<compile_context>
chip_gen: v6e
topology: v6e:2x2x1
jax: 0.10.0
libtpu: 0.0.40
codegen_flags: <defaults>
</compile_context>

<pallas_src>
import jax
import jax.numpy as jnp
from jax import lax
from jax.experimental import pallas as pl
from jax.experimental.pallas import tpu as pltpu  # noqa: F401  (TPU backend)

LRELU_SLOPE = 0.2
BN_EPS = 1e-5


def _pick_mxu_dtype():
    """bf16 MXU operands on bf16-native chips (v6e / v7x); f32 elsewhere."""
    try:
        kind = jax.devices()[0].device_kind.lower()
    except Exception:
        return jnp.float32
    if ("v6" in kind) or ("v7" in kind) or ("7x" in kind):
        return jnp.bfloat16
    return jnp.float32


MXU_DTYPE = _pick_mxu_dtype()


# ----------------------------- Pallas kernels ------------------------------


def _gemm_lrelu_kernel(a_ref, b_ref, o_ref):
    """GEMM (MXU, f32 accumulation) + fused LeakyReLU(0.2)."""
    acc = jnp.dot(a_ref[...], b_ref[...], preferred_element_type=jnp.float32)
    o_ref[...] = jnp.where(acc > 0, acc, LRELU_SLOPE * acc).astype(o_ref.dtype)


def _gemm_bn_lrelu_kernel(a_ref, b_ref, g_ref, beta_ref, o_ref):
    """GEMM + BatchNorm (batch stats over rows, biased var, f32) + LeakyReLU,
    all while the (M, C) result block is resident in VMEM."""
    acc = jnp.dot(a_ref[...], b_ref[...], preferred_element_type=jnp.float32)
    m = jnp.mean(acc, axis=0, keepdims=True)
    v = jnp.mean((acc - m) ** 2, axis=0, keepdims=True)
    y = (acc - m) * lax.rsqrt(v + BN_EPS) * g_ref[...] + beta_ref[...]
    o_ref[...] = jnp.where(y > 0, y, LRELU_SLOPE * y).astype(o_ref.dtype)


def _gemm_bn_lrelu_head_kernel(a_ref, b_ref, g_ref, beta_ref, w3_ref, seg_ref, o_ref):
    """Block-2 GEMM + BN + LeakyReLU, then the fused head:
    the 3x3x256->1 conv covers the whole 3x3 spatial extent, so per sample it is
    just sum_{r,c} h2[r, c] * w3[r, c]; `seg_ref` (B, M) sums rows per sample.
    Ends with the sigmoid, writing only the tiny (B, 1) result to HBM."""
    acc = jnp.dot(a_ref[...], b_ref[...], preferred_element_type=jnp.float32)
    m = jnp.mean(acc, axis=0, keepdims=True)
    v = jnp.mean((acc - m) ** 2, axis=0, keepdims=True)
    h = (acc - m) * lax.rsqrt(v + BN_EPS) * g_ref[...] + beta_ref[...]
    h = jnp.where(h > 0, h, LRELU_SLOPE * h)                       # (M, C)
    contrib = h * w3_ref[...]                                      # (M, C)
    part = jnp.dot(seg_ref[...], contrib,
                   preferred_element_type=jnp.float32)             # (B, C)
    logit = jnp.sum(part, axis=1, keepdims=True)                   # (B, 1)
    o_ref[...] = jax.nn.sigmoid(logit).astype(o_ref.dtype)


# --------------------------- pallas_call wrappers ---------------------------
# Whole problem fits in VMEM at these sizes -> full-array blocks, no grid.


def gemm_lrelu(a, b):
    M, K = a.shape
    _, N = b.shape
    return pl.pallas_call(
        _gemm_lrelu_kernel,
        out_shape=jax.ShapeDtypeStruct((M, N), jnp.float32),
        in_specs=[
            pl.BlockSpec((M, K), lambda: (0, 0)),
            pl.BlockSpec((K, N), lambda: (0, 0)),
        ],
        out_specs=pl.BlockSpec((M, N), lambda: (0, 0)),
    )(a, b)


def gemm_bn_lrelu(a, b, gamma, beta):
    M, K = a.shape
    _, N = b.shape
    return pl.pallas_call(
        _gemm_bn_lrelu_kernel,
        out_shape=jax.ShapeDtypeStruct((M, N), jnp.float32),
        in_specs=[
            pl.BlockSpec((M, K), lambda: (0, 0)),
            pl.BlockSpec((K, N), lambda: (0, 0)),
            pl.BlockSpec((1, N), lambda: (0, 0)),
            pl.BlockSpec((1, N), lambda: (0, 0)),
        ],
        out_specs=pl.BlockSpec((M, N), lambda: (0, 0)),
    )(a, b,
      gamma.reshape(1, N).astype(jnp.float32),
      beta.reshape(1, N).astype(jnp.float32))


def gemm_bn_lrelu_head(a, b, gamma, beta, w3_rows, segmat):
    M, K = a.shape
    _, N = b.shape
    B = segmat.shape[0]
    return pl.pallas_call(
        _gemm_bn_lrelu_head_kernel,
        out_shape=jax.ShapeDtypeStruct((B, 1), jnp.float32),
        in_specs=[
            pl.BlockSpec((M, K), lambda: (0, 0)),
            pl.BlockSpec((K, N), lambda: (0, 0)),
            pl.BlockSpec((1, N), lambda: (0, 0)),
            pl.BlockSpec((1, N), lambda: (0, 0)),
            pl.BlockSpec((M, N), lambda: (0, 0)),
            pl.BlockSpec((B, M), lambda: (0, 0)),
        ],
        out_specs=pl.BlockSpec((B, 1), lambda: (0, 0)),
    )(a, b,
      gamma.reshape(1, N).astype(jnp.float32),
      beta.reshape(1, N).astype(jnp.float32),
      w3_rows.astype(jnp.float32),
      segmat.astype(jnp.float32))


# ------------------------------ JAX-side glue -------------------------------


def im2col_nhwc(x, kh, kw, stride, pad):
    """x: NHWC -> (N*OH*OW, kh*kw*C) patch matrix, (kh, kw, C) flatten order.
    Pure strided-slice/stack/reshape -> fuses into cheap XLA ops, no transposes."""
    N, H, W, C = x.shape
    if pad:
        x = jnp.pad(x, ((0, 0), (pad, pad), (pad, pad), (0, 0)))
    Hp, Wp = H + 2 * pad, W + 2 * pad
    OH = (Hp - kh) // stride + 1
    OW = (Wp - kw) // stride + 1
    taps = []
    for i in range(kh):
        for j in range(kw):
            taps.append(x[:, i:i + stride * OH:stride, j:j + stride * OW:stride, :])
    p = jnp.stack(taps, axis=3)                      # (N, OH, OW, kh*kw, C)
    return p.reshape(N * OH * OW, kh * kw * C), (N, OH, OW)


def _w_nhwc(w):
    """PyTorch OIHW conv weight -> (kh*kw*I, O), matching im2col_nhwc order."""
    O, I, kh, kw = w.shape
    return jnp.transpose(w, (2, 3, 1, 0)).reshape(kh * kw * I, O)


def discriminator_forward(params, x, y):
    B = x.shape[0]
    mxu_dt = MXU_DTYPE

    # --- NHWC throughout (channels on the 128-lane axis) ---------------------
    x = jnp.transpose(x, (0, 2, 3, 1))
    y = jnp.transpose(y, (0, 2, 3, 1))
    xy = jnp.concatenate([x, y], axis=-1)            # (B, H, W, 1 + n_classes)

    # --- merged layer_x / layer_y: block-diagonal weight -> one GEMM ---------
    w_x, w_y = params["w_x"], params["w_y"]          # (32,1,4,4), (32,nc,4,4)
    ox, cx = w_x.shape[0], w_x.shape[1]
    oy, cy = w_y.shape[0], w_y.shape[1]
    kh0, kw0 = w_x.shape[2], w_x.shape[3]
    co = ox + oy
    w0 = jnp.zeros((kh0, kw0, cx + cy, co), jnp.float32)
    w0 = w0.at[:, :, :cx, :ox].set(jnp.transpose(w_x, (2, 3, 1, 0)))
    w0 = w0.at[:, :, cx:, ox:].set(jnp.transpose(w_y, (2, 3, 1, 0)))
    w0 = w0.reshape(kh0 * kw0 * (cx + cy), co)       # (80, 64)

    p0, d0 = im2col_nhwc(xy, kh0, kw0, 2, 1)
    h0 = gemm_lrelu(p0.astype(mxu_dt), w0.astype(mxu_dt))        # (B*16*16, 64)
    h0 = h0.reshape(d0[0], d0[1], d0[2], co)                     # NHWC

    # --- block 1: Conv(64->128, k4,s2,p1) + BN + LReLU (fused epilogue) ------
    n1 = params["w1"].shape[0]
    p1, d1 = im2col_nhwc(h0, 4, 4, 2, 1)
    h1 = gemm_bn_lrelu(p1.astype(mxu_dt), _w_nhwc(params["w1"]).astype(mxu_dt),
                       params["g1"], params["b1"])               # (B*8*8, 128)
    h1 = h1.reshape(d1[0], d1[1], d1[2], n1)                     # NHWC

    # --- block 2 + head: Conv(128->256,k3,s2,p0) + BN + LReLU, then the
    #     Conv(256->1,k3,s1,p0) + Sigmoid fused as a per-sample contraction ----
    n2 = params["w2"].shape[0]
    p2, d2 = im2col_nhwc(h1, 3, 3, 2, 0)                         # (B*3*3, 1152)
    kh3, kw3 = params["w3"].shape[2], params["w3"].shape[3]
    # the fused head assumes the last conv covers the whole remaining spatial
    # extent (true for 32x32 inputs, as in the PyTorch module's intended use)
    assert (d2[1], d2[2]) == (kh3, kw3), (d2, (kh3, kw3))
    rows = d2[1] * d2[2]
    M2 = p2.shape[0]
    w3_rows = jnp.transpose(params["w3"][0], (1, 2, 0)).reshape(rows, n2)
    w3_tiled = jnp.tile(w3_rows, (B, 1))                         # (M2, 256)
    segmat = (jnp.arange(M2)[None, :] // rows
              == jnp.arange(B)[:, None]).astype(jnp.float32)     # (B, M2)

    out = gemm_bn_lrelu_head(p2.astype(mxu_dt), _w_nhwc(params["w2"]).astype(mxu_dt),
                             params["g2"], params["b2"], w3_tiled, segmat)
    return out                                                   # (B, 1) == xy.view(B,-1)


# ------------------------- pure-JAX reference check --------------------------


def reference_forward(params, x, y):
    def conv(v, w, stride, pad):
        return lax.conv_general_dilated(
            v, w, (stride, stride), [(pad, pad), (pad, pad)],
            dimension_numbers=("NCHW", "OIHW", "NCHW"),
        )

    def lrelu(v):
        return jnp.where(v > 0, v, LRELU_SLOPE * v)

    def bn(v, g, b):
        m = v.mean(axis=(0, 2, 3), keepdims=True)
        var = ((v - m) ** 2).mean(axis=(0, 2, 3), keepdims=True)
        return (v - m) * lax.rsqrt(var + BN_EPS) * g.reshape(1, -1, 1, 1) + b.reshape(
            1, -1, 1, 1
        )

    hx = lrelu(conv(x, params["w_x"], 2, 1))
    hy = lrelu(conv(y, params["w_y"], 2, 1))
    h = jnp.concatenate([hx, hy], axis=1)
    h = lrelu(bn(conv(h, params["w1"], 2, 1), params["g1"], params["b1"]))
    h = lrelu(bn(conv(h, params["w2"], 2, 0), params["g2"], params["b2"]))
    h = jax.nn.sigmoid(conv(h, params["w3"], 1, 0))
    return h.reshape(h.shape[0], -1)


# ----------------------------------- main ------------------------------------

if __name__ == "__main__":
    B, N_CLASSES, H, W = 2, 4, 32, 32  # 32x32 input -> final (B, 1) as in PyTorch

    key = jax.random.PRNGKey(0)
    keys = jax.random.split(key, 10)

    def nrm(k, shape, scale=0.02):
        return scale * jax.random.normal(k, shape, dtype=jnp.float32)

    params = {
        "w_x": nrm(keys[0], (32, 1, 4, 4)),
        "w_y": nrm(keys[1], (32, N_CLASSES, 4, 4)),
        "w1": nrm(keys[2], (128, 64, 4, 4)),
        "g1": 1.0 + nrm(keys[3], (128,)),
        "b1": nrm(keys[4], (128,)),
        "w2": nrm(keys[5], (256, 128, 3, 3)),
        "g2": 1.0 + nrm(keys[6], (256,)),
        "b2": nrm(keys[7], (256,)),
        "w3": nrm(keys[8], (1, 256, 3, 3)),
    }

    kx, ky = jax.random.split(keys[9])
    x = jax.random.normal(kx, (B, 1, H, W), dtype=jnp.float32)
    y = jax.random.normal(ky, (B, N_CLASSES, H, W), dtype=jnp.float32)

    out = jax.jit(discriminator_forward)(params, x, y)
    out = jax.block_until_ready(out)
    assert out.shape == (B, 1), out.shape

    ref = jax.block_until_ready(reference_forward(params, x, y))
    # tolerance covers the optional bf16 MXU-operand path on v6e/v7x
    assert jnp.allclose(out, ref, atol=2.5e-2, rtol=2.5e-2), (out, ref)

    print("KERNEL_OK")
</pallas_src>

<mosaic_0001>
module attributes {stable_mosaic.version = 11 : i64} {
  func.func @_gemm_lrelu_kernel(%arg0: memref<512x80xf32, #tpu.memory_space<vmem>>, %arg1: memref<80x64xf32, #tpu.memory_space<vmem>>, %arg2: memref<512x64xf32, #tpu.memory_space<vmem>>) attributes {dimension_semantics = [], scalar_prefetch = 0 : i64, scratch_operands = 0 : i64, tpu.core_type = #tpu.core_type<tc>} {
    %c0 = arith.constant 0 : index
    %c0_0 = arith.constant 0 : index
    %0 = vector.load %arg0[%c0, %c0_0] : memref<512x80xf32, #tpu.memory_space<vmem>>, vector<512x80xf32>
    %c0_1 = arith.constant 0 : index
    %c0_2 = arith.constant 0 : index
    %1 = vector.load %arg1[%c0_1, %c0_2] : memref<80x64xf32, #tpu.memory_space<vmem>>, vector<80x64xf32>
    %cst = arith.constant dense<0.000000e+00> : vector<512x64xf32>
    %2 = tpu.matmul %0, %1, %cst {dimension_numbers = #tpu.dot_dimension_numbers<[1], [0], [0], [1], [0, 0, 1, 1], [], []>} : vector<512x80xf32>, vector<80x64xf32>, vector<512x64xf32> -> vector<512x64xf32>
    %cst_3 = arith.constant 0.000000e+00 : f32
    %3 = vector.broadcast %cst_3 : f32 to vector<512x64xf32>
    %4 = arith.cmpf ogt, %2, %3 : vector<512x64xf32>
    %cst_4 = arith.constant 2.000000e-01 : f32
    %5 = vector.broadcast %cst_4 : f32 to vector<512x64xf32>
    %6 = arith.mulf %5, %2 : vector<512x64xf32>
    %7 = arith.select %4, %2, %6 : vector<512x64xi1>, vector<512x64xf32>
    %c0_5 = arith.constant 0 : index
    %c0_6 = arith.constant 0 : index
    %8 = vector.load %arg2[%c0_5, %c0_6] : memref<512x64xf32, #tpu.memory_space<vmem>>, vector<512x64xf32>
    tpu.vector_store %arg2[%c0_5, %c0_6], %7 {strides = array<i32>} : memref<512x64xf32, #tpu.memory_space<vmem>>, vector<512x64xf32>,
    return
  }
}

module attributes {stable_mosaic.version = 11 : i64} {
  func.func @_gemm_bn_lrelu_kernel(%arg0: memref<128x1024xf32, #tpu.memory_space<vmem>>, %arg1: memref<1024x128xf32, #tpu.memory_space<vmem>>, %arg2: memref<1x128xf32, #tpu.memory_space<vmem>>, %arg3: memref<1x128xf32, #tpu.memory_space<vmem>>, %arg4: memref<128x128xf32, #tpu.memory_space<vmem>>) attributes {dimension_semantics = [], scalar_prefetch = 0 : i64, scratch_operands = 0 : i64, tpu.core_type = #tpu.core_type<tc>} {
    %c0 = arith.constant 0 : index
    %c0_0 = arith.constant 0 : index
    %0 = vector.load %arg0[%c0, %c0_0] : memref<128x1024xf32, #tpu.memory_space<vmem>>, vector<128x1024xf32>
    %c0_1 = arith.constant 0 : index
    %c0_2 = arith.constant 0 : index
    %1 = vector.load %arg1[%c0_1, %c0_2] : memref<1024x128xf32, #tpu.memory_space<vmem>>, vector<1024x128xf32>
    %cst = arith.constant dense<0.000000e+00> : vector<128x128xf32>
    %2 = tpu.matmul %0, %1, %cst {dimension_numbers = #tpu.dot_dimension_numbers<[1], [0], [0], [1], [0, 0, 1, 1], [], []>} : vector<128x1024xf32>, vector<1024x128xf32>, vector<128x128xf32> -> vector<128x128xf32>
    %cst_3 = arith.constant dense<0.000000e+00> : vector<128xf32>
    %3 = vector.multi_reduction <add>, %2, %cst_3 [0] : vector<128x128xf32> to vector<128xf32>
    %4 = vector.shape_cast %3 : vector<128xf32> to vector<1x128xf32>
    %cst_4 = arith.constant 1.280000e+02 : f32
    %5 = vector.broadcast %cst_4 : f32 to vector<1x128xf32>
    %6 = arith.divf %4, %5 : vector<1x128xf32>
    %7 = vector.broadcast %6 : vector<1x128xf32> to vector<128x128xf32>
    %8 = arith.subf %2, %7 : vector<128x128xf32>
    %9 = arith.mulf %8, %8 : vector<128x128xf32>
    %cst_5 = arith.constant dense<0.000000e+00> : vector<128xf32>
    %10 = vector.multi_reduction <add>, %9, %cst_5 [0] : vector<128x128xf32> to vector<128xf32>
    %11 = vector.shape_cast %10 : vector<128xf32> to vector<1x128xf32>
    %cst_6 = arith.constant 1.280000e+02 : f32
    %12 = vector.broadcast %cst_6 : f32 to vector<1x128xf32>
    %13 = arith.divf %11, %12 : vector<1x128xf32>
    %14 = vector.broadcast %6 : vector<1x128xf32> to vector<128x128xf32>
    %15 = arith.subf %2, %14 : vector<128x128xf32>
    %cst_7 = arith.constant 9.99999974E-6 : f32
    %16 = vector.broadcast %cst_7 : f32 to vector<1x128xf32>
    %17 = arith.addf %13, %16 : vector<1x128xf32>
    %18 = math.rsqrt %17 : vector<1x128xf32>
    %19 = vector.broadcast %18 : vector<1x128xf32> to vector<128x128xf32>
    %20 = arith.mulf %15, %19 : vector<128x128xf32>
    %c0_8 = arith.constant 0 : index
    %c0_9 = arith.constant 0 : index
    %21 = vector.load %arg2[%c0_8, %c0_9] : memref<1x128xf32, #tpu.memory_space<vmem>>, vector<1x128xf32>
    %22 = vector.broadcast %21 : vector<1x128xf32> to vector<128x128xf32>
    %23 = arith.mulf %20, %22 : vector<128x128xf32>
    %c0_10 = arith.constant 0 : index
    %c0_11 = arith.constant 0 : index
    %24 = vector.load %arg3[%c0_10, %c0_11] : memref<1x128xf32, #tpu.memory_space<vmem>>, vector<1x128xf32>
    %25 = vector.broadcast %24 : vector<1x128xf32> to vector<128x128xf32>
    %26 = arith.addf %23, %25 : vector<128x128xf32>
    %cst_12 = arith.constant 0.000000e+00 : f32
    %27 = vector.broadcast %cst_12 : f32 to vector<128x128xf32>
    %28 = arith.cmpf ogt, %26, %27 : vector<128x128xf32>
    %cst_13 = arith.constant 2.000000e-01 : f32
    %29 = vector.broadcast %cst_13 : f32 to vector<128x128xf32>
    %30 = arith.mulf %29, %26 : vector<128x128xf32>
    %31 = arith.select %28, %26, %30 : vector<128x128xi1>, vector<128x128xf32>
    %c0_14 = arith.constant 0 : index
    %c0_15 = arith.constant 0 : index
    %32 = vector.load %arg4[%c0_14, %c0_15] : memref<128x128xf32, #tpu.memory_space<vmem>>, vector<128x128xf32>
    tpu.vector_store %arg4[%c0_14, %c0_15], %31 {strides = array<i32>} : memref<128x128xf32, #tpu.memory_space<vmem>>, vector<128x128xf32>,
    return
  }
}

module attributes {stable_mosaic.version = 11 : i64} {
  func.func @_gemm_bn_lrelu_head_kernel(%arg0: memref<18x1152xf32, #tpu.memory_space<vmem>>, %arg1: memref<1152x256xf32, #tpu.memory_space<vmem>>, %arg2: memref<1x256xf32, #tpu.memory_space<vmem>>, %arg3: memref<1x256xf32, #tpu.memory_space<vmem>>, %arg4: memref<18x256xf32, #tpu.memory_space<vmem>>, %arg5: memref<2x18xf32, #tpu.memory_space<vmem>>, %arg6: memref<2x1xf32, #tpu.memory_space<vmem>>) attributes {dimension_semantics = [], scalar_prefetch = 0 : i64, scratch_operands = 0 : i64, tpu.core_type = #tpu.core_type<tc>} {
    %c0 = arith.constant 0 : index
    %c0_0 = arith.constant 0 : index
    %0 = vector.load %arg0[%c0, %c0_0] : memref<18x1152xf32, #tpu.memory_space<vmem>>, vector<18x1152xf32>
    %c0_1 = arith.constant 0 : index
    %c0_2 = arith.constant 0 : index
    %1 = vector.load %arg1[%c0_1, %c0_2] : memref<1152x256xf32, #tpu.memory_space<vmem>>, vector<1152x256xf32>
    %cst = arith.constant dense<0.000000e+00> : vector<18x256xf32>
    %2 = tpu.matmul %0, %1, %cst {dimension_numbers = #tpu.dot_dimension_numbers<[1], [0], [0], [1], [0, 0, 1, 1], [], []>} : vector<18x1152xf32>, vector<1152x256xf32>, vector<18x256xf32> -> vector<18x256xf32>
    %cst_3 = arith.constant dense<0.000000e+00> : vector<256xf32>
    %3 = vector.multi_reduction <add>, %2, %cst_3 [0] : vector<18x256xf32> to vector<256xf32>
    %4 = vector.shape_cast %3 : vector<256xf32> to vector<1x256xf32>
    %cst_4 = arith.constant 1.800000e+01 : f32
    %5 = vector.broadcast %cst_4 : f32 to vector<1x256xf32>
    %6 = arith.divf %4, %5 : vector<1x256xf32>
    %7 = vector.broadcast %6 : vector<1x256xf32> to vector<18x256xf32>
    %8 = arith.subf %2, %7 : vector<18x256xf32>
    %9 = arith.mulf %8, %8 : vector<18x256xf32>
    %cst_5 = arith.constant dense<0.000000e+00> : vector<256xf32>
    %10 = vector.multi_reduction <add>, %9, %cst_5 [0] : vector<18x256xf32> to vector<256xf32>
    %11 = vector.shape_cast %10 : vector<256xf32> to vector<1x256xf32>
    %cst_6 = arith.constant 1.800000e+01 : f32
    %12 = vector.broadcast %cst_6 : f32 to vector<1x256xf32>
    %13 = arith.divf %11, %12 : vector<1x256xf32>
    %14 = vector.broadcast %6 : vector<1x256xf32> to vector<18x256xf32>
    %15 = arith.subf %2, %14 : vector<18x256xf32>
    %cst_7 = arith.constant 9.99999974E-6 : f32
    %16 = vector.broadcast %cst_7 : f32 to vector<1x256xf32>
    %17 = arith.addf %13, %16 : vector<1x256xf32>
    %18 = math.rsqrt %17 : vector<1x256xf32>
    %19 = vector.broadcast %18 : vector<1x256xf32> to vector<18x256xf32>
    %20 = arith.mulf %15, %19 : vector<18x256xf32>
    %c0_8 = arith.constant 0 : index
    %c0_9 = arith.constant 0 : index
    %21 = vector.load %arg2[%c0_8, %c0_9] : memref<1x256xf32, #tpu.memory_space<vmem>>, vector<1x256xf32>
    %22 = vector.broadcast %21 : vector<1x256xf32> to vector<18x256xf32>
    %23 = arith.mulf %20, %22 : vector<18x256xf32>
    %c0_10 = arith.constant 0 : index
    %c0_11 = arith.constant 0 : index
    %24 = vector.load %arg3[%c0_10, %c0_11] : memref<1x256xf32, #tpu.memory_space<vmem>>, vector<1x256xf32>
    %25 = vector.broadcast %24 : vector<1x256xf32> to vector<18x256xf32>
    %26 = arith.addf %23, %25 : vector<18x256xf32>
    %cst_12 = arith.constant 0.000000e+00 : f32
    %27 = vector.broadcast %cst_12 : f32 to vector<18x256xf32>
    %28 = arith.cmpf ogt, %26, %27 : vector<18x256xf32>
    %cst_13 = arith.constant 2.000000e-01 : f32
    %29 = vector.broadcast %cst_13 : f32 to vector<18x256xf32>
    %30 = arith.mulf %29, %26 : vector<18x256xf32>
    %31 = arith.select %28, %26, %30 : vector<18x256xi1>, vector<18x256xf32>
    %c0_14 = arith.constant 0 : index
    %c0_15 = arith.constant 0 : index
    %32 = vector.load %arg4[%c0_14, %c0_15] : memref<18x256xf32, #tpu.memory_space<vmem>>, vector<18x256xf32>
    %33 = arith.mulf %31, %32 : vector<18x256xf32>
    %c0_16 = arith.constant 0 : index
    %c0_17 = arith.constant 0 : index
    %34 = vector.load %arg5[%c0_16, %c0_17] : memref<2x18xf32, #tpu.memory_space<vmem>>, vector<2x18xf32>
    %cst_18 = arith.constant dense<0.000000e+00> : vector<2x256xf32>
    %35 = tpu.matmul %34, %33, %cst_18 {dimension_numbers = #tpu.dot_dimension_numbers<[1], [0], [0], [1], [0, 0, 1, 1], [], []>} : vector<2x18xf32>, vector<18x256xf32>, vector<2x256xf32> -> vector<2x256xf32>
    %cst_19 = arith.constant dense<0.000000e+00> : vector<2xf32>
    %36 = vector.multi_reduction <add>, %35, %cst_19 [1] : vector<2x256xf32> to vector<2xf32>
    %37 = vector.shape_cast %36 : vector<2xf32> to vector<2x1xf32>
    %38 = arith.negf %37 : vector<2x1xf32>
    %39 = math.exp %38 : vector<2x1xf32>
    %cst_20 = arith.constant 1.000000e+00 : f32
    %40 = vector.broadcast %cst_20 : f32 to vector<2x1xf32>
    %41 = arith.addf %40, %39 : vector<2x1xf32>
    %42 = arith.divf %40, %41 : vector<2x1xf32>
    %c0_21 = arith.constant 0 : index
    %c0_22 = arith.constant 0 : index
    %43 = vector.load %arg6[%c0_21, %c0_22] : memref<2x1xf32, #tpu.memory_space<vmem>>, vector<2x1xf32>
    tpu.vector_store %arg6[%c0_21, %c0_22], %42 {strides = array<i32>} : memref<2x1xf32, #tpu.memory_space<vmem>>, vector<2x1xf32>,
    return
  }
}

</mosaic_0001>

<bundles_post_ra>
// kernel: discriminator_forward.3
= control target key start
LH: loop header
LB: loop body
LE: loop exit
PB: predicated region body
PF: predicated region fallthrough
CT: control target
= control target key end

     0   :  { %vm85_vm0 = vcmask 654336   ;;  %vm855_vm1 = vcmask 523264   ;;  %s1755_s1 = inlined_call_operand.vmem [shape: f32[80,64], index: 1, kind: input, shape index: {}]   ;;  %s1756_s0 = inlined_call_operand.vmem [shape: f32[512,80], index: 0, kind: input, shape index: {}]   ;;  %s1757_s2 = inlined_call_operand.vmem [shape: f32[512,64], index: 2, kind: output, shape index: {}]  }
   0x1   :  { %v84_v0 = vld [vmem:[%s1755_s1 + $0x48] sm:$0xff]  ;;  %v83_v1 = vld [vmem:[%s1755_s1 + $0x40] sm:$0xff]  ;;  %v82_v2 = vld [vmem:[%s1755_s1 + $0x38] sm:$0xff] }
   0x2   :  { %1062 = vmatprep.subr.mxu0 %v84_v0  ;;  %1178 = vmatprep.subr.mxu1 %v84_v0  ;;  %v81_v3 = vld [vmem:[%s1755_s1 + $0x30] sm:$0xff]  ;;  %v80_v4 = vld [vmem:[%s1755_s1 + $0x28] sm:$0xff]  ;;  %v79_v5 = vld [vmem:[%s1755_s1 + $0x20] sm:$0xff] }
   0x3   :  { %1063 = vmatpush3.msra.mxu0 %v84_v0  ;;  %1188 = vmatpush3.msra.mxu1 %v84_v0  ;;  %v78_v6 = vld [vmem:[%s1755_s1 + $0x18] sm:$0xff]  ;;  %v77_v7 = vld [vmem:[%s1755_s1 + $0x10] sm:$0xff]  ;;  %v76_v8 = vld [vmem:[%s1755_s1 + $0x8] sm:$0xff] }
   0x4   :  { %1064 = vmatprep.subr.mxu0 %v83_v1  ;;  %1179 = vmatprep.subr.mxu1 %v83_v1  ;;  %v75_v9 = vld [vmem:[%s1755_s1] sm:$0xff]  ;;  %v12_v12 = vld [vmem:[%s1756_s0 + $0x8] sm:$0xff]  ;;  %v13_v14 = vld [vmem:[%s1756_s0 + $0x10] sm:$0xff] }
   0x5   :  { %1065 = vmatpush3.msra.mxu0 %v83_v1  ;;  %1189 = vmatpush3.msra.mxu1 %v83_v1  ;;  %v11_v10 = vld [vmem:[%s1756_s0] sm:$0xff]  ;;  %v44_v13 = vld [vmem:[%s1756_s0 + $0x108] sm:$0xff]  ;;  %v45_v15 = vld [vmem:[%s1756_s0 + $0x110] sm:$0xff] }
   0x6   :  { %1066 = vmatprep.subr.mxu0 %v82_v2  ;;  %1180 = vmatprep.subr.mxu1 %v82_v2  ;;  %v43_v11 = vld [vmem:[%s1756_s0 + $0x100] sm:$0xff]  ;;  %v14_v16 = vld [vmem:[%s1756_s0 + $0x18] sm:$0xff]  ;;  %v16_v20 = vld [vmem:[%s1756_s0 + $0x28] sm:$0xff] }
   0x7   :  { %1067 = vmatpush3.msra.mxu0 %v82_v2  ;;  %1190 = vmatpush3.msra.mxu1 %v82_v2  ;;  %v46_v17 = vld [vmem:[%s1756_s0 + $0x118] sm:$0xff]  ;;  %v15_v18 = vld [vmem:[%s1756_s0 + $0x20] sm:$0xff]  ;;  %v48_v21 = vld [vmem:[%s1756_s0 + $0x128] sm:$0xff] }
   0x8   :  { %1068 = vmatprep.subr.mxu0 %v81_v3  ;;  %1181 = vmatprep.subr.mxu1 %v81_v3  ;;  %v47_v19 = vld [vmem:[%s1756_s0 + $0x120] sm:$0xff]  ;;  %v17_v22 = vld [vmem:[%s1756_s0 + $0x30] sm:$0xff]  ;;  %v18_v24 = vld [vmem:[%s1756_s0 + $0x38] sm:$0xff] }
   0x9   :  { %1069 = vmatpush3.msra.mxu0 %v81_v3  ;;  %1191 = vmatpush3.msra.mxu1 %v81_v3  ;;  %v49_v23 = vld [vmem:[%s1756_s0 + $0x130] sm:$0xff]  ;;  %v50_v25 = vld [vmem:[%s1756_s0 + $0x138] sm:$0xff]  ;;  %v19_v26 = vld [vmem:[%s1756_s0 + $0x40] sm:$0xff] }
   0xa   :  { %1070 = vmatprep.subr.mxu0 %v80_v4  ;;  %1182 = vmatprep.subr.mxu1 %v80_v4  ;;  %v51_v27 = vld [vmem:[%s1756_s0 + $0x140] sm:$0xff]  ;;  %v20_v28 = vld [vmem:[%s1756_s0 + $0x48] sm:$0xff]  ;;  %v21_v30 = vld [vmem:[%s1756_s0 + $0x50] sm:$0xff] }
   0xb   :  { %1071 = vmatpush3.msra.mxu0 %v80_v4  ;;  %1192 = vmatpush3.msra.mxu1 %v80_v4  ;;  %v52_v29 = vld [vmem:[%s1756_s0 + $0x148] sm:$0xff]  ;;  %v53_v31 = vld [vmem:[%s1756_s0 + $0x150] sm:$0xff]  ;;  %v22_v32 = vld [vmem:[%s1756_s0 + $0x58] sm:$0xff] }
   0xc   :  { %1072 = vmatprep.subr.mxu0 %v79_v5  ;;  %1183 = vmatprep.subr.mxu1 %v79_v5  ;;  %v54_v33 = vld [vmem:[%s1756_s0 + $0x158] sm:$0xff]  ;;  %v23_v34 = vld [vmem:[%s1756_s0 + $0x60] sm:$0xff]  ;;  %v24_v36 = vld [vmem:[%s1756_s0 + $0x68] sm:$0xff] }
   0xd   :  { %1073 = vmatpush3.msra.mxu0 %v79_v5  ;;  %1193 = vmatpush3.msra.mxu1 %v79_v5  ;;  %v55_v35 = vld [vmem:[%s1756_s0 + $0x160] sm:$0xff]  ;;  %v56_v37 = vld [vmem:[%s1756_s0 + $0x168] sm:$0xff]  ;;  %v25_v38 = vld [vmem:[%s1756_s0 + $0x70] sm:$0xff] }
   0xe   :  { %1074 = vmatprep.subr.mxu0 %v78_v6  ;;  %1184 = vmatprep.subr.mxu1 %v78_v6  ;;  %v57_v39 = vld [vmem:[%s1756_s0 + $0x170] sm:$0xff]  ;;  %v26_v40 = vld [vmem:[%s1756_s0 + $0x78] sm:$0xff]  ;;  %v27_v42 = vld [vmem:[%s1756_s0 + $0x80] sm:$0xff] }
   0xf   :  { %1075 = vmatpush3.msra.mxu0 %v78_v6  ;;  %1194 = vmatpush3.msra.mxu1 %v78_v6  ;;  %v58_v41 = vld [vmem:[%s1756_s0 + $0x178] sm:$0xff]  ;;  %v59_v43 = vld [vmem:[%s1756_s0 + $0x180] sm:$0xff]  ;;  %v28_v44 = vld [vmem:[%s1756_s0 + $0x88] sm:$0xff] }
  0x10   :  { %1076 = vmatprep.subr.mxu0 %v77_v7  ;;  %1185 = vmatprep.subr.mxu1 %v77_v7  ;;  %v60_v45 = vld [vmem:[%s1756_s0 + $0x188] sm:$0xff]  ;;  %v29_v46 = vld [vmem:[%s1756_s0 + $0x90] sm:$0xff]  ;;  %v30_v48 = vld [vmem:[%s1756_s0 + $0x98] sm:$0xff] }
  0x11   :  { %1077 = vmatpush3.msra.mxu0 %v77_v7  ;;  %1195 = vmatpush3.msra.mxu1 %v77_v7  ;;  %v61_v47 = vld [vmem:[%s1756_s0 + $0x190] sm:$0xff]  ;;  %v62_v49 = vld [vmem:[%s1756_s0 + $0x198] sm:$0xff]  ;;  %v31_v50 = vld [vmem:[%s1756_s0 + $0xa0] sm:$0xff] }
  0x12   :  { %1078 = vmatprep.subr.mxu0 %v76_v8  ;;  %1186 = vmatprep.subr.mxu1 %v76_v8  ;;  %v63_v51 = vld [vmem:[%s1756_s0 + $0x1a0] sm:$0xff]  ;;  %v32_v52 = vld [vmem:[%s1756_s0 + $0xa8] sm:$0xff]  ;;  %v33_v54 = vld [vmem:[%s1756_s0 + $0xb0] sm:$0xff] }
  0x13   :  { %1079 = vmatpush3.msra.mxu0 %v76_v8  ;;  %1196 = vmatpush3.msra.mxu1 %v76_v8  ;;  %v64_v53 = vld [vmem:[%s1756_s0 + $0x1a8] sm:$0xff]  ;;  %v65_v55 = vld [vmem:[%s1756_s0 + $0x1b0] sm:$0xff]  ;;  %v34_v56 = vld [vmem:[%s1756_s0 + $0xb8] sm:$0xff] }
  0x14   :  { %1080 = vmatprep.subr.mxu0 %v75_v9  ;;  %1187 = vmatprep.subr.mxu1 %v75_v9  ;;  %v66_v57 = vld [vmem:[%s1756_s0 + $0x1b8] sm:$0xff]  ;;  %v35_v58 = vld [vmem:[%s1756_s0 + $0xc0] sm:$0xff]  ;;  %v36_v60 = vld [vmem:[%s1756_s0 + $0xc8] sm:$0xff] }
  0x15   :  { %1081 = vmatpush3.msra.mxu0 %v75_v9  ;;  %1197 = vmatpush3.msra.mxu1 %v75_v9  ;;  %v67_v59 = vld [vmem:[%s1756_s0 + $0x1c0] sm:$0xff]  ;;  %v68_v61 = vld [vmem:[%s1756_s0 + $0x1c8] sm:$0xff]  ;;  %v37_v62 = vld [vmem:[%s1756_s0 + $0xd0] sm:$0xff] }
  0x16   :  { %1082 = vmatprep.mubr.msk.f32.mxu0 %vm85_vm0, %v11_v10  ;;  %1130 = vmatprep.mubr.msk.f32.mxu1 %vm85_vm0, %v43_v11  ;;  %v69_v63 = vld [vmem:[%s1756_s0 + $0x1d0] sm:$0xff]  ;;  %v38_v0 = vld [vmem:[%s1756_s0 + $0xd8] sm:$0xff]  ;;  %v39_v2 = vld [vmem:[%s1756_s0 + $0xe0] sm:$0xff] }
  0x17   :  { %1083 = vmatmul.mubr.msk.f32.vlgmr.msra.gmra.mxu0 %vm85_vm0, %v12_v12  ;;  %1131 = vmatmul.mubr.msk.f32.vlgmr.msra.gmra.mxu1 %vm85_vm0, %v44_v13  ;;  %v70_v1 = vld [vmem:[%s1756_s0 + $0x1d8] sm:$0xff]  ;;  %v71_v3 = vld [vmem:[%s1756_s0 + $0x1e0] sm:$0xff]  ;;  %v40_v4 = vld [vmem:[%s1756_s0 + $0xe8] sm:$0xff] }
  0x18   :  { %1085 = vmatprep.mubr.msk.f32.mxu0 %vm85_vm0, %v13_v14  ;;  %1133 = vmatprep.mubr.msk.f32.mxu1 %vm85_vm0, %v45_v15  ;;  %v72_v5 = vld [vmem:[%s1756_s0 + $0x1e8] sm:$0xff]  ;;  %v41_v6 = vld [vmem:[%s1756_s0 + $0xf0] sm:$0xff]  ;;  %v42_v8 = vld [vmem:[%s1756_s0 + $0xf8] sm:$0xff] }
  0x19   :  { %v73_v7 = vld [vmem:[%s1756_s0 + $0x1f0] sm:$0xff]  ;;  %v74_v9 = vld [vmem:[%s1756_s0 + $0x1f8] sm:$0xff] }
  0x1b   :  { %1086 = vmatmul.mubr.msk.f32.gmra.mxu0 %vm85_vm0, %v14_v16  ;;  %1134 = vmatmul.mubr.msk.f32.gmra.mxu1 %vm85_vm0, %v46_v17 }
  0x1c   :  { %1088 = vmatprep.mubr.msk.f32.mxu0 %vm85_vm0, %v15_v18  ;;  %1136 = vmatprep.mubr.msk.f32.mxu1 %vm85_vm0, %v47_v19 }
  0x1f   :  { %1089 = vmatmul.mubr.msk.f32.gmra.mxu0 %vm85_vm0, %v16_v20  ;;  %1137 = vmatmul.mubr.msk.f32.gmra.mxu1 %vm85_vm0, %v48_v21 }
  0x20   :  { %1091 = vmatprep.mubr.msk.f32.mxu0 %vm85_vm0, %v17_v22  ;;  %1139 = vmatprep.mubr.msk.f32.mxu1 %vm85_vm0, %v49_v23 }
  0x23   :  { %1092 = vmatmul.mubr.msk.f32.gmra.mxu0 %vm85_vm0, %v18_v24  ;;  %1140 = vmatmul.mubr.msk.f32.gmra.mxu1 %vm85_vm0, %v50_v25 }
  0x24   :  { %1094 = vmatprep.mubr.msk.f32.mxu0 %vm85_vm0, %v19_v26  ;;  %1142 = vmatprep.mubr.msk.f32.mxu1 %vm85_vm0, %v51_v27 }
  0x27   :  { %1095 = vmatmul.mubr.msk.f32.gmra.mxu0 %vm85_vm0, %v20_v28  ;;  %1143 = vmatmul.mubr.msk.f32.gmra.mxu1 %vm85_vm0, %v52_v29 }
  0x28   :  { %1097 = vmatprep.mubr.msk.f32.mxu0 %vm85_vm0, %v21_v30  ;;  %1145 = vmatprep.mubr.msk.f32.mxu1 %vm85_vm0, %v53_v31 }
  0x2b   :  { %1098 = vmatmul.mubr.msk.f32.gmra.mxu0 %vm85_vm0, %v22_v32  ;;  %1146 = vmatmul.mubr.msk.f32.gmra.mxu1 %vm85_vm0, %v54_v33 }
  0x2c   :  { %1100 = vmatprep.mubr.msk.f32.mxu0 %vm85_vm0, %v23_v34  ;;  %1148 = vmatprep.mubr.msk.f32.mxu1 %vm85_vm0, %v55_v35 }
  0x2f   :  { %1101 = vmatmul.mubr.msk.f32.gmra.mxu0 %vm85_vm0, %v24_v36  ;;  %1149 = vmatmul.mubr.msk.f32.gmra.mxu1 %vm85_vm0, %v56_v37 }
  0x30   :  { %1103 = vmatprep.mubr.msk.f32.mxu0 %vm85_vm0, %v25_v38  ;;  %1151 = vmatprep.mubr.msk.f32.mxu1 %vm85_vm0, %v57_v39 }
  0x33   :  { %1104 = vmatmul.mubr.msk.f32.gmra.mxu0 %vm85_vm0, %v26_v40  ;;  %1152 = vmatmul.mubr.msk.f32.gmra.mxu1 %vm85_vm0, %v58_v41 }
  0x34   :  { %1106 = vmatprep.mubr.msk.f32.mxu0 %vm85_vm0, %v27_v42  ;;  %1154 = vmatprep.mubr.msk.f32.mxu1 %vm85_vm0, %v59_v43 }
  0x37   :  { %1107 = vmatmul.mubr.msk.f32.gmra.mxu0 %vm85_vm0, %v28_v44  ;;  %1155 = vmatmul.mubr.msk.f32.gmra.mxu1 %vm85_vm0, %v60_v45 }
  0x38   :  { %1109 = vmatprep.mubr.msk.f32.mxu0 %vm85_vm0, %v29_v46  ;;  %1157 = vmatprep.mubr.msk.f32.mxu1 %vm85_vm0, %v61_v47 }
  0x3b   :  { %1110 = vmatmul.mubr.msk.f32.gmra.mxu0 %vm85_vm0, %v30_v48  ;;  %1158 = vmatmul.mubr.msk.f32.gmra.mxu1 %vm85_vm0, %v62_v49 }
  0x3c   :  { %1112 = vmatprep.mubr.msk.f32.mxu0 %vm85_vm0, %v31_v50  ;;  %1160 = vmatprep.mubr.msk.f32.mxu1 %vm85_vm0, %v63_v51 }
  0x3f   :  { %1113 = vmatmul.mubr.msk.f32.gmra.mxu0 %vm85_vm0, %v32_v52  ;;  %1161 = vmatmul.mubr.msk.f32.gmra.mxu1 %vm85_vm0, %v64_v53 }
  0x40   :  { %1115 = vmatprep.mubr.msk.f32.mxu0 %vm85_vm0, %v33_v54  ;;  %1163 = vmatprep.mubr.msk.f32.mxu1 %vm85_vm0, %v65_v55 }
  0x43   :  { %1116 = vmatmul.mubr.msk.f32.gmra.mxu0 %vm85_vm0, %v34_v56  ;;  %1164 = vmatmul.mubr.msk.f32.gmra.mxu1 %vm85_vm0, %v66_v57 }
  0x44   :  { %1118 = vmatprep.mubr.msk.f32.mxu0 %vm85_vm0, %v35_v58  ;;  %1166 = vmatprep.mubr.msk.f32.mxu1 %vm85_vm0, %v67_v59 }
  0x47   :  { %1119 = vmatmul.mubr.msk.f32.gmra.mxu0 %vm85_vm0, %v36_v60  ;;  %1167 = vmatmul.mubr.msk.f32.gmra.mxu1 %vm85_vm0, %v68_v61 }
  0x48   :  { %1121 = vmatprep.mubr.msk.f32.mxu0 %vm85_vm0, %v37_v62  ;;  %1169 = vmatprep.mubr.msk.f32.mxu1 %vm85_vm0, %v69_v63 }
  0x4b   :  { %1122 = vmatmul.mubr.msk.f32.gmra.mxu0 %vm85_vm0, %v38_v0  ;;  %1170 = vmatmul.mubr.msk.f32.gmra.mxu1 %vm85_vm0, %v70_v1 }
  0x4c   :  { %1124 = vmatprep.mubr.msk.f32.mxu0 %vm85_vm0, %v39_v2  ;;  %1172 = vmatprep.mubr.msk.f32.mxu1 %vm85_vm0, %v71_v3 }
  0x4f   :  { %1125 = vmatmul.mubr.msk.f32.gmra.mxu0 %vm85_vm0, %v40_v4  ;;  %1173 = vmatmul.mubr.msk.f32.gmra.mxu1 %vm85_vm0, %v72_v5 }
  0x50   :  { %1127 = vmatprep.mubr.msk.f32.mxu0 %vm85_vm0, %v41_v6  ;;  %1175 = vmatprep.mubr.msk.f32.mxu1 %vm85_vm0, %v73_v7 }
  0x53   :  { %1128 = vmatmul.mubr.msk.f32.gmra.mxu0 %vm85_vm0, %v42_v8  ;;  %1176 = vmatmul.mubr.msk.f32.gmra.mxu1 %vm85_vm0, %v74_v9 }
  0xd7   :  { %v1084_v10 = vpop.f32.mrf.mxu0  ;;  %v1132_v11 = vpop.f32.mrf.mxu1 }
  0xd8   :  { %vm664_vm2 = vcmp.gt.f32.partialorder %v1084_v10, 0.0  ;;  %v728_v12 = vmul.f32 0.2, %v1084_v10  ;;  %vm696_vm3 = vcmp.gt.f32.partialorder %v1132_v11, 0.0  ;;  %v760_v13 = vmul.f32 0.2, %v1132_v11 }
  0xd9   :  { %v344_v14 = vpop.f32.mrf.mxu0  ;;  %v504_v15 = vpop.f32.mrf.mxu1 }
  0xda   :  { %v792_v16 = vsel %vm664_vm2, %v1084_v10, %v728_v12  ;;  %v824_v17 = vsel %vm696_vm3, %v1132_v11, %v760_v13  ;;  %vm663_vm4 = vcmp.gt.f32.partialorder %v344_v14, 0.0  ;;  %v727_v18 = vmul.f32 0.2, %v344_v14 }
  0xdb   :  { %857 = vst.msk [vmem:[%s1757_s2 + $0x8] sm:$0xff] %vm855_vm1, %v792_v16  ;;  %889 = vst.msk [vmem:[%s1757_s2 + $0x108] sm:$0xff] %vm855_vm1, %v824_v17  ;;  %vm695_vm5 = vcmp.gt.f32.partialorder %v504_v15, 0.0  ;;  %v759_v19 = vmul.f32 0.2, %v504_v15  ;;  %v1087_v20 = vpop.f32.mrf.mxu0  ;;  %v1135_v21 = vpop.f32.mrf.mxu1 }
  0xdc   :  { %v791_v22 = vsel %vm663_vm4, %v344_v14, %v727_v18  ;;  %vm666_vm6 = vcmp.gt.f32.partialorder %v1087_v20, 0.0  ;;  %v730_v23 = vmul.f32 0.2, %v1087_v20  ;;  %vm698_vm7 = vcmp.gt.f32.partialorder %v1135_v21, 0.0 }
  0xdd   :  { %856 = vst.msk [vmem:[%s1757_s2] sm:$0xff] %vm855_vm1, %v791_v22  ;;  %v823_v24 = vsel %vm695_vm5, %v504_v15, %v759_v19  ;;  %v762_v25 = vmul.f32 0.2, %v1135_v21  ;;  %v354_v26 = vpop.f32.mrf.mxu0  ;;  %v514_v27 = vpop.f32.mrf.mxu1 }
  0xde   :  { %888 = vst.msk [vmem:[%s1757_s2 + $0x100] sm:$0xff] %vm855_vm1, %v823_v24  ;;  %v794_v28 = vsel %vm666_vm6, %v1087_v20, %v730_v23  ;;  %vm665_vm8 = vcmp.gt.f32.partialorder %v354_v26, 0.0  ;;  %v729_v29 = vmul.f32 0.2, %v354_v26  ;;  %vm697_vm9 = vcmp.gt.f32.partialorder %v514_v27, 0.0 }
  0xdf   :  { %859 = vst.msk [vmem:[%s1757_s2 + $0x18] sm:$0xff] %vm855_vm1, %v794_v28  ;;  %v826_v30 = vsel %vm698_vm7, %v1135_v21, %v762_v25  ;;  %v761_v31 = vmul.f32 0.2, %v514_v27  ;;  %v1090_v32 = vpop.f32.mrf.mxu0  ;;  %v1138_v33 = vpop.f32.mrf.mxu1 }
  0xe0   :  { %891 = vst.msk [vmem:[%s1757_s2 + $0x118] sm:$0xff] %vm855_vm1, %v826_v30  ;;  %v793_v34 = vsel %vm665_vm8, %v354_v26, %v729_v29  ;;  %vm668_vm10 = vcmp.gt.f32.partialorder %v1090_v32, 0.0  ;;  %v732_v35 = vmul.f32 0.2, %v1090_v32  ;;  %vm700_vm11 = vcmp.gt.f32.partialorder %v1138_v33, 0.0 }
  0xe1   :  { %858 = vst.msk [vmem:[%s1757_s2 + $0x10] sm:$0xff] %vm855_vm1, %v793_v34  ;;  %v825_v36 = vsel %vm697_vm9, %v514_v27, %v761_v31  ;;  %v764_v37 = vmul.f32 0.2, %v1138_v33  ;;  %v364_v38 = vpop.f32.mrf.mxu0  ;;  %v524_v39 = vpop.f32.mrf.mxu1 }
  0xe2   :  { %890 = vst.msk [vmem:[%s1757_s2 + $0x110] sm:$0xff] %vm855_vm1, %v825_v36  ;;  %v796_v40 = vsel %vm668_vm10, %v1090_v32, %v732_v35  ;;  %vm667_vm12 = vcmp.gt.f32.partialorder %v364_v38, 0.0  ;;  %v731_v41 = vmul.f32 0.2, %v364_v38  ;;  %vm699_vm13 = vcmp.gt.f32.partialorder %v524_v39, 0.0 }
  0xe3   :  { %861 = vst.msk [vmem:[%s1757_s2 + $0x28] sm:$0xff] %vm855_vm1, %v796_v40  ;;  %v828_v42 = vsel %vm700_vm11, %v1138_v33, %v764_v37  ;;  %v763_v43 = vmul.f32 0.2, %v524_v39  ;;  %v1093_v44 = vpop.f32.mrf.mxu0  ;;  %v1141_v45 = vpop.f32.mrf.mxu1 }
  0xe4   :  { %893 = vst.msk [vmem:[%s1757_s2 + $0x128] sm:$0xff] %vm855_vm1, %v828_v42  ;;  %v795_v46 = vsel %vm667_vm12, %v364_v38, %v731_v41  ;;  %vm670_vm14 = vcmp.gt.f32.partialorder %v1093_v44, 0.0  ;;  %v734_v47 = vmul.f32 0.2, %v1093_v44  ;;  %vm702_vm15 = vcmp.gt.f32.partialorder %v1141_v45, 0.0 }
  0xe5   :  { %860 = vst.msk [vmem:[%s1757_s2 + $0x20] sm:$0xff] %vm855_vm1, %v795_v46  ;;  %v827_v48 = vsel %vm699_vm13, %v524_v39, %v763_v43  ;;  %v766_v49 = vmul.f32 0.2, %v1141_v45  ;;  %v374_v50 = vpop.f32.mrf.mxu0  ;;  %v534_v51 = vpop.f32.mrf.mxu1 }
  0xe6   :  { %892 = vst.msk [vmem:[%s1757_s2 + $0x120] sm:$0xff] %vm855_vm1, %v827_v48  ;;  %v798_v52 = vsel %vm670_vm14, %v1093_v44, %v734_v47  ;;  %vm669_vm0 = vcmp.gt.f32.partialorder %v374_v50, 0.0  ;;  %v733_v53 = vmul.f32 0.2, %v374_v50  ;;  %vm701_vm2 = vcmp.gt.f32.partialorder %v534_v51, 0.0 }
  0xe7   :  { %863 = vst.msk [vmem:[%s1757_s2 + $0x38] sm:$0xff] %vm855_vm1, %v798_v52  ;;  %v830_v54 = vsel %vm702_vm15, %v1141_v45, %v766_v49  ;;  %v765_v55 = vmul.f32 0.2, %v534_v51  ;;  %v1096_v56 = vpop.f32.mrf.mxu0  ;;  %v1144_v57 = vpop.f32.mrf.mxu1 }
  0xe8   :  { %895 = vst.msk [vmem:[%s1757_s2 + $0x138] sm:$0xff] %vm855_vm1, %v830_v54  ;;  %v797_v58 = vsel %vm669_vm0, %v374_v50, %v733_v53  ;;  %vm672_vm3 = vcmp.gt.f32.partialorder %v1096_v56, 0.0  ;;  %v736_v59 = vmul.f32 0.2, %v1096_v56  ;;  %vm704_vm4 = vcmp.gt.f32.partialorder %v1144_v57, 0.0 }
  0xe9   :  { %862 = vst.msk [vmem:[%s1757_s2 + $0x30] sm:$0xff] %vm855_vm1, %v797_v58  ;;  %v829_v60 = vsel %vm701_vm2, %v534_v51, %v765_v55  ;;  %v768_v61 = vmul.f32 0.2, %v1144_v57  ;;  %v384_v62 = vpop.f32.mrf.mxu0  ;;  %v544_v63 = vpop.f32.mrf.mxu1 }
  0xea   :  { %894 = vst.msk [vmem:[%s1757_s2 + $0x130] sm:$0xff] %vm855_vm1, %v829_v60  ;;  %v800_v0 = vsel %vm672_vm3, %v1096_v56, %v736_v59  ;;  %vm671_vm5 = vcmp.gt.f32.partialorder %v384_v62, 0.0  ;;  %v735_v1 = vmul.f32 0.2, %v384_v62  ;;  %vm703_vm6 = vcmp.gt.f32.partialorder %v544_v63, 0.0 }
  0xeb   :  { %865 = vst.msk [vmem:[%s1757_s2 + $0x48] sm:$0xff] %vm855_vm1, %v800_v0  ;;  %v832_v2 = vsel %vm704_vm4, %v1144_v57, %v768_v61  ;;  %v767_v3 = vmul.f32 0.2, %v544_v63  ;;  %v1099_v4 = vpop.f32.mrf.mxu0  ;;  %v1147_v5 = vpop.f32.mrf.mxu1 }
  0xec   :  { %897 = vst.msk [vmem:[%s1757_s2 + $0x148] sm:$0xff] %vm855_vm1, %v832_v2  ;;  %v799_v6 = vsel %vm671_vm5, %v384_v62, %v735_v1  ;;  %vm674_vm7 = vcmp.gt.f32.partialorder %v1099_v4, 0.0  ;;  %v738_v7 = vmul.f32 0.2, %v1099_v4  ;;  %vm706_vm8 = vcmp.gt.f32.partialorder %v1147_v5, 0.0 }
  0xed   :  { %864 = vst.msk [vmem:[%s1757_s2 + $0x40] sm:$0xff] %vm855_vm1, %v799_v6  ;;  %v831_v8 = vsel %vm703_vm6, %v544_v63, %v767_v3  ;;  %v770_v9 = vmul.f32 0.2, %v1147_v5  ;;  %v394_v10 = vpop.f32.mrf.mxu0  ;;  %v554_v11 = vpop.f32.mrf.mxu1 }
  0xee   :  { %896 = vst.msk [vmem:[%s1757_s2 + $0x140] sm:$0xff] %vm855_vm1, %v831_v8  ;;  %v802_v12 = vsel %vm674_vm7, %v1099_v4, %v738_v7  ;;  %vm673_vm9 = vcmp.gt.f32.partialorder %v394_v10, 0.0  ;;  %v737_v13 = vmul.f32 0.2, %v394_v10  ;;  %vm705_vm10 = vcmp.gt.f32.partialorder %v554_v11, 0.0 }
  0xef   :  { %867 = vst.msk [vmem:[%s1757_s2 + $0x58] sm:$0xff] %vm855_vm1, %v802_v12  ;;  %v834_v14 = vsel %vm706_vm8, %v1147_v5, %v770_v9  ;;  %v769_v15 = vmul.f32 0.2, %v554_v11  ;;  %v1102_v16 = vpop.f32.mrf.mxu0  ;;  %v1150_v17 = vpop.f32.mrf.mxu1 }
  0xf0   :  { %899 = vst.msk [vmem:[%s1757_s2 + $0x158] sm:$0xff] %vm855_vm1, %v834_v14  ;;  %v801_v18 = vsel %vm673_vm9, %v394_v10, %v737_v13  ;;  %vm676_vm11 = vcmp.gt.f32.partialorder %v1102_v16, 0.0  ;;  %v740_v19 = vmul.f32 0.2, %v1102_v16  ;;  %vm708_vm12 = vcmp.gt.f32.partialorder %v1150_v17, 0.0 }
  0xf1   :  { %866 = vst.msk [vmem:[%s1757_s2 + $0x50] sm:$0xff] %vm855_vm1, %v801_v18  ;;  %v833_v20 = vsel %vm705_vm10, %v554_v11, %v769_v15  ;;  %v772_v21 = vmul.f32 0.2, %v1150_v17  ;;  %v404_v22 = vpop.f32.mrf.mxu0  ;;  %v564_v23 = vpop.f32.mrf.mxu1 }
  0xf2   :  { %898 = vst.msk [vmem:[%s1757_s2 + $0x150] sm:$0xff] %vm855_vm1, %v833_v20  ;;  %v804_v24 = vsel %vm676_vm11, %v1102_v16, %v740_v19  ;;  %vm675_vm13 = vcmp.gt.f32.partialorder %v404_v22, 0.0  ;;  %v739_v25 = vmul.f32 0.2, %v404_v22  ;;  %vm707_vm14 = vcmp.gt.f32.partialorder %v564_v23, 0.0 }
  0xf3   :  { %869 = vst.msk [vmem:[%s1757_s2 + $0x68] sm:$0xff] %vm855_vm1, %v804_v24  ;;  %v836_v26 = vsel %vm708_vm12, %v1150_v17, %v772_v21  ;;  %v771_v27 = vmul.f32 0.2, %v564_v23  ;;  %v1105_v28 = vpop.f32.mrf.mxu0  ;;  %v1153_v29 = vpop.f32.mrf.mxu1 }
  0xf4   :  { %901 = vst.msk [vmem:[%s1757_s2 + $0x168] sm:$0xff] %vm855_vm1, %v836_v26  ;;  %v803_v30 = vsel %vm675_vm13, %v404_v22, %v739_v25  ;;  %vm678_vm15 = vcmp.gt.f32.partialorder %v1105_v28, 0.0  ;;  %v742_v31 = vmul.f32 0.2, %v1105_v28  ;;  %vm710_vm0 = vcmp.gt.f32.partialorder %v1153_v29, 0.0 }
  0xf5   :  { %868 = vst.msk [vmem:[%s1757_s2 + $0x60] sm:$0xff] %vm855_vm1, %v803_v30  ;;  %v835_v32 = vsel %vm707_vm14, %v564_v23, %v771_v27  ;;  %v774_v33 = vmul.f32 0.2, %v1153_v29  ;;  %v414_v34 = vpop.f32.mrf.mxu0  ;;  %v574_v35 = vpop.f32.mrf.mxu1 }
  0xf6   :  { %900 = vst.msk [vmem:[%s1757_s2 + $0x160] sm:$0xff] %vm855_vm1, %v835_v32  ;;  %v806_v36 = vsel %vm678_vm15, %v1105_v28, %v742_v31  ;;  %vm677_vm2 = vcmp.gt.f32.partialorder %v414_v34, 0.0  ;;  %v741_v37 = vmul.f32 0.2, %v414_v34  ;;  %vm709_vm3 = vcmp.gt.f32.partialorder %v574_v35, 0.0 }
  0xf7   :  { %871 = vst.msk [vmem:[%s1757_s2 + $0x78] sm:$0xff] %vm855_vm1, %v806_v36  ;;  %v838_v38 = vsel %vm710_vm0, %v1153_v29, %v774_v33  ;;  %v773_v39 = vmul.f32 0.2, %v574_v35  ;;  %v1108_v40 = vpop.f32.mrf.mxu0  ;;  %v1156_v41 = vpop.f32.mrf.mxu1 }
  0xf8   :  { %903 = vst.msk [vmem:[%s1757_s2 + $0x178] sm:$0xff] %vm855_vm1, %v838_v38  ;;  %v805_v42 = vsel %vm677_vm2, %v414_v34, %v741_v37  ;;  %vm680_vm4 = vcmp.gt.f32.partialorder %v1108_v40, 0.0  ;;  %v744_v43 = vmul.f32 0.2, %v1108_v40  ;;  %vm712_vm5 = vcmp.gt.f32.partialorder %v1156_v41, 0.0 }
  0xf9   :  { %870 = vst.msk [vmem:[%s1757_s2 + $0x70] sm:$0xff] %vm855_vm1, %v805_v42  ;;  %v837_v44 = vsel %vm709_vm3, %v574_v35, %v773_v39  ;;  %v776_v45 = vmul.f32 0.2, %v1156_v41  ;;  %v424_v46 = vpop.f32.mrf.mxu0  ;;  %v584_v47 = vpop.f32.mrf.mxu1 }
  0xfa   :  { %902 = vst.msk [vmem:[%s1757_s2 + $0x170] sm:$0xff] %vm855_vm1, %v837_v44  ;;  %v808_v48 = vsel %vm680_vm4, %v1108_v40, %v744_v43  ;;  %vm679_vm6 = vcmp.gt.f32.partialorder %v424_v46, 0.0  ;;  %v743_v49 = vmul.f32 0.2, %v424_v46  ;;  %vm711_vm7 = vcmp.gt.f32.partialorder %v584_v47, 0.0 }
  0xfb   :  { %873 = vst.msk [vmem:[%s1757_s2 + $0x88] sm:$0xff] %vm855_vm1, %v808_v48  ;;  %v840_v50 = vsel %vm712_vm5, %v1156_v41, %v776_v45  ;;  %v775_v51 = vmul.f32 0.2, %v584_v47  ;;  %v1111_v52 = vpop.f32.mrf.mxu0  ;;  %v1159_v53 = vpop.f32.mrf.mxu1 }
  0xfc   :  { %905 = vst.msk [vmem:[%s1757_s2 + $0x188] sm:$0xff] %vm855_vm1, %v840_v50  ;;  %v807_v54 = vsel %vm679_vm6, %v424_v46, %v743_v49  ;;  %vm682_vm8 = vcmp.gt.f32.partialorder %v1111_v52, 0.0  ;;  %v746_v55 = vmul.f32 0.2, %v1111_v52  ;;  %vm714_vm9 = vcmp.gt.f32.partialorder %v1159_v53, 0.0 }
  0xfd   :  { %872 = vst.msk [vmem:[%s1757_s2 + $0x80] sm:$0xff] %vm855_vm1, %v807_v54  ;;  %v839_v56 = vsel %vm711_vm7, %v584_v47, %v775_v51  ;;  %v778_v57 = vmul.f32 0.2, %v1159_v53  ;;  %v434_v58 = vpop.f32.mrf.mxu0  ;;  %v594_v59 = vpop.f32.mrf.mxu1 }
  0xfe   :  { %904 = vst.msk [vmem:[%s1757_s2 + $0x180] sm:$0xff] %vm855_vm1, %v839_v56  ;;  %v810_v60 = vsel %vm682_vm8, %v1111_v52, %v746_v55  ;;  %vm681_vm10 = vcmp.gt.f32.partialorder %v434_v58, 0.0  ;;  %v745_v61 = vmul.f32 0.2, %v434_v58  ;;  %vm713_vm11 = vcmp.gt.f32.partialorder %v594_v59, 0.0 }
  0xff   :  { %875 = vst.msk [vmem:[%s1757_s2 + $0x98] sm:$0xff] %vm855_vm1, %v810_v60  ;;  %v842_v62 = vsel %vm714_vm9, %v1159_v53, %v778_v57  ;;  %v777_v63 = vmul.f32 0.2, %v594_v59  ;;  %v1114_v0 = vpop.f32.mrf.mxu0  ;;  %v1162_v1 = vpop.f32.mrf.mxu1 }
 0x100   :  { %907 = vst.msk [vmem:[%s1757_s2 + $0x198] sm:$0xff] %vm855_vm1, %v842_v62  ;;  %v809_v2 = vsel %vm681_vm10, %v434_v58, %v745_v61  ;;  %vm684_vm12 = vcmp.gt.f32.partialorder %v1114_v0, 0.0  ;;  %v748_v3 = vmul.f32 0.2, %v1114_v0  ;;  %vm716_vm13 = vcmp.gt.f32.partialorder %v1162_v1, 0.0 }
 0x101   :  { %874 = vst.msk [vmem:[%s1757_s2 + $0x90] sm:$0xff] %vm855_vm1, %v809_v2  ;;  %v841_v4 = vsel %vm713_vm11, %v594_v59, %v777_v63  ;;  %v780_v5 = vmul.f32 0.2, %v1162_v1  ;;  %v444_v6 = vpop.f32.mrf.mxu0  ;;  %v604_v7 = vpop.f32.mrf.mxu1 }
 0x102   :  { %906 = vst.msk [vmem:[%s1757_s2 + $0x190] sm:$0xff] %vm855_vm1, %v841_v4  ;;  %v812_v8 = vsel %vm684_vm12, %v1114_v0, %v748_v3  ;;  %vm683_vm14 = vcmp.gt.f32.partialorder %v444_v6, 0.0  ;;  %v747_v9 = vmul.f32 0.2, %v444_v6  ;;  %vm715_vm15 = vcmp.gt.f32.partialorder %v604_v7, 0.0 }
 0x103   :  { %877 = vst.msk [vmem:[%s1757_s2 + $0xa8] sm:$0xff] %vm855_vm1, %v812_v8  ;;  %v844_v10 = vsel %vm716_vm13, %v1162_v1, %v780_v5  ;;  %v779_v11 = vmul.f32 0.2, %v604_v7  ;;  %v1117_v12 = vpop.f32.mrf.mxu0  ;;  %v1165_v13 = vpop.f32.mrf.mxu1 }
 0x104   :  { %909 = vst.msk [vmem:[%s1757_s2 + $0x1a8] sm:$0xff] %vm855_vm1, %v844_v10  ;;  %v811_v14 = vsel %vm683_vm14, %v444_v6, %v747_v9  ;;  %vm686_vm0 = vcmp.gt.f32.partialorder %v1117_v12, 0.0  ;;  %v750_v15 = vmul.f32 0.2, %v1117_v12  ;;  %vm718_vm2 = vcmp.gt.f32.partialorder %v1165_v13, 0.0 }
 0x105   :  { %876 = vst.msk [vmem:[%s1757_s2 + $0xa0] sm:$0xff] %vm855_vm1, %v811_v14  ;;  %v843_v16 = vsel %vm715_vm15, %v604_v7, %v779_v11  ;;  %v782_v17 = vmul.f32 0.2, %v1165_v13  ;;  %v454_v18 = vpop.f32.mrf.mxu0  ;;  %v614_v19 = vpop.f32.mrf.mxu1 }
 0x106   :  { %908 = vst.msk [vmem:[%s1757_s2 + $0x1a0] sm:$0xff] %vm855_vm1, %v843_v16  ;;  %v814_v20 = vsel %vm686_vm0, %v1117_v12, %v750_v15  ;;  %vm685_vm3 = vcmp.gt.f32.partialorder %v454_v18, 0.0  ;;  %v749_v21 = vmul.f32 0.2, %v454_v18  ;;  %vm717_vm4 = vcmp.gt.f32.partialorder %v614_v19, 0.0 }
 0x107   :  { %879 = vst.msk [vmem:[%s1757_s2 + $0xb8] sm:$0xff] %vm855_vm1, %v814_v20  ;;  %v846_v22 = vsel %vm718_vm2, %v1165_v13, %v782_v17  ;;  %v781_v23 = vmul.f32 0.2, %v614_v19  ;;  %v1120_v24 = vpop.f32.mrf.mxu0  ;;  %v1168_v25 = vpop.f32.mrf.mxu1 }
 0x108   :  { %911 = vst.msk [vmem:[%s1757_s2 + $0x1b8] sm:$0xff] %vm855_vm1, %v846_v22  ;;  %v813_v26 = vsel %vm685_vm3, %v454_v18, %v749_v21  ;;  %vm688_vm5 = vcmp.gt.f32.partialorder %v1120_v24, 0.0  ;;  %v752_v27 = vmul.f32 0.2, %v1120_v24  ;;  %vm720_vm6 = vcmp.gt.f32.partialorder %v1168_v25, 0.0 }
 0x109   :  { %878 = vst.msk [vmem:[%s1757_s2 + $0xb0] sm:$0xff] %vm855_vm1, %v813_v26  ;;  %v845_v28 = vsel %vm717_vm4, %v614_v19, %v781_v23  ;;  %v784_v29 = vmul.f32 0.2, %v1168_v25  ;;  %v464_v30 = vpop.f32.mrf.mxu0  ;;  %v624_v31 = vpop.f32.mrf.mxu1 }
 0x10a   :  { %910 = vst.msk [vmem:[%s1757_s2 + $0x1b0] sm:$0xff] %vm855_vm1, %v845_v28  ;;  %v816_v32 = vsel %vm688_vm5, %v1120_v24, %v752_v27  ;;  %vm687_vm7 = vcmp.gt.f32.partialorder %v464_v30, 0.0  ;;  %v751_v33 = vmul.f32 0.2, %v464_v30  ;;  %vm719_vm8 = vcmp.gt.f32.partialorder %v624_v31, 0.0 }
 0x10b   :  { %881 = vst.msk [vmem:[%s1757_s2 + $0xc8] sm:$0xff] %vm855_vm1, %v816_v32  ;;  %v848_v34 = vsel %vm720_vm6, %v1168_v25, %v784_v29  ;;  %v783_v35 = vmul.f32 0.2, %v624_v31  ;;  %v1123_v36 = vpop.f32.mrf.mxu0  ;;  %v1171_v37 = vpop.f32.mrf.mxu1 }
 0x10c   :  { %913 = vst.msk [vmem:[%s1757_s2 + $0x1c8] sm:$0xff] %vm855_vm1, %v848_v34  ;;  %v815_v38 = vsel %vm687_vm7, %v464_v30, %v751_v33  ;;  %vm690_vm9 = vcmp.gt.f32.partialorder %v1123_v36, 0.0  ;;  %v754_v39 = vmul.f32 0.2, %v1123_v36  ;;  %vm722_vm10 = vcmp.gt.f32.partialorder %v1171_v37, 0.0 }
 0x10d   :  { %880 = vst.msk [vmem:[%s1757_s2 + $0xc0] sm:$0xff] %vm855_vm1, %v815_v38  ;;  %v847_v40 = vsel %vm719_vm8, %v624_v31, %v783_v35  ;;  %v786_v41 = vmul.f32 0.2, %v1171_v37  ;;  %v474_v42 = vpop.f32.mrf.mxu0  ;;  %v634_v43 = vpop.f32.mrf.mxu1 }
 0x10e   :  { %912 = vst.msk [vmem:[%s1757_s2 + $0x1c0] sm:$0xff] %vm855_vm1, %v847_v40  ;;  %v818_v44 = vsel %vm690_vm9, %v1123_v36, %v754_v39  ;;  %vm689_vm11 = vcmp.gt.f32.partialorder %v474_v42, 0.0  ;;  %v753_v45 = vmul.f32 0.2, %v474_v42  ;;  %vm721_vm12 = vcmp.gt.f32.partialorder %v634_v43, 0.0 }
 0x10f   :  { %883 = vst.msk [vmem:[%s1757_s2 + $0xd8] sm:$0xff] %vm855_vm1, %v818_v44  ;;  %v850_v46 = vsel %vm722_vm10, %v1171_v37, %v786_v41  ;;  %v785_v47 = vmul.f32 0.2, %v634_v43  ;;  %v1126_v48 = vpop.f32.mrf.mxu0  ;;  %v1174_v49 = vpop.f32.mrf.mxu1 }
 0x110   :  { %915 = vst.msk [vmem:[%s1757_s2 + $0x1d8] sm:$0xff] %vm855_vm1, %v850_v46  ;;  %v817_v50 = vsel %vm689_vm11, %v474_v42, %v753_v45  ;;  %vm692_vm13 = vcmp.gt.f32.partialorder %v1126_v48, 0.0  ;;  %v756_v51 = vmul.f32 0.2, %v1126_v48  ;;  %vm724_vm14 = vcmp.gt.f32.partialorder %v1174_v49, 0.0 }
 0x111   :  { %882 = vst.msk [vmem:[%s1757_s2 + $0xd0] sm:$0xff] %vm855_vm1, %v817_v50  ;;  %v849_v52 = vsel %vm721_vm12, %v634_v43, %v785_v47  ;;  %v788_v53 = vmul.f32 0.2, %v1174_v49  ;;  %v484_v54 = vpop.f32.mrf.mxu0  ;;  %v644_v55 = vpop.f32.mrf.mxu1 }
 0x112   :  { %914 = vst.msk [vmem:[%s1757_s2 + $0x1d0] sm:$0xff] %vm855_vm1, %v849_v52  ;;  %v820_v56 = vsel %vm692_vm13, %v1126_v48, %v756_v51  ;;  %vm691_vm15 = vcmp.gt.f32.partialorder %v484_v54, 0.0  ;;  %v755_v57 = vmul.f32 0.2, %v484_v54  ;;  %vm723_vm0 = vcmp.gt.f32.partialorder %v644_v55, 0.0 }
 0x113   :  { %885 = vst.msk [vmem:[%s1757_s2 + $0xe8] sm:$0xff] %vm855_vm1, %v820_v56  ;;  %v852_v58 = vsel %vm724_vm14, %v1174_v49, %v788_v53  ;;  %v787_v59 = vmul.f32 0.2, %v644_v55  ;;  %v1129_v60 = vpop.f32.mrf.mxu0  ;;  %v1177_v61 = vpop.f32.mrf.mxu1 }
 0x114   :  { %917 = vst.msk [vmem:[%s1757_s2 + $0x1e8] sm:$0xff] %vm855_vm1, %v852_v58  ;;  %v819_v62 = vsel %vm691_vm15, %v484_v54, %v755_v57  ;;  %vm694_vm2 = vcmp.gt.f32.partialorder %v1129_v60, 0.0  ;;  %v758_v63 = vmul.f32 0.2, %v1129_v60  ;;  %vm726_vm3 = vcmp.gt.f32.partialorder %v1177_v61, 0.0 }
 0x115   :  { %884 = vst.msk [vmem:[%s1757_s2 + $0xe0] sm:$0xff] %vm855_vm1, %v819_v62  ;;  %v851_v0 = vsel %vm723_vm0, %v644_v55, %v787_v59  ;;  %v790_v1 = vmul.f32 0.2, %v1177_v61  ;;  %v494_v2 = vpop.f32.mrf.mxu0  ;;  %v654_v3 = vpop.f32.mrf.mxu1 }
 0x116   :  { %916 = vst.msk [vmem:[%s1757_s2 + $0x1e0] sm:$0xff] %vm855_vm1, %v851_v0  ;;  %v822_v4 = vsel %vm694_vm2, %v1129_v60, %v758_v63  ;;  %vm693_vm4 = vcmp.gt.f32.partialorder %v494_v2, 0.0  ;;  %v757_v5 = vmul.f32 0.2, %v494_v2  ;;  %vm725_vm5 = vcmp.gt.f32.partialorder %v654_v3, 0.0 }
 0x117   :  { %887 = vst.msk [vmem:[%s1757_s2 + $0xf8] sm:$0xff] %vm855_vm1, %v822_v4  ;;  %v854_v6 = vsel %vm726_vm3, %v1177_v61, %v790_v1  ;;  %v789_v7 = vmul.f32 0.2, %v654_v3 }
 0x118   :  { %919 = vst.msk [vmem:[%s1757_s2 + $0x1f8] sm:$0xff] %vm855_vm1, %v854_v6  ;;  %v821_v8 = vsel %vm693_vm4, %v494_v2, %v757_v5 }
 0x119   :  { %886 = vst.msk [vmem:[%s1757_s2 + $0xf0] sm:$0xff] %vm855_vm1, %v821_v8  ;;  %v853_v9 = vsel %vm725_vm5, %v654_v3, %v789_v7 }
 0x11a   :  { %918 = vst.msk [vmem:[%s1757_s2 + $0x1f0] sm:$0xff] %vm855_vm1, %v853_v9 }

// kernel: discriminator_forward.4
= control target key start
LH: loop header
LB: loop body
LE: loop exit
PB: predicated region body
PF: predicated region fallthrough
CT: control target
= control target key end

     0   :  { %s2350_s1 = inlined_call_operand.vmem [shape: f32[1024,128], index: 1, kind: input, shape index: {}]   ;;  %s2351_s0 = inlined_call_operand.vmem [shape: f32[128,1024], index: 0, kind: input, shape index: {}]   ;;  %s2352_s2 = inlined_call_operand.vmem [shape: f32[1,128], index: 2, kind: input, shape index: {}]   ;;  %s2353_s3 = inlined_call_operand.vmem [shape: f32[1,128], index: 3, kind: input, shape index: {}]   ;;  %s2354_s4 = inlined_call_operand.vmem [shape: f32[128,128], index: 4, kind: output, shape index: {}]  }
   0x1   :  { %v176_v0 = vld [vmem:[%s2350_s1 + $0xf8] sm:$0xff]  ;;  %v175_v4 = vld [vmem:[%s2350_s1 + $0xf0] sm:$0xff]  ;;  %v174_v8 = vld [vmem:[%s2350_s1 + $0xe8] sm:$0xff] }
   0x2   :  { %v208_v1 = vld [vmem:[%s2350_s1 + $0x1f8] sm:$0xff]  ;;  %1064 = vmatprep.subr.mxu0 %v176_v0  ;;  %v207_v5 = vld [vmem:[%s2350_s1 + $0x1f0] sm:$0xff]  ;;  %v206_v9 = vld [vmem:[%s2350_s1 + $0x1e8] sm:$0xff] }
   0x3   :  { %v160_v2 = vld [vmem:[%s2350_s1 + $0x78] sm:$0xff]  ;;  %1144 = vmatprep.subr.mxu1 %v208_v1  ;;  %v159_v6 = vld [vmem:[%s2350_s1 + $0x70] sm:$0xff]  ;;  %v158_v10 = vld [vmem:[%s2350_s1 + $0x68] sm:$0xff] }
   0x4   :  { %v192_v3 = vld [vmem:[%s2350_s1 + $0x178] sm:$0xff]  ;;  %1065 = vmatpush3.msra.mxu0 %v160_v2  ;;  %v191_v7 = vld [vmem:[%s2350_s1 + $0x170] sm:$0xff]  ;;  %v190_v11 = vld [vmem:[%s2350_s1 + $0x168] sm:$0xff] }
   0x5   :  { %1145 = vmatpush3.msra.mxu1 %v192_v3  ;;  %1066 = vmatprep.subr.mxu0 %v175_v4  ;;  %v173_v12 = vld [vmem:[%s2350_s1 + $0xe0] sm:$0xff]  ;;  %v172_v16 = vld [vmem:[%s2350_s1 + $0xd8] sm:$0xff]  ;;  %v171_v20 = vld [vmem:[%s2350_s1 + $0xd0] sm:$0xff] }
   0x6   :  { %1146 = vmatprep.subr.mxu1 %v207_v5  ;;  %1067 = vmatpush3.msra.mxu0 %v159_v6  ;;  %v205_v13 = vld [vmem:[%s2350_s1 + $0x1e0] sm:$0xff]  ;;  %v204_v17 = vld [vmem:[%s2350_s1 + $0x1d8] sm:$0xff]  ;;  %v203_v21 = vld [vmem:[%s2350_s1 + $0x1d0] sm:$0xff] }
   0x7   :  { %1147 = vmatpush3.msra.mxu1 %v191_v7  ;;  %1068 = vmatprep.subr.mxu0 %v174_v8  ;;  %v157_v14 = vld [vmem:[%s2350_s1 + $0x60] sm:$0xff]  ;;  %v156_v18 = vld [vmem:[%s2350_s1 + $0x58] sm:$0xff]  ;;  %v155_v22 = vld [vmem:[%s2350_s1 + $0x50] sm:$0xff] }
   0x8   :  { %1148 = vmatprep.subr.mxu1 %v206_v9  ;;  %v189_v15 = vld [vmem:[%s2350_s1 + $0x160] sm:$0xff]  ;;  %1069 = vmatpush3.msra.mxu0 %v158_v10  ;;  %v188_v19 = vld [vmem:[%s2350_s1 + $0x158] sm:$0xff]  ;;  %v187_v23 = vld [vmem:[%s2350_s1 + $0x150] sm:$0xff] }
   0x9   :  { %1149 = vmatpush3.msra.mxu1 %v190_v11  ;;  %1070 = vmatprep.subr.mxu0 %v173_v12  ;;  %v170_v24 = vld [vmem:[%s2350_s1 + $0xc8] sm:$0xff]  ;;  %v169_v28 = vld [vmem:[%s2350_s1 + $0xc0] sm:$0xff]  ;;  %v168_v32 = vld [vmem:[%s2350_s1 + $0xb8] sm:$0xff] }
   0xa   :  { %1150 = vmatprep.subr.mxu1 %v205_v13  ;;  %1071 = vmatpush3.msra.mxu0 %v157_v14  ;;  %v202_v25 = vld [vmem:[%s2350_s1 + $0x1c8] sm:$0xff]  ;;  %v201_v29 = vld [vmem:[%s2350_s1 + $0x1c0] sm:$0xff]  ;;  %v200_v33 = vld [vmem:[%s2350_s1 + $0x1b8] sm:$0xff] }
   0xb   :  { %1151 = vmatpush3.msra.mxu1 %v189_v15  ;;  %1072 = vmatprep.subr.mxu0 %v172_v16  ;;  %v154_v26 = vld [vmem:[%s2350_s1 + $0x48] sm:$0xff]  ;;  %v153_v30 = vld [vmem:[%s2350_s1 + $0x40] sm:$0xff]  ;;  %v152_v34 = vld [vmem:[%s2350_s1 + $0x38] sm:$0xff] }
   0xc   :  { %1152 = vmatprep.subr.mxu1 %v204_v17  ;;  %1073 = vmatpush3.msra.mxu0 %v156_v18  ;;  %v186_v27 = vld [vmem:[%s2350_s1 + $0x148] sm:$0xff]  ;;  %v185_v31 = vld [vmem:[%s2350_s1 + $0x140] sm:$0xff]  ;;  %v184_v35 = vld [vmem:[%s2350_s1 + $0x138] sm:$0xff] }
   0xd   :  { %1153 = vmatpush3.msra.mxu1 %v188_v19  ;;  %1074 = vmatprep.subr.mxu0 %v171_v20  ;;  %v167_v36 = vld [vmem:[%s2350_s1 + $0xb0] sm:$0xff]  ;;  %v166_v40 = vld [vmem:[%s2350_s1 + $0xa8] sm:$0xff]  ;;  %v165_v44 = vld [vmem:[%s2350_s1 + $0xa0] sm:$0xff] }
   0xe   :  { %1154 = vmatprep.subr.mxu1 %v203_v21  ;;  %1075 = vmatpush3.msra.mxu0 %v155_v22  ;;  %v199_v37 = vld [vmem:[%s2350_s1 + $0x1b0] sm:$0xff]  ;;  %v198_v41 = vld [vmem:[%s2350_s1 + $0x1a8] sm:$0xff]  ;;  %v197_v45 = vld [vmem:[%s2350_s1 + $0x1a0] sm:$0xff] }
   0xf   :  { %1155 = vmatpush3.msra.mxu1 %v187_v23  ;;  %1076 = vmatprep.subr.mxu0 %v170_v24  ;;  %v151_v38 = vld [vmem:[%s2350_s1 + $0x30] sm:$0xff]  ;;  %v150_v42 = vld [vmem:[%s2350_s1 + $0x28] sm:$0xff]  ;;  %v149_v46 = vld [vmem:[%s2350_s1 + $0x20] sm:$0xff] }
  0x10   :  { %1156 = vmatprep.subr.mxu1 %v202_v25  ;;  %1077 = vmatpush3.msra.mxu0 %v154_v26  ;;  %v183_v39 = vld [vmem:[%s2350_s1 + $0x130] sm:$0xff]  ;;  %v182_v43 = vld [vmem:[%s2350_s1 + $0x128] sm:$0xff]  ;;  %v181_v47 = vld [vmem:[%s2350_s1 + $0x120] sm:$0xff] }
  0x11   :  { %1157 = vmatpush3.msra.mxu1 %v186_v27  ;;  %1078 = vmatprep.subr.mxu0 %v169_v28  ;;  %v164_v48 = vld [vmem:[%s2350_s1 + $0x98] sm:$0xff]  ;;  %v163_v52 = vld [vmem:[%s2350_s1 + $0x90] sm:$0xff]  ;;  %v162_v56 = vld [vmem:[%s2350_s1 + $0x88] sm:$0xff] }
  0x12   :  { %1158 = vmatprep.subr.mxu1 %v201_v29  ;;  %1079 = vmatpush3.msra.mxu0 %v153_v30  ;;  %v196_v49 = vld [vmem:[%s2350_s1 + $0x198] sm:$0xff]  ;;  %v195_v53 = vld [vmem:[%s2350_s1 + $0x190] sm:$0xff]  ;;  %v194_v57 = vld [vmem:[%s2350_s1 + $0x188] sm:$0xff] }
  0x13   :  { %1159 = vmatpush3.msra.mxu1 %v185_v31  ;;  %1080 = vmatprep.subr.mxu0 %v168_v32  ;;  %v148_v50 = vld [vmem:[%s2350_s1 + $0x18] sm:$0xff]  ;;  %v147_v54 = vld [vmem:[%s2350_s1 + $0x10] sm:$0xff]  ;;  %v146_v58 = vld [vmem:[%s2350_s1 + $0x8] sm:$0xff] }
  0x14   :  { %1160 = vmatprep.subr.mxu1 %v200_v33  ;;  %1081 = vmatpush3.msra.mxu0 %v152_v34  ;;  %v180_v51 = vld [vmem:[%s2350_s1 + $0x118] sm:$0xff]  ;;  %v179_v55 = vld [vmem:[%s2350_s1 + $0x110] sm:$0xff]  ;;  %v178_v59 = vld [vmem:[%s2350_s1 + $0x108] sm:$0xff] }
  0x15   :  { %1161 = vmatpush3.msra.mxu1 %v184_v35  ;;  %1082 = vmatprep.subr.mxu0 %v167_v36  ;;  %v161_v60 = vld [vmem:[%s2350_s1 + $0x80] sm:$0xff]  ;;  %v18_v63 = vld [vmem:[%s2351_s0 + $0x8] sm:$0xff]  ;;  %v20_v1 = vld [vmem:[%s2351_s0 + $0x18] sm:$0xff] }
  0x16   :  { %1162 = vmatprep.subr.mxu1 %v199_v37  ;;  %1083 = vmatpush3.msra.mxu0 %v151_v38  ;;  %v193_v61 = vld [vmem:[%s2350_s1 + $0x180] sm:$0xff]  ;;  %v19_v3 = vld [vmem:[%s2351_s0 + $0x10] sm:$0xff]  ;;  %v240_v4 = vld [vmem:[%s2350_s1 + $0x2f8] sm:$0xff] }
  0x17   :  { %1163 = vmatpush3.msra.mxu1 %v183_v39  ;;  %1084 = vmatprep.subr.mxu0 %v166_v40  ;;  %v145_v62 = vld [vmem:[%s2350_s1] sm:$0xff]  ;;  %v272_v5 = vld [vmem:[%s2350_s1 + $0x3f8] sm:$0xff]  ;;  %v26_v7 = vld [vmem:[%s2351_s0 + $0x48] sm:$0xff] }
  0x18   :  { %1164 = vmatprep.subr.mxu1 %v198_v41  ;;  %1085 = vmatpush3.msra.mxu0 %v150_v42  ;;  %v177_v0 = vld [vmem:[%s2350_s1 + $0x100] sm:$0xff]  ;;  %v224_v6 = vld [vmem:[%s2350_s1 + $0x278] sm:$0xff]  ;;  %v27_v11 = vld [vmem:[%s2351_s0 + $0x50] sm:$0xff] }
  0x19   :  { %1165 = vmatpush3.msra.mxu1 %v182_v43  ;;  %1086 = vmatprep.subr.mxu0 %v165_v44  ;;  %v17_v2 = vld [vmem:[%s2351_s0] sm:$0xff]  ;;  %v28_v8 = vld [vmem:[%s2351_s0 + $0x58] sm:$0xff]  ;;  %v239_v12 = vld [vmem:[%s2350_s1 + $0x2f0] sm:$0xff] }
  0x1a   :  { %1166 = vmatprep.subr.mxu1 %v197_v45  ;;  %1087 = vmatpush3.msra.mxu0 %v149_v46  ;;  %v256_v9 = vld [vmem:[%s2350_s1 + $0x378] sm:$0xff]  ;;  %v25_v10 = vld [vmem:[%s2351_s0 + $0x40] sm:$0xff]  ;;  %v271_v13 = vld [vmem:[%s2350_s1 + $0x3f0] sm:$0xff] }
  0x1b   :  { %1167 = vmatpush3.msra.mxu1 %v181_v47  ;;  %1088 = vmatprep.subr.mxu0 %v164_v48  ;;  %v223_v14 = vld [vmem:[%s2350_s1 + $0x270] sm:$0xff]  ;;  %v34_v15 = vld [vmem:[%s2351_s0 + $0x88] sm:$0xff]  ;;  %v36_v16 = vld [vmem:[%s2351_s0 + $0x98] sm:$0xff] }
  0x1c   :  { %1168 = vmatprep.subr.mxu1 %v196_v49  ;;  %1089 = vmatpush3.msra.mxu0 %v148_v50  ;;  %v255_v17 = vld [vmem:[%s2350_s1 + $0x370] sm:$0xff]  ;;  %v33_v18 = vld [vmem:[%s2351_s0 + $0x80] sm:$0xff]  ;;  %v238_v20 = vld [vmem:[%s2350_s1 + $0x2e8] sm:$0xff] }
  0x1d   :  { %1169 = vmatpush3.msra.mxu1 %v180_v51  ;;  %1090 = vmatprep.subr.mxu0 %v163_v52  ;;  %v35_v19 = vld [vmem:[%s2351_s0 + $0x90] sm:$0xff]  ;;  %v270_v21 = vld [vmem:[%s2350_s1 + $0x3e8] sm:$0xff]  ;;  %v44_v24 = vld [vmem:[%s2351_s0 + $0xd8] sm:$0xff] }
  0x1e   :  { %1170 = vmatprep.subr.mxu1 %v195_v53  ;;  %1091 = vmatpush3.msra.mxu0 %v147_v54  ;;  %v222_v22 = vld [vmem:[%s2350_s1 + $0x268] sm:$0xff]  ;;  %v41_v26 = vld [vmem:[%s2351_s0 + $0xc0] sm:$0xff]  ;;  %v43_v27 = vld [vmem:[%s2351_s0 + $0xd0] sm:$0xff] }
  0x1f   :  { %1171 = vmatpush3.msra.mxu1 %v179_v55  ;;  %1092 = vmatprep.subr.mxu0 %v162_v56  ;;  %v42_v23 = vld [vmem:[%s2351_s0 + $0xc8] sm:$0xff]  ;;  %v237_v28 = vld [vmem:[%s2350_s1 + $0x2e0] sm:$0xff]  ;;  %v52_v32 = vld [vmem:[%s2351_s0 + $0x118] sm:$0xff] }
  0x20   :  { %1172 = vmatprep.subr.mxu1 %v194_v57  ;;  %1093 = vmatpush3.msra.mxu0 %v146_v58  ;;  %v254_v25 = vld [vmem:[%s2350_s1 + $0x368] sm:$0xff]  ;;  %v269_v29 = vld [vmem:[%s2350_s1 + $0x3e0] sm:$0xff]  ;;  %v51_v35 = vld [vmem:[%s2351_s0 + $0x110] sm:$0xff] }
  0x21   :  { %1173 = vmatpush3.msra.mxu1 %v178_v59  ;;  %1094 = vmatprep.subr.mxu0 %v161_v60  ;;  %v221_v30 = vld [vmem:[%s2350_s1 + $0x260] sm:$0xff]  ;;  %v50_v31 = vld [vmem:[%s2351_s0 + $0x108] sm:$0xff]  ;;  %v236_v36 = vld [vmem:[%s2350_s1 + $0x2d8] sm:$0xff] }
  0x22   :  { %1174 = vmatprep.subr.mxu1 %v193_v61  ;;  %1095 = vmatpush3.msra.mxu0 %v145_v62  ;;  %v253_v33 = vld [vmem:[%s2350_s1 + $0x360] sm:$0xff]  ;;  %v268_v37 = vld [vmem:[%s2350_s1 + $0x3d8] sm:$0xff]  ;;  %v58_v39 = vld [vmem:[%s2351_s0 + $0x148] sm:$0xff] }
  0x23   :  { %337 = vmatprep.mubr.f32.mxu0 %v18_v63  ;;  %1175 = vmatpush3.msra.mxu1 %v177_v0  ;;  %v49_v34 = vld [vmem:[%s2351_s0 + $0x100] sm:$0xff]  ;;  %v220_v38 = vld [vmem:[%s2350_s1 + $0x258] sm:$0xff]  ;;  %v59_v43 = vld [vmem:[%s2351_s0 + $0x150] sm:$0xff] }
  0x24   :  { %482 = vmatprep.mubr.f32.mxu1 %v20_v1  ;;  %338 = vmatmul.mubr.f32.vlgmr.msra.gmra.mxu0 %v17_v2  ;;  %v60_v40 = vld [vmem:[%s2351_s0 + $0x158] sm:$0xff]  ;;  %v57_v42 = vld [vmem:[%s2351_s0 + $0x140] sm:$0xff]  ;;  %v235_v44 = vld [vmem:[%s2350_s1 + $0x2d0] sm:$0xff] }
  0x25   :  { %483 = vmatmul.mubr.f32.vlgmr.msra.gmra.mxu1 %v19_v3  ;;  %1224 = vmatprep.subr.mxu0 %v240_v4  ;;  %v252_v41 = vld [vmem:[%s2350_s1 + $0x358] sm:$0xff]  ;;  %v267_v45 = vld [vmem:[%s2350_s1 + $0x3d0] sm:$0xff]  ;;  %v66_v47 = vld [vmem:[%s2351_s0 + $0x188] sm:$0xff] }
  0x26   :  { %1304 = vmatprep.subr.mxu1 %v272_v5  ;;  %1225 = vmatpush3.msra.mxu0 %v224_v6  ;;  %v219_v46 = vld [vmem:[%s2350_s1 + $0x250] sm:$0xff]  ;;  %v68_v48 = vld [vmem:[%s2351_s0 + $0x198] sm:$0xff]  ;;  %v65_v50 = vld [vmem:[%s2351_s0 + $0x180] sm:$0xff] }
  0x27   :  { %342 = vmatprep.mubr.f32.mxu0 %v26_v7  ;;  %487 = vmatprep.mubr.f32.mxu1 %v28_v8  ;;  %v251_v49 = vld [vmem:[%s2350_s1 + $0x350] sm:$0xff]  ;;  %v234_v52 = vld [vmem:[%s2350_s1 + $0x2c8] sm:$0xff]  ;;  %v76_v56 = vld [vmem:[%s2351_s0 + $0x1d8] sm:$0xff] }
  0x28   :  { %1305 = vmatpush3.msra.mxu1 %v256_v9  ;;  %343 = vmatmul.mubr.f32.gmra.mxu0 %v25_v10  ;;  %v67_v51 = vld [vmem:[%s2351_s0 + $0x190] sm:$0xff]  ;;  %v266_v53 = vld [vmem:[%s2350_s1 + $0x3c8] sm:$0xff]  ;;  %v73_v58 = vld [vmem:[%s2351_s0 + $0x1c0] sm:$0xff] }
  0x29   :  { %488 = vmatmul.mubr.f32.gmra.mxu1 %v27_v11  ;;  %1226 = vmatprep.subr.mxu0 %v239_v12  ;;  %v218_v54 = vld [vmem:[%s2350_s1 + $0x248] sm:$0xff]  ;;  %v75_v59 = vld [vmem:[%s2351_s0 + $0x1d0] sm:$0xff]  ;;  %v233_v60 = vld [vmem:[%s2350_s1 + $0x2c0] sm:$0xff] }
  0x2a   :  { %1306 = vmatprep.subr.mxu1 %v271_v13  ;;  %1227 = vmatpush3.msra.mxu0 %v223_v14  ;;  %v74_v55 = vld [vmem:[%s2351_s0 + $0x1c8] sm:$0xff]  ;;  %v265_v61 = vld [vmem:[%s2350_s1 + $0x3c0] sm:$0xff]  ;;  %v84_v0 = vld [vmem:[%s2351_s0 + $0x218] sm:$0xff] }
  0x2b   :  { %347 = vmatprep.mubr.f32.mxu0 %v34_v15  ;;  %492 = vmatprep.mubr.f32.mxu1 %v36_v16  ;;  %v250_v57 = vld [vmem:[%s2350_s1 + $0x348] sm:$0xff]  ;;  %v217_v62 = vld [vmem:[%s2350_s1 + $0x240] sm:$0xff]  ;;  %v83_v3 = vld [vmem:[%s2351_s0 + $0x210] sm:$0xff] }
  0x2c   :  { %1307 = vmatpush3.msra.mxu1 %v255_v17  ;;  %348 = vmatmul.mubr.f32.gmra.mxu0 %v33_v18  ;;  %v82_v63 = vld [vmem:[%s2351_s0 + $0x208] sm:$0xff]  ;;  %v249_v1 = vld [vmem:[%s2350_s1 + $0x340] sm:$0xff]  ;;  %v232_v4 = vld [vmem:[%s2350_s1 + $0x2b8] sm:$0xff] }
  0x2d   :  { %493 = vmatmul.mubr.f32.gmra.mxu1 %v35_v19  ;;  %1228 = vmatprep.subr.mxu0 %v238_v20  ;;  %v81_v2 = vld [vmem:[%s2351_s0 + $0x200] sm:$0xff]  ;;  %v264_v5 = vld [vmem:[%s2350_s1 + $0x3b8] sm:$0xff]  ;;  %v90_v7 = vld [vmem:[%s2351_s0 + $0x248] sm:$0xff] }
  0x2e   :  { %1308 = vmatprep.subr.mxu1 %v270_v21  ;;  %1229 = vmatpush3.msra.mxu0 %v222_v22  ;;  %v216_v6 = vld [vmem:[%s2350_s1 + $0x238] sm:$0xff]  ;;  %v89_v10 = vld [vmem:[%s2351_s0 + $0x240] sm:$0xff]  ;;  %v91_v11 = vld [vmem:[%s2351_s0 + $0x250] sm:$0xff] }
  0x2f   :  { %352 = vmatprep.mubr.f32.mxu0 %v42_v23  ;;  %497 = vmatprep.mubr.f32.mxu1 %v44_v24  ;;  %v92_v8 = vld [vmem:[%s2351_s0 + $0x258] sm:$0xff]  ;;  %v231_v12 = vld [vmem:[%s2350_s1 + $0x2b0] sm:$0xff]  ;;  %v98_v15 = vld [vmem:[%s2351_s0 + $0x288] sm:$0xff] }
  0x30   :  { %1309 = vmatpush3.msra.mxu1 %v254_v25  ;;  %353 = vmatmul.mubr.f32.gmra.mxu0 %v41_v26  ;;  %v248_v9 = vld [vmem:[%s2350_s1 + $0x338] sm:$0xff]  ;;  %v263_v13 = vld [vmem:[%s2350_s1 + $0x3b0] sm:$0xff]  ;;  %v97_v18 = vld [vmem:[%s2351_s0 + $0x280] sm:$0xff] }
  0x31   :  { %498 = vmatmul.mubr.f32.gmra.mxu1 %v43_v27  ;;  %1230 = vmatprep.subr.mxu0 %v237_v28  ;;  %v215_v14 = vld [vmem:[%s2350_s1 + $0x230] sm:$0xff]  ;;  %v100_v16 = vld [vmem:[%s2351_s0 + $0x298] sm:$0xff]  ;;  %v230_v20 = vld [vmem:[%s2350_s1 + $0x2a8] sm:$0xff] }
  0x32   :  { %1310 = vmatprep.subr.mxu1 %v269_v29  ;;  %1231 = vmatpush3.msra.mxu0 %v221_v30  ;;  %v247_v17 = vld [vmem:[%s2350_s1 + $0x330] sm:$0xff]  ;;  %v262_v21 = vld [vmem:[%s2350_s1 + $0x3a8] sm:$0xff]  ;;  %v108_v24 = vld [vmem:[%s2351_s0 + $0x2d8] sm:$0xff] }
  0x33   :  { %357 = vmatprep.mubr.f32.mxu0 %v50_v31  ;;  %502 = vmatprep.mubr.f32.mxu1 %v52_v32  ;;  %v99_v19 = vld [vmem:[%s2351_s0 + $0x290] sm:$0xff]  ;;  %v214_v22 = vld [vmem:[%s2350_s1 + $0x228] sm:$0xff]  ;;  %v105_v26 = vld [vmem:[%s2351_s0 + $0x2c0] sm:$0xff] }
  0x34   :  { %1311 = vmatpush3.msra.mxu1 %v253_v33  ;;  %358 = vmatmul.mubr.f32.gmra.mxu0 %v49_v34  ;;  %v106_v23 = vld [vmem:[%s2351_s0 + $0x2c8] sm:$0xff]  ;;  %v107_v27 = vld [vmem:[%s2351_s0 + $0x2d0] sm:$0xff]  ;;  %v229_v28 = vld [vmem:[%s2350_s1 + $0x2a0] sm:$0xff] }
  0x35   :  { %503 = vmatmul.mubr.f32.gmra.mxu1 %v51_v35  ;;  %1232 = vmatprep.subr.mxu0 %v236_v36  ;;  %v246_v25 = vld [vmem:[%s2350_s1 + $0x328] sm:$0xff]  ;;  %v261_v29 = vld [vmem:[%s2350_s1 + $0x3a0] sm:$0xff]  ;;  %v116_v32 = vld [vmem:[%s2351_s0 + $0x318] sm:$0xff] }
  0x36   :  { %1312 = vmatprep.subr.mxu1 %v268_v37  ;;  %1233 = vmatpush3.msra.mxu0 %v220_v38  ;;  %v213_v30 = vld [vmem:[%s2350_s1 + $0x220] sm:$0xff]  ;;  %v114_v31 = vld [vmem:[%s2351_s0 + $0x308] sm:$0xff]  ;;  %v115_v35 = vld [vmem:[%s2351_s0 + $0x310] sm:$0xff] }
  0x37   :  { %362 = vmatprep.mubr.f32.mxu0 %v58_v39  ;;  %507 = vmatprep.mubr.f32.mxu1 %v60_v40  ;;  %v245_v33 = vld [vmem:[%s2350_s1 + $0x320] sm:$0xff]  ;;  %v228_v36 = vld [vmem:[%s2350_s1 + $0x298] sm:$0xff]  ;;  %v122_v39 = vld [vmem:[%s2351_s0 + $0x348] sm:$0xff] }
  0x38   :  { %1313 = vmatpush3.msra.mxu1 %v252_v41  ;;  %363 = vmatmul.mubr.f32.gmra.mxu0 %v57_v42  ;;  %v113_v34 = vld [vmem:[%s2351_s0 + $0x300] sm:$0xff]  ;;  %v260_v37 = vld [vmem:[%s2350_s1 + $0x398] sm:$0xff] }
  0x39   :  { %508 = vmatmul.mubr.f32.gmra.mxu1 %v59_v43  ;;  %1234 = vmatprep.subr.mxu0 %v235_v44  ;;  %v212_v38 = vld [vmem:[%s2350_s1 + $0x218] sm:$0xff]  ;;  %v121_v42 = vld [vmem:[%s2351_s0 + $0x340] sm:$0xff]  ;;  %v123_v43 = vld [vmem:[%s2351_s0 + $0x350] sm:$0xff] }
  0x3a   :  { %1314 = vmatprep.subr.mxu1 %v267_v45  ;;  %1235 = vmatpush3.msra.mxu0 %v219_v46  ;;  %v124_v40 = vld [vmem:[%s2351_s0 + $0x358] sm:$0xff]  ;;  %v227_v44 = vld [vmem:[%s2350_s1 + $0x290] sm:$0xff] }
  0x3b   :  { %367 = vmatprep.mubr.f32.mxu0 %v66_v47  ;;  %512 = vmatprep.mubr.f32.mxu1 %v68_v48  ;;  %v244_v41 = vld [vmem:[%s2350_s1 + $0x318] sm:$0xff]  ;;  %v259_v45 = vld [vmem:[%s2350_s1 + $0x390] sm:$0xff]  ;;  %v130_v47 = vld [vmem:[%s2351_s0 + $0x388] sm:$0xff] }
  0x3c   :  { %1315 = vmatpush3.msra.mxu1 %v251_v49  ;;  %368 = vmatmul.mubr.f32.gmra.mxu0 %v65_v50  ;;  %v211_v46 = vld [vmem:[%s2350_s1 + $0x210] sm:$0xff]  ;;  %v132_v48 = vld [vmem:[%s2351_s0 + $0x398] sm:$0xff]  ;;  %v129_v50 = vld [vmem:[%s2351_s0 + $0x380] sm:$0xff] }
  0x3d   :  { %513 = vmatmul.mubr.f32.gmra.mxu1 %v67_v51  ;;  %1236 = vmatprep.subr.mxu0 %v234_v52  ;;  %v243_v49 = vld [vmem:[%s2350_s1 + $0x310] sm:$0xff]  ;;  %v226_v52 = vld [vmem:[%s2350_s1 + $0x288] sm:$0xff] }
  0x3e   :  { %1316 = vmatprep.subr.mxu1 %v266_v53  ;;  %1237 = vmatpush3.msra.mxu0 %v218_v54  ;;  %v131_v51 = vld [vmem:[%s2351_s0 + $0x390] sm:$0xff]  ;;  %v258_v53 = vld [vmem:[%s2350_s1 + $0x388] sm:$0xff] }
  0x3f   :  { %372 = vmatprep.mubr.f32.mxu0 %v74_v55  ;;  %517 = vmatprep.mubr.f32.mxu1 %v76_v56  ;;  %v210_v54 = vld [vmem:[%s2350_s1 + $0x208] sm:$0xff]  ;;  %v140_v56 = vld [vmem:[%s2351_s0 + $0x3d8] sm:$0xff] }
  0x40   :  { %1317 = vmatpush3.msra.mxu1 %v250_v57  ;;  %373 = vmatmul.mubr.f32.gmra.mxu0 %v73_v58  ;;  %v138_v55 = vld [vmem:[%s2351_s0 + $0x3c8] sm:$0xff]  ;;  %v137_v58 = vld [vmem:[%s2351_s0 + $0x3c0] sm:$0xff] }
  0x41   :  { %518 = vmatmul.mubr.f32.gmra.mxu1 %v75_v59  ;;  %1238 = vmatprep.subr.mxu0 %v233_v60  ;;  %v242_v57 = vld [vmem:[%s2350_s1 + $0x308] sm:$0xff]  ;;  %v139_v59 = vld [vmem:[%s2351_s0 + $0x3d0] sm:$0xff]  ;;  %v225_v60 = vld [vmem:[%s2350_s1 + $0x280] sm:$0xff] }
  0x42   :  { %1318 = vmatprep.subr.mxu1 %v265_v61  ;;  %1239 = vmatpush3.msra.mxu0 %v217_v62  ;;  %v257_v61 = vld [vmem:[%s2350_s1 + $0x380] sm:$0xff] }
  0x43   :  { %377 = vmatprep.mubr.f32.mxu0 %v82_v63  ;;  %522 = vmatprep.mubr.f32.mxu1 %v84_v0  ;;  %v209_v62 = vld [vmem:[%s2350_s1 + $0x200] sm:$0xff]  ;;  %v22_v63 = vld [vmem:[%s2351_s0 + $0x28] sm:$0xff] }
  0x44   :  { %1319 = vmatpush3.msra.mxu1 %v249_v1  ;;  %378 = vmatmul.mubr.f32.gmra.mxu0 %v81_v2  ;;  %v241_v0 = vld [vmem:[%s2350_s1 + $0x300] sm:$0xff]  ;;  %v24_v1 = vld [vmem:[%s2351_s0 + $0x38] sm:$0xff] }
  0x45   :  { %523 = vmatmul.mubr.f32.gmra.mxu1 %v83_v3  ;;  %1240 = vmatprep.subr.mxu0 %v232_v4  ;;  %v21_v2 = vld [vmem:[%s2351_s0 + $0x20] sm:$0xff]  ;;  %v23_v3 = vld [vmem:[%s2351_s0 + $0x30] sm:$0xff]  ;;  %v30_v4 = vld [vmem:[%s2351_s0 + $0x68] sm:$0xff] }
  0x46   :  { %1320 = vmatprep.subr.mxu1 %v264_v5  ;;  %1241 = vmatpush3.msra.mxu0 %v216_v6  ;;  %v32_v5 = vld [vmem:[%s2351_s0 + $0x78] sm:$0xff]  ;;  %v29_v6 = vld [vmem:[%s2351_s0 + $0x60] sm:$0xff] }
  0x47   :  { %382 = vmatprep.mubr.f32.mxu0 %v90_v7  ;;  %527 = vmatprep.mubr.f32.mxu1 %v92_v8  ;;  %v31_v7 = vld [vmem:[%s2351_s0 + $0x70] sm:$0xff]  ;;  %v38_v8 = vld [vmem:[%s2351_s0 + $0xa8] sm:$0xff] }
  0x48   :  { %1321 = vmatpush3.msra.mxu1 %v248_v9  ;;  %383 = vmatmul.mubr.f32.gmra.mxu0 %v89_v10  ;;  %v40_v9 = vld [vmem:[%s2351_s0 + $0xb8] sm:$0xff]  ;;  %v37_v10 = vld [vmem:[%s2351_s0 + $0xa0] sm:$0xff] }
  0x49   :  { %528 = vmatmul.mubr.f32.gmra.mxu1 %v91_v11  ;;  %1242 = vmatprep.subr.mxu0 %v231_v12  ;;  %v39_v11 = vld [vmem:[%s2351_s0 + $0xb0] sm:$0xff]  ;;  %v46_v12 = vld [vmem:[%s2351_s0 + $0xe8] sm:$0xff] }
  0x4a   :  { %1322 = vmatprep.subr.mxu1 %v263_v13  ;;  %1243 = vmatpush3.msra.mxu0 %v215_v14  ;;  %v48_v13 = vld [vmem:[%s2351_s0 + $0xf8] sm:$0xff]  ;;  %v45_v14 = vld [vmem:[%s2351_s0 + $0xe0] sm:$0xff] }
  0x4b   :  { %387 = vmatprep.mubr.f32.mxu0 %v98_v15  ;;  %532 = vmatprep.mubr.f32.mxu1 %v100_v16  ;;  %v47_v15 = vld [vmem:[%s2351_s0 + $0xf0] sm:$0xff]  ;;  %v54_v16 = vld [vmem:[%s2351_s0 + $0x128] sm:$0xff] }
  0x4c   :  { %1323 = vmatpush3.msra.mxu1 %v247_v17  ;;  %388 = vmatmul.mubr.f32.gmra.mxu0 %v97_v18  ;;  %v56_v17 = vld [vmem:[%s2351_s0 + $0x138] sm:$0xff]  ;;  %v53_v18 = vld [vmem:[%s2351_s0 + $0x120] sm:$0xff] }
  0x4d   :  { %533 = vmatmul.mubr.f32.gmra.mxu1 %v99_v19  ;;  %1244 = vmatprep.subr.mxu0 %v230_v20  ;;  %v55_v19 = vld [vmem:[%s2351_s0 + $0x130] sm:$0xff]  ;;  %v62_v20 = vld [vmem:[%s2351_s0 + $0x168] sm:$0xff] }
  0x4e   :  { %1324 = vmatprep.subr.mxu1 %v262_v21  ;;  %1245 = vmatpush3.msra.mxu0 %v214_v22  ;;  %v64_v21 = vld [vmem:[%s2351_s0 + $0x178] sm:$0xff]  ;;  %v61_v22 = vld [vmem:[%s2351_s0 + $0x160] sm:$0xff] }
  0x4f   :  { %392 = vmatprep.mubr.f32.mxu0 %v106_v23  ;;  %537 = vmatprep.mubr.f32.mxu1 %v108_v24  ;;  %v63_v23 = vld [vmem:[%s2351_s0 + $0x170] sm:$0xff]  ;;  %v70_v24 = vld [vmem:[%s2351_s0 + $0x1a8] sm:$0xff] }
  0x50   :  { %1325 = vmatpush3.msra.mxu1 %v246_v25  ;;  %393 = vmatmul.mubr.f32.gmra.mxu0 %v105_v26  ;;  %v72_v25 = vld [vmem:[%s2351_s0 + $0x1b8] sm:$0xff]  ;;  %v69_v26 = vld [vmem:[%s2351_s0 + $0x1a0] sm:$0xff] }
  0x51   :  { %538 = vmatmul.mubr.f32.gmra.mxu1 %v107_v27  ;;  %1246 = vmatprep.subr.mxu0 %v229_v28  ;;  %v71_v27 = vld [vmem:[%s2351_s0 + $0x1b0] sm:$0xff]  ;;  %v78_v28 = vld [vmem:[%s2351_s0 + $0x1e8] sm:$0xff] }
  0x52   :  { %1326 = vmatprep.subr.mxu1 %v261_v29  ;;  %1247 = vmatpush3.msra.mxu0 %v213_v30  ;;  %v80_v29 = vld [vmem:[%s2351_s0 + $0x1f8] sm:$0xff]  ;;  %v77_v30 = vld [vmem:[%s2351_s0 + $0x1e0] sm:$0xff] }
  0x53   :  { %397 = vmatprep.mubr.f32.mxu0 %v114_v31  ;;  %542 = vmatprep.mubr.f32.mxu1 %v116_v32  ;;  %v79_v31 = vld [vmem:[%s2351_s0 + $0x1f0] sm:$0xff]  ;;  %v86_v32 = vld [vmem:[%s2351_s0 + $0x228] sm:$0xff] }
  0x54   :  { %1327 = vmatpush3.msra.mxu1 %v245_v33  ;;  %398 = vmatmul.mubr.f32.gmra.mxu0 %v113_v34  ;;  %v88_v33 = vld [vmem:[%s2351_s0 + $0x238] sm:$0xff]  ;;  %v85_v34 = vld [vmem:[%s2351_s0 + $0x220] sm:$0xff] }
  0x55   :  { %543 = vmatmul.mubr.f32.gmra.mxu1 %v115_v35  ;;  %1248 = vmatprep.subr.mxu0 %v228_v36  ;;  %v87_v35 = vld [vmem:[%s2351_s0 + $0x230] sm:$0xff]  ;;  %v94_v36 = vld [vmem:[%s2351_s0 + $0x268] sm:$0xff] }
  0x56   :  { %1328 = vmatprep.subr.mxu1 %v260_v37  ;;  %1249 = vmatpush3.msra.mxu0 %v212_v38  ;;  %v96_v37 = vld [vmem:[%s2351_s0 + $0x278] sm:$0xff]  ;;  %v93_v38 = vld [vmem:[%s2351_s0 + $0x260] sm:$0xff] }
  0x57   :  { %402 = vmatprep.mubr.f32.mxu0 %v122_v39  ;;  %547 = vmatprep.mubr.f32.mxu1 %v124_v40  ;;  %v95_v39 = vld [vmem:[%s2351_s0 + $0x270] sm:$0xff]  ;;  %v102_v40 = vld [vmem:[%s2351_s0 + $0x2a8] sm:$0xff] }
  0x58   :  { %1329 = vmatpush3.msra.mxu1 %v244_v41  ;;  %403 = vmatmul.mubr.f32.gmra.mxu0 %v121_v42  ;;  %v104_v41 = vld [vmem:[%s2351_s0 + $0x2b8] sm:$0xff]  ;;  %v101_v42 = vld [vmem:[%s2351_s0 + $0x2a0] sm:$0xff] }
  0x59   :  { %548 = vmatmul.mubr.f32.gmra.mxu1 %v123_v43  ;;  %1250 = vmatprep.subr.mxu0 %v227_v44  ;;  %v103_v43 = vld [vmem:[%s2351_s0 + $0x2b0] sm:$0xff]  ;;  %v110_v44 = vld [vmem:[%s2351_s0 + $0x2e8] sm:$0xff] }
  0x5a   :  { %1330 = vmatprep.subr.mxu1 %v259_v45  ;;  %1251 = vmatpush3.msra.mxu0 %v211_v46  ;;  %v112_v45 = vld [vmem:[%s2351_s0 + $0x2f8] sm:$0xff]  ;;  %v109_v46 = vld [vmem:[%s2351_s0 + $0x2e0] sm:$0xff] }
  0x5b   :  { %407 = vmatprep.mubr.f32.mxu0 %v130_v47  ;;  %552 = vmatprep.mubr.f32.mxu1 %v132_v48  ;;  %v111_v47 = vld [vmem:[%s2351_s0 + $0x2f0] sm:$0xff]  ;;  %v118_v48 = vld [vmem:[%s2351_s0 + $0x328] sm:$0xff] }
  0x5c   :  { %1331 = vmatpush3.msra.mxu1 %v243_v49  ;;  %408 = vmatmul.mubr.f32.gmra.mxu0 %v129_v50  ;;  %v120_v49 = vld [vmem:[%s2351_s0 + $0x338] sm:$0xff]  ;;  %v117_v50 = vld [vmem:[%s2351_s0 + $0x320] sm:$0xff] }
  0x5d   :  { %553 = vmatmul.mubr.f32.gmra.mxu1 %v131_v51  ;;  %1252 = vmatprep.subr.mxu0 %v226_v52  ;;  %v119_v51 = vld [vmem:[%s2351_s0 + $0x330] sm:$0xff]  ;;  %v126_v52 = vld [vmem:[%s2351_s0 + $0x368] sm:$0xff] }
  0x5e   :  { %1332 = vmatprep.subr.mxu1 %v258_v53  ;;  %1253 = vmatpush3.msra.mxu0 %v210_v54  ;;  %v128_v53 = vld [vmem:[%s2351_s0 + $0x378] sm:$0xff]  ;;  %v125_v54 = vld [vmem:[%s2351_s0 + $0x360] sm:$0xff] }
  0x5f   :  { %412 = vmatprep.mubr.f32.mxu0 %v138_v55  ;;  %557 = vmatprep.mubr.f32.mxu1 %v140_v56  ;;  %v127_v55 = vld [vmem:[%s2351_s0 + $0x370] sm:$0xff]  ;;  %v134_v56 = vld [vmem:[%s2351_s0 + $0x3a8] sm:$0xff] }
  0x60   :  { %1333 = vmatpush3.msra.mxu1 %v242_v57  ;;  %413 = vmatmul.mubr.f32.gmra.mxu0 %v137_v58  ;;  %v136_v57 = vld [vmem:[%s2351_s0 + $0x3b8] sm:$0xff]  ;;  %v133_v58 = vld [vmem:[%s2351_s0 + $0x3a0] sm:$0xff] }
  0x61   :  { %558 = vmatmul.mubr.f32.gmra.mxu1 %v139_v59  ;;  %1254 = vmatprep.subr.mxu0 %v225_v60  ;;  %v135_v59 = vld [vmem:[%s2351_s0 + $0x3b0] sm:$0xff]  ;;  %v142_v60 = vld [vmem:[%s2351_s0 + $0x3e8] sm:$0xff] }
  0x62   :  { %1334 = vmatprep.subr.mxu1 %v257_v61  ;;  %1255 = vmatpush3.msra.mxu0 %v209_v62  ;;  %v144_v61 = vld [vmem:[%s2351_s0 + $0x3f8] sm:$0xff]  ;;  %v141_v62 = vld [vmem:[%s2351_s0 + $0x3e0] sm:$0xff] }
  0x63   :  { %627 = vmatprep.mubr.f32.mxu0 %v22_v63  ;;  %1335 = vmatpush3.msra.mxu1 %v241_v0  ;;  %v143_v63 = vld [vmem:[%s2351_s0 + $0x3f0] sm:$0xff] }
  0x64   :  { %772 = vmatprep.mubr.f32.mxu1 %v24_v1  ;;  %628 = vmatmul.mubr.f32.vlgmr.msra.gmra.mxu0 %v21_v2 }
  0x65   :  { %773 = vmatmul.mubr.f32.vlgmr.msra.gmra.mxu1 %v23_v3  ;;  %632 = vmatprep.mubr.f32.mxu0 %v30_v4 }
  0x66   :  { %777 = vmatprep.mubr.f32.mxu1 %v32_v5 }
  0x68   :  { %633 = vmatmul.mubr.f32.gmra.mxu0 %v29_v6 }
  0x69   :  { %778 = vmatmul.mubr.f32.gmra.mxu1 %v31_v7  ;;  %637 = vmatprep.mubr.f32.mxu0 %v38_v8 }
  0x6a   :  { %782 = vmatprep.mubr.f32.mxu1 %v40_v9 }
  0x6c   :  { %638 = vmatmul.mubr.f32.gmra.mxu0 %v37_v10 }
  0x6d   :  { %783 = vmatmul.mubr.f32.gmra.mxu1 %v39_v11  ;;  %642 = vmatprep.mubr.f32.mxu0 %v46_v12 }
  0x6e   :  { %787 = vmatprep.mubr.f32.mxu1 %v48_v13 }
  0x70   :  { %643 = vmatmul.mubr.f32.gmra.mxu0 %v45_v14 }
  0x71   :  { %788 = vmatmul.mubr.f32.gmra.mxu1 %v47_v15  ;;  %647 = vmatprep.mubr.f32.mxu0 %v54_v16 }
  0x72   :  { %792 = vmatprep.mubr.f32.mxu1 %v56_v17 }
  0x74   :  { %648 = vmatmul.mubr.f32.gmra.mxu0 %v53_v18 }
  0x75   :  { %793 = vmatmul.mubr.f32.gmra.mxu1 %v55_v19  ;;  %652 = vmatprep.mubr.f32.mxu0 %v62_v20 }
  0x76   :  { %797 = vmatprep.mubr.f32.mxu1 %v64_v21 }
  0x78   :  { %653 = vmatmul.mubr.f32.gmra.mxu0 %v61_v22 }
  0x79   :  { %798 = vmatmul.mubr.f32.gmra.mxu1 %v63_v23  ;;  %657 = vmatprep.mubr.f32.mxu0 %v70_v24 }
  0x7a   :  { %802 = vmatprep.mubr.f32.mxu1 %v72_v25 }
  0x7c   :  { %658 = vmatmul.mubr.f32.gmra.mxu0 %v69_v26 }
  0x7d   :  { %803 = vmatmul.mubr.f32.gmra.mxu1 %v71_v27  ;;  %662 = vmatprep.mubr.f32.mxu0 %v78_v28 }
  0x7e   :  { %807 = vmatprep.mubr.f32.mxu1 %v80_v29 }
  0x80   :  { %663 = vmatmul.mubr.f32.gmra.mxu0 %v77_v30 }
  0x81   :  { %808 = vmatmul.mubr.f32.gmra.mxu1 %v79_v31  ;;  %667 = vmatprep.mubr.f32.mxu0 %v86_v32 }
  0x82   :  { %812 = vmatprep.mubr.f32.mxu1 %v88_v33 }
  0x84   :  { %668 = vmatmul.mubr.f32.gmra.mxu0 %v85_v34 }
  0x85   :  { %813 = vmatmul.mubr.f32.gmra.mxu1 %v87_v35  ;;  %672 = vmatprep.mubr.f32.mxu0 %v94_v36 }
  0x86   :  { %817 = vmatprep.mubr.f32.mxu1 %v96_v37 }
  0x88   :  { %673 = vmatmul.mubr.f32.gmra.mxu0 %v93_v38 }
  0x89   :  { %818 = vmatmul.mubr.f32.gmra.mxu1 %v95_v39  ;;  %677 = vmatprep.mubr.f32.mxu0 %v102_v40 }
  0x8a   :  { %822 = vmatprep.mubr.f32.mxu1 %v104_v41 }
  0x8c   :  { %678 = vmatmul.mubr.f32.gmra.mxu0 %v101_v42 }
  0x8d   :  { %823 = vmatmul.mubr.f32.gmra.mxu1 %v103_v43  ;;  %682 = vmatprep.mubr.f32.mxu0 %v110_v44 }
  0x8e   :  { %827 = vmatprep.mubr.f32.mxu1 %v112_v45 }
  0x90   :  { %683 = vmatmul.mubr.f32.gmra.mxu0 %v109_v46 }
  0x91   :  { %828 = vmatmul.mubr.f32.gmra.mxu1 %v111_v47  ;;  %687 = vmatprep.mubr.f32.mxu0 %v118_v48 }
  0x92   :  { %832 = vmatprep.mubr.f32.mxu1 %v120_v49 }
  0x94   :  { %688 = vmatmul.mubr.f32.gmra.mxu0 %v117_v50 }
  0x95   :  { %833 = vmatmul.mubr.f32.gmra.mxu1 %v119_v51  ;;  %692 = vmatprep.mubr.f32.mxu0 %v126_v52 }
  0x96   :  { %837 = vmatprep.mubr.f32.mxu1 %v128_v53 }
  0x98   :  { %693 = vmatmul.mubr.f32.gmra.mxu0 %v125_v54 }
  0x99   :  { %838 = vmatmul.mubr.f32.gmra.mxu1 %v127_v55  ;;  %697 = vmatprep.mubr.f32.mxu0 %v134_v56 }
  0x9a   :  { %842 = vmatprep.mubr.f32.mxu1 %v136_v57 }
  0x9c   :  { %698 = vmatmul.mubr.f32.gmra.mxu0 %v133_v58 }
  0x9d   :  { %843 = vmatmul.mubr.f32.gmra.mxu1 %v135_v59  ;;  %702 = vmatprep.mubr.f32.mxu0 %v142_v60 }
  0x9e   :  { %847 = vmatprep.mubr.f32.mxu1 %v144_v61 }
  0xa0   :  { %703 = vmatmul.mubr.f32.gmra.mxu0 %v141_v62 }
  0xa1   :  { %848 = vmatmul.mubr.f32.gmra.mxu1 %v143_v63 }
  0xe4   :  { %v1096_v0 = vpop.f32.mrf.mxu0 }
  0xe5   :  { %v1176_v1 = vpop.f32.mrf.mxu1 }
  0xe6   :  { %v1097_v2 = vpop.f32.mrf.mxu0 }
  0xe7   :  { %v1177_v3 = vpop.f32.mrf.mxu1  ;;  %v1098_v4 = vadd.f32 %v1097_v2, %v1096_v0 }
  0xe8   :  { %v1178_v5 = vadd.f32 %v1177_v3, %v1176_v1  ;;  %v1099_v6 = vpop.f32.mrf.mxu0 }
  0xe9   :  { %v1179_v7 = vpop.f32.mrf.mxu1 }
  0xea   :  { %v2179_v8 = vadd.f32 %v1178_v5, %v1098_v4  ;;  %v1100_v9 = vpop.f32.mrf.mxu0 }
  0xeb   :  { %v1180_v10 = vpop.f32.mrf.mxu1  ;;  %v1101_v11 = vadd.f32 %v1100_v9, %v1099_v6 }
  0xec   :  { %v1181_v12 = vadd.f32 %v1180_v10, %v1179_v7  ;;  %v1102_v13 = vpop.f32.mrf.mxu0 }
  0xed   :  { %v1182_v14 = vpop.f32.mrf.mxu1 }
  0xee   :  { %v2181_v15 = vadd.f32 %v1181_v12, %v1101_v11  ;;  %v1103_v16 = vpop.f32.mrf.mxu0 }
  0xef   :  { %v1183_v17 = vpop.f32.mrf.mxu1  ;;  %v1104_v18 = vadd.f32 %v1103_v16, %v1102_v13 }
  0xf0   :  { %v1184_v19 = vadd.f32 %v1183_v17, %v1182_v14  ;;  %v1105_v20 = vpop.f32.mrf.mxu0 }
  0xf1   :  { %v1185_v21 = vpop.f32.mrf.mxu1 }
  0xf2   :  { %v2183_v22 = vadd.f32 %v1184_v19, %v1104_v18  ;;  %v1106_v23 = vpop.f32.mrf.mxu0 }
  0xf3   :  { %v1186_v24 = vpop.f32.mrf.mxu1  ;;  %v1107_v25 = vadd.f32 %v1106_v23, %v1105_v20 }
  0xf4   :  { %v1187_v26 = vadd.f32 %v1186_v24, %v1185_v21  ;;  %v1108_v27 = vpop.f32.mrf.mxu0 }
  0xf5   :  { %v1188_v28 = vpop.f32.mrf.mxu1 }
  0xf6   :  { %v2185_v29 = vadd.f32 %v1187_v26, %v1107_v25  ;;  %v1109_v30 = vpop.f32.mrf.mxu0 }
  0xf7   :  { %v1189_v31 = vpop.f32.mrf.mxu1  ;;  %v1110_v32 = vadd.f32 %v1109_v30, %v1108_v27 }
  0xf8   :  { %v1190_v33 = vadd.f32 %v1189_v31, %v1188_v28  ;;  %v1111_v34 = vpop.f32.mrf.mxu0 }
  0xf9   :  { %v1191_v35 = vpop.f32.mrf.mxu1 }
  0xfa   :  { %v2187_v36 = vadd.f32 %v1190_v33, %v1110_v32  ;;  %v1112_v37 = vpop.f32.mrf.mxu0 }
  0xfb   :  { %v1192_v38 = vpop.f32.mrf.mxu1  ;;  %v1113_v39 = vadd.f32 %v1112_v37, %v1111_v34 }
  0xfc   :  { %v1193_v40 = vadd.f32 %v1192_v38, %v1191_v35  ;;  %v1114_v41 = vpop.f32.mrf.mxu0 }
  0xfd   :  { %v1194_v42 = vpop.f32.mrf.mxu1 }
  0xfe   :  { %v2189_v43 = vadd.f32 %v1193_v40, %v1113_v39  ;;  %v1115_v44 = vpop.f32.mrf.mxu0 }
  0xff   :  { %v1195_v45 = vpop.f32.mrf.mxu1  ;;  %v1116_v46 = vadd.f32 %v1115_v44, %v1114_v41 }
 0x100   :  { %v1196_v47 = vadd.f32 %v1195_v45, %v1194_v42  ;;  %v1117_v48 = vpop.f32.mrf.mxu0 }
 0x101   :  { %v1197_v49 = vpop.f32.mrf.mxu1 }
 0x102   :  { %v2191_v50 = vadd.f32 %v1196_v47, %v1116_v46  ;;  %v1118_v51 = vpop.f32.mrf.mxu0 }
 0x103   :  { %v1198_v52 = vpop.f32.mrf.mxu1  ;;  %v1119_v53 = vadd.f32 %v1118_v51, %v1117_v48 }
 0x104   :  { %v1199_v54 = vadd.f32 %v1198_v52, %v1197_v49  ;;  %v1120_v55 = vpop.f32.mrf.mxu0 }
 0x105   :  { %v1200_v56 = vpop.f32.mrf.mxu1 }
 0x106   :  { %v2193_v57 = vadd.f32 %v1199_v54, %v1119_v53  ;;  %v1121_v58 = vpop.f32.mrf.mxu0 }
 0x107   :  { %v1201_v59 = vpop.f32.mrf.mxu1  ;;  %v1122_v60 = vadd.f32 %v1121_v58, %v1120_v55 }
 0x108   :  { %v1202_v61 = vadd.f32 %v1201_v59, %v1200_v56  ;;  %v1123_v62 = vpop.f32.mrf.mxu0 }
 0x109   :  { %v1203_v63 = vpop.f32.mrf.mxu1 }
 0x10a   :  { %v2195_v0 = vadd.f32 %v1202_v61, %v1122_v60  ;;  %v1124_v1 = vpop.f32.mrf.mxu0 }
 0x10b   :  { %v1204_v2 = vpop.f32.mrf.mxu1  ;;  %v1125_v3 = vadd.f32 %v1124_v1, %v1123_v62 }
 0x10c   :  { %v1205_v4 = vadd.f32 %v1204_v2, %v1203_v63  ;;  %v1126_v5 = vpop.f32.mrf.mxu0 }
 0x10d   :  { %v1206_v6 = vpop.f32.mrf.mxu1 }
 0x10e   :  { %v2197_v7 = vadd.f32 %v1205_v4, %v1125_v3  ;;  %v1127_v9 = vpop.f32.mrf.mxu0 }
 0x10f   :  { %v1207_v10 = vpop.f32.mrf.mxu1  ;;  %v1128_v11 = vadd.f32 %v1127_v9, %v1126_v5 }
 0x110   :  { %v1208_v12 = vadd.f32 %v1207_v10, %v1206_v6  ;;  %v1129_v13 = vpop.f32.mrf.mxu0 }
 0x111   :  { %v1209_v14 = vpop.f32.mrf.mxu1 }
 0x112   :  { %v2199_v16 = vadd.f32 %v1208_v12, %v1128_v11  ;;  %v1130_v17 = vpop.f32.mrf.mxu0 }
 0x113   :  { %v1210_v18 = vpop.f32.mrf.mxu1  ;;  %v1131_v19 = vadd.f32 %v1130_v17, %v1129_v13 }
 0x114   :  { %v1211_v20 = vadd.f32 %v1210_v18, %v1209_v14  ;;  %v1132_v21 = vpop.f32.mrf.mxu0 }
 0x115   :  { %v1212_v23 = vpop.f32.mrf.mxu1 }
 0x116   :  { %v2201_v24 = vadd.f32 %v1211_v20, %v1131_v19  ;;  %v1133_v25 = vpop.f32.mrf.mxu0 }
 0x117   :  { %v1213_v26 = vpop.f32.mrf.mxu1  ;;  %v1134_v27 = vadd.f32 %v1133_v25, %v1132_v21 }
 0x118   :  { %v1214_v28 = vadd.f32 %v1213_v26, %v1212_v23  ;;  %v1135_v30 = vpop.f32.mrf.mxu0 }
 0x119   :  { %v1215_v31 = vpop.f32.mrf.mxu1 }
 0x11a   :  { %v2203_v32 = vadd.f32 %v1214_v28, %v1134_v27  ;;  %v1136_v33 = vpop.f32.mrf.mxu0 }
 0x11b   :  { %v1216_v34 = vpop.f32.mrf.mxu1  ;;  %v1137_v35 = vadd.f32 %v1136_v33, %v1135_v30 }
 0x11c   :  { %v1217_v37 = vadd.f32 %v1216_v34, %v1215_v31  ;;  %v1138_v38 = vpop.f32.mrf.mxu0 }
 0x11d   :  { %v1218_v39 = vpop.f32.mrf.mxu1 }
 0x11e   :  { %v2205_v40 = vadd.f32 %v1217_v37, %v1137_v35  ;;  %v1139_v41 = vpop.f32.mrf.mxu0 }
 0x11f   :  { %v1219_v42 = vpop.f32.mrf.mxu1  ;;  %v1140_v44 = vadd.f32 %v1139_v41, %v1138_v38 }
 0x120   :  { %v1220_v45 = vadd.f32 %v1219_v42, %v1218_v39  ;;  %v2207_v46 = vpop.f32.mrf.mxu0 }
 0x121   :  { %v2209_v47 = vpop.f32.mrf.mxu1 }
 0x122   :  { %v2211_v48 = vadd.f32 %v1220_v45, %v1140_v44  ;;  %v2213_v49 = vpop.f32.mrf.mxu0 }
 0x123   :  { %v2215_v51 = vpop.f32.mrf.mxu1 }
 0x124   :  { %v1256_v52 = vpop.f32.mrf.mxu0 }
 0x125   :  { %v1336_v53 = vpop.f32.mrf.mxu1 }
 0x126   :  { %v1257_v54 = vpop.f32.mrf.mxu0 }
 0x127   :  { %v1337_v55 = vpop.f32.mrf.mxu1  ;;  %v1258_v56 = vadd.f32 %v1257_v54, %v1256_v52 }
 0x128   :  { %v1259_v58 = vpop.f32.mrf.mxu0  ;;  %v1338_v3 = vadd.f32 %v1337_v55, %v1336_v53 }
 0x129   :  { %v1339_v59 = vpop.f32.mrf.mxu1  ;;  %v630_v62 = vadd.f32 %v1258_v56, %v2179_v8 }
 0x12a   :  { %v1260_v60 = vpop.f32.mrf.mxu0 }
 0x12b   :  { %v1340_v61 = vpop.f32.mrf.mxu1  ;;  %v1261_v63 = vadd.f32 %v1260_v60, %v1259_v58  ;;  %v2219_v10 = vadd.f32 %v1338_v3, %v630_v62 }
 0x12c   :  { %v1262_v1 = vpop.f32.mrf.mxu0  ;;  %v1341_v5 = vadd.f32 %v1340_v61, %v1339_v59 }
 0x12d   :  { %v1342_v2 = vpop.f32.mrf.mxu1  ;;  %v635_v4 = vadd.f32 %v1261_v63, %v2181_v15 }
 0x12e   :  { %v1263_v6 = vpop.f32.mrf.mxu0 }
 0x12f   :  { %v1343_v9 = vpop.f32.mrf.mxu1  ;;  %v2221_v11 = vadd.f32 %v1341_v5, %v635_v4  ;;  %v1264_v12 = vadd.f32 %v1263_v6, %v1262_v1 }
 0x130   :  { %v1265_v13 = vpop.f32.mrf.mxu0  ;;  %v1344_v18 = vadd.f32 %v1343_v9, %v1342_v2 }
 0x131   :  { %v1345_v14 = vpop.f32.mrf.mxu1  ;;  %v853_v17 = vadd.f32 %v2221_v11, %v2219_v10  ;;  %v640_v8 = vadd.f32 %v1264_v12, %v2183_v22 }
 0x132   :  { %v1266_v19 = vpop.f32.mrf.mxu0 }
 0x133   :  { %v1346_v20 = vpop.f32.mrf.mxu1  ;;  %v2226_v21 = vadd.f32 %v1344_v18, %v640_v8  ;;  %v1267_v15 = vadd.f32 %v1266_v19, %v1265_v13 }
 0x134   :  { %v1268_v23 = vpop.f32.mrf.mxu0  ;;  %v1347_v28 = vadd.f32 %v1346_v20, %v1345_v14 }
 0x135   :  { %v1348_v25 = vpop.f32.mrf.mxu1  ;;  %v854_v26 = vadd.f32 %v853_v17, %v2226_v21  ;;  %v645_v27 = vadd.f32 %v1267_v15, %v2185_v29 }
 0x136   :  { %v1269_v30 = vpop.f32.mrf.mxu0 }
 0x137   :  { %v1349_v31 = vpop.f32.mrf.mxu1  ;;  %v2230_v33 = vadd.f32 %v1347_v28, %v645_v27  ;;  %v1270_v34 = vadd.f32 %v1269_v30, %v1268_v23 }
 0x138   :  { %v1271_v35 = vpop.f32.mrf.mxu0  ;;  %v1350_v39 = vadd.f32 %v1349_v31, %v1348_v25 }
 0x139   :  { %v1351_v22 = vpop.f32.mrf.mxu1  ;;  %v855_v37 = vadd.f32 %v854_v26, %v2230_v33  ;;  %v650_v38 = vadd.f32 %v1270_v34, %v2187_v36 }
 0x13a   :  { %v1272_v41 = vpop.f32.mrf.mxu0 }
 0x13b   :  { %v1352_v42 = vpop.f32.mrf.mxu1  ;;  %v2234_v44 = vadd.f32 %v1350_v39, %v650_v38  ;;  %v1273_v45 = vadd.f32 %v1272_v41, %v1271_v35 }
 0x13c   :  { %v1274_v52 = vpop.f32.mrf.mxu0  ;;  %v1353_v55 = vadd.f32 %v1352_v42, %v1351_v22 }
 0x13d   :  { %v1354_v29 = vpop.f32.mrf.mxu1  ;;  %v856_v53 = vadd.f32 %v855_v37, %v2234_v44  ;;  %v655_v54 = vadd.f32 %v1273_v45, %v2189_v43 }
 0x13e   :  { %v1275_v56 = vpop.f32.mrf.mxu0 }
 0x13f   :  { %v1355_v58 = vpop.f32.mrf.mxu1  ;;  %v2238_v59 = vadd.f32 %v1353_v55, %v655_v54  ;;  %v1276_v60 = vadd.f32 %v1275_v56, %v1274_v52 }
 0x140   :  { %v1277_v61 = vpop.f32.mrf.mxu0  ;;  %v1356_v1 = vadd.f32 %v1355_v58, %v1354_v29 }
 0x141   :  { %v1357_v36 = vpop.f32.mrf.mxu1  ;;  %v857_v62 = vadd.f32 %v856_v53, %v2238_v59  ;;  %v660_v63 = vadd.f32 %v1276_v60, %v2191_v50 }
 0x142   :  { %v1278_v2 = vpop.f32.mrf.mxu0 }
 0x143   :  { %v1358_v3 = vpop.f32.mrf.mxu1  ;;  %v2242_v4 = vadd.f32 %v1356_v1, %v660_v63  ;;  %v1279_v5 = vadd.f32 %v1278_v2, %v1277_v61 }
 0x144   :  { %v1280_v6 = vpop.f32.mrf.mxu0  ;;  %v1359_v13 = vadd.f32 %v1358_v3, %v1357_v36 }
 0x145   :  { %v1360_v43 = vpop.f32.mrf.mxu1  ;;  %v858_v9 = vadd.f32 %v857_v62, %v2242_v4  ;;  %v665_v12 = vadd.f32 %v1279_v5, %v2193_v57 }
 0x146   :  { %v1281_v14 = vpop.f32.mrf.mxu0 }
 0x147   :  { %v1361_v17 = vpop.f32.mrf.mxu1  ;;  %v2246_v8 = vadd.f32 %v1359_v13, %v665_v12  ;;  %v1282_v18 = vadd.f32 %v1281_v14, %v1280_v6 }
 0x148   :  { %v1283_v19 = vpop.f32.mrf.mxu0  ;;  %v1362_v23 = vadd.f32 %v1361_v17, %v1360_v43 }
 0x149   :  { %v1363_v50 = vpop.f32.mrf.mxu1  ;;  %v859_v20 = vadd.f32 %v858_v9, %v2246_v8  ;;  %v670_v15 = vadd.f32 %v1282_v18, %v2195_v0 }
 0x14a   :  { %v1284_v25 = vpop.f32.mrf.mxu0 }
 0x14b   :  { %v1364_v26 = vpop.f32.mrf.mxu1  ;;  %v2250_v27 = vadd.f32 %v1362_v23, %v670_v15  ;;  %v1285_v28 = vadd.f32 %v1284_v25, %v1283_v19  ;;  %v1143_v15 = vadd.f32 %v2213_v49, %v2207_v46  ;;  %v1223_v23 = vadd.f32 %v2215_v51, %v2209_v47 }
 0x14c   :  { %v1286_v30 = vpop.f32.mrf.mxu0  ;;  %v1365_v35 = vadd.f32 %v1364_v26, %v1363_v50 }
 0x14d   :  { %v1366_v57 = vpop.f32.mrf.mxu1  ;;  %v860_v31 = vadd.f32 %v859_v20, %v2250_v27  ;;  %v675_v34 = vadd.f32 %v1285_v28, %v2197_v7 }
 0x14e   :  { %v1287_v22 = vpop.f32.mrf.mxu0 }
 0x14f   :  { %v1367_v37 = vpop.f32.mrf.mxu1  ;;  %v2254_v38 = vadd.f32 %v1365_v35, %v675_v34  ;;  %v1288_v39 = vadd.f32 %v1287_v22, %v1286_v30 }
 0x150   :  { %v1289_v41 = vpop.f32.mrf.mxu0  ;;  %v1368_v52 = vadd.f32 %v1367_v37, %v1366_v57 }
 0x151   :  { %v1369_v0 = vpop.f32.mrf.mxu1  ;;  %v861_v42 = vadd.f32 %v860_v31, %v2254_v38  ;;  %v680_v45 = vadd.f32 %v1288_v39, %v2199_v16 }
 0x152   :  { %v1290_v29 = vpop.f32.mrf.mxu0 }
 0x153   :  { %v1370_v53 = vpop.f32.mrf.mxu1  ;;  %v2258_v54 = vadd.f32 %v1368_v52, %v680_v45  ;;  %v1291_v55 = vadd.f32 %v1290_v29, %v1289_v41 }
 0x154   :  { %v1292_v56 = vpop.f32.mrf.mxu0  ;;  %v1371_v61 = vadd.f32 %v1370_v53, %v1369_v0 }
 0x155   :  { %v1372_v7 = vpop.f32.mrf.mxu1  ;;  %v862_v58 = vadd.f32 %v861_v42, %v2258_v54  ;;  %v685_v60 = vadd.f32 %v1291_v55, %v2201_v24 }
 0x156   :  { %v1293_v36 = vpop.f32.mrf.mxu0 }
 0x157   :  { %v1373_v62 = vpop.f32.mrf.mxu1  ;;  %v830_v63 = vadd.f32 %v1371_v61, %v685_v60  ;;  %v1294_v1 = vadd.f32 %v1293_v36, %v1292_v56 }
 0x158   :  { %v1295_v2 = vpop.f32.mrf.mxu0  ;;  %v1374_v6 = vadd.f32 %v1373_v62, %v1372_v7 }
 0x159   :  { %v1375_v3 = vpop.f32.mrf.mxu1  ;;  %v863_v16 = vadd.f32 %v862_v58, %v830_v63  ;;  %v690_v5 = vadd.f32 %v1294_v1, %v2203_v32 }
 0x15a   :  { %v1296_v43 = vpop.f32.mrf.mxu0 }
 0x15b   :  { %v1376_v9 = vpop.f32.mrf.mxu1  ;;  %v835_v12 = vadd.f32 %v1374_v6, %v690_v5  ;;  %v1297_v13 = vadd.f32 %v1296_v43, %v1295_v2 }
 0x15c   :  { %v1298_v14 = vpop.f32.mrf.mxu0  ;;  %v1377_v19 = vadd.f32 %v1376_v9, %v1375_v3 }
 0x15d   :  { %v1378_v17 = vpop.f32.mrf.mxu1  ;;  %v864_v18 = vadd.f32 %v863_v16, %v835_v12  ;;  %v695_v24 = vadd.f32 %v1297_v13, %v2205_v40  ;;  %v560_v40 = vadd.f32 %v1223_v23, %v1143_v15 }
 0x15e   :  { %v1299_v50 = vpop.f32.mrf.mxu0 }
 0x15f   :  { %v1379_v20 = vpop.f32.mrf.mxu1  ;;  %v840_v32 = vadd.f32 %v1377_v19, %v695_v24  ;;  %v1300_v25 = vadd.f32 %v1299_v50, %v1298_v14 }
 0x160   :  { %v1301_v26 = vpop.f32.mrf.mxu0  ;;  %v1380_v31 = vadd.f32 %v1379_v20, %v1378_v17 }
 0x161   :  { %v1381_v28 = vpop.f32.mrf.mxu1  ;;  %v865_v30 = vadd.f32 %v864_v18, %v840_v32  ;;  %v700_v57 = vadd.f32 %v1300_v25, %v2211_v48 }
 0x162   :  { %v1302_v34 = vpop.f32.mrf.mxu0 }
 0x163   :  { %v1382_v35 = vpop.f32.mrf.mxu1  ;;  %v845_v22 = vadd.f32 %v1380_v31, %v700_v57  ;;  %v1303_v37 = vadd.f32 %v1302_v34, %v1301_v26 }
 0x164   :  { %v1383_v0 = vadd.f32 %v1382_v35, %v1381_v28 }
 0x165   :  { %v866_v39 = vadd.f32 %v865_v30, %v845_v22  ;;  %v705_v41 = vadd.f32 %v1303_v37, %v560_v40 }
 0x167   :  { %v850_v46 = vadd.f32 %v1383_v0, %v705_v41 }
 0x169   :  { %v867_v49 = vadd.f32 %v866_v39, %v850_v46 }
 0x16b   :  { %v868_v42 = vrot.slane %v867_v49, 4 }
 0x16d   :  { %v869_v47 = vadd.f32 %v868_v42, %v867_v49 }
 0x16f   :  { %v870_v51 = vrot.slane %v869_v47, 2 }
 0x171   :  { %v871_v45 = vadd.f32 %v870_v51, %v869_v47 }
 0x173   :  { %v872_v52 = vrot.slane %v871_v45, 1 }
 0x175   :  { %v873_v29 = vadd.f32 %v872_v52, %v871_v45 }
 0x177   :  { %v875_v53 = vmul.f32 0.0078125, %v873_v29 }
 0x179   :  { %v876_v48 = vsub.f32 %v2219_v10, %v875_v53  ;;  %v877_v55 = vsub.f32 %v2221_v11, %v875_v53  ;;  %v878_v56 = vsub.f32 %v2226_v21, %v875_v53  ;;  %v879_v7 = vsub.f32 %v2230_v33, %v875_v53 }
 0x17a   :  { %v880_v58 = vsub.f32 %v2234_v44, %v875_v53  ;;  %v881_v60 = vsub.f32 %v2238_v59, %v875_v53  ;;  %v882_v61 = vsub.f32 %v2242_v4, %v875_v53  ;;  %v883_v36 = vsub.f32 %v2246_v8, %v875_v53 }
 0x17b   :  { %v884_v62 = vsub.f32 %v2250_v27, %v875_v53  ;;  %v885_v1 = vsub.f32 %v2254_v38, %v875_v53  ;;  %v886_v10 = vsub.f32 %v2258_v54, %v875_v53  ;;  %v887_v2 = vsub.f32 %v830_v63, %v875_v53 }
 0x17c   :  { %v888_v11 = vsub.f32 %v835_v12, %v875_v53  ;;  %v889_v3 = vsub.f32 %v840_v32, %v875_v53  ;;  %v890_v21 = vsub.f32 %v845_v22, %v875_v53  ;;  %v891_v16 = vsub.f32 %v850_v46, %v875_v53 }
 0x17d   :  { %v892_v33 = vmul.f32 %v876_v48, %v876_v48  ;;  %v893_v5 = vmul.f32 %v877_v55, %v877_v55  ;;  %v894_v44 = vmul.f32 %v878_v56, %v878_v56  ;;  %v895_v59 = vmul.f32 %v879_v7, %v879_v7 }
 0x17e   :  { %v896_v4 = vmul.f32 %v880_v58, %v880_v58  ;;  %v897_v8 = vmul.f32 %v881_v60, %v881_v60  ;;  %v898_v27 = vmul.f32 %v882_v61, %v882_v61  ;;  %v899_v38 = vmul.f32 %v883_v36, %v883_v36 }
 0x17f   :  { %v908_v6 = vadd.f32 %v893_v5, %v892_v33  ;;  %v900_v54 = vmul.f32 %v884_v62, %v884_v62  ;;  %v901_v12 = vmul.f32 %v885_v1, %v885_v1  ;;  %v902_v24 = vmul.f32 %v886_v10, %v886_v10  ;;  %v1062_v33 = vld [vmem:[%s2352_s2] ss:$0 sm:$0xff] }
 0x180   :  { %v903_v50 = vmul.f32 %v887_v2, %v887_v2  ;;  %v904_v15 = vmul.f32 %v888_v11, %v888_v11  ;;  %v905_v32 = vmul.f32 %v889_v3, %v889_v3  ;;  %v906_v26 = vmul.f32 %v890_v21, %v890_v21 }
 0x181   :  { %v909_v43 = vadd.f32 %v908_v6, %v894_v44  ;;  %v907_v30 = vmul.f32 %v891_v16, %v891_v16 }
 0x183   :  { %v910_v9 = vadd.f32 %v909_v43, %v895_v59 }
 0x185   :  { %v911_v13 = vadd.f32 %v910_v9, %v896_v4 }
 0x187   :  { %v912_v14 = vadd.f32 %v911_v13, %v897_v8  ;;  %v1063_v13 = vld [vmem:[%s2353_s3] ss:$0 sm:$0xff] }
 0x189   :  { %v913_v17 = vadd.f32 %v912_v14, %v898_v27 }
 0x18b   :  { %v914_v63 = vadd.f32 %v913_v17, %v899_v38 }
 0x18d   :  { %v915_v18 = vadd.f32 %v914_v63, %v900_v54 }
 0x18f   :  { %v916_v19 = vadd.f32 %v915_v18, %v901_v12 }
 0x191   :  { %v917_v20 = vadd.f32 %v916_v19, %v902_v24 }
 0x193   :  { %v918_v23 = vadd.f32 %v917_v20, %v903_v50 }
 0x195   :  { %v919_v25 = vadd.f32 %v918_v23, %v904_v15 }
 0x197   :  { %v920_v28 = vadd.f32 %v919_v25, %v905_v32 }
 0x199   :  { %v921_v57 = vadd.f32 %v920_v28, %v906_v26 }
 0x19b   :  { %v922_v31 = vadd.f32 %v921_v57, %v907_v30 }
 0x19d   :  { %v923_v34 = vrot.slane %v922_v31, 4 }
 0x19f   :  { %v924_v35 = vadd.f32 %v923_v34, %v922_v31 }
 0x1a1   :  { %v925_v40 = vrot.slane %v924_v35, 2 }
 0x1a3   :  { %v926_v22 = vadd.f32 %v925_v40, %v924_v35 }
 0x1a5   :  { %v927_v37 = vrot.slane %v926_v22, 1 }
 0x1a7   :  { %v928_v39 = vadd.f32 %v927_v37, %v926_v22 }
 0x1a9   :  { %v929_v41 = vmul.f32 0.0078125, %v928_v39 }
 0x1ab   :  { %v930_v0 = vadd.f32 1e-05, %v929_v41 }
 0x1ad   :  { %1384 = vrsqrt.f32 %v930_v0 }
 0x1ba   :  { %v1385_v46 = vpop.eup %1384 }
 0x1bb   :  { %v932_v49 = vmul.f32 %v1385_v46, %v876_v48  ;;  %v933_v42 = vmul.f32 %v1385_v46, %v877_v55  ;;  %v934_v47 = vmul.f32 %v1385_v46, %v878_v56  ;;  %v935_v51 = vmul.f32 %v1385_v46, %v879_v7 }
 0x1bc   :  { %v936_v45 = vmul.f32 %v1385_v46, %v880_v58  ;;  %v937_v52 = vmul.f32 %v1385_v46, %v881_v60  ;;  %v938_v29 = vmul.f32 %v1385_v46, %v882_v61  ;;  %v939_v53 = vmul.f32 %v1385_v46, %v883_v36 }
 0x1bd   :  { %v940_v5 = vmul.f32 %v1385_v46, %v884_v62  ;;  %v941_v44 = vmul.f32 %v1385_v46, %v885_v1  ;;  %v942_v6 = vmul.f32 %v1385_v46, %v886_v10  ;;  %v943_v59 = vmul.f32 %v1385_v46, %v887_v2 }
 0x1be   :  { %v944_v43 = vmul.f32 %v1385_v46, %v888_v11  ;;  %v945_v4 = vmul.f32 %v1385_v46, %v889_v3  ;;  %v946_v9 = vmul.f32 %v1385_v46, %v890_v21  ;;  %v947_v8 = vmul.f32 %v1385_v46, %v891_v16 }
 0x1bf   :  { %v955_v48 = vmul.f32 %v1062_v33, %v932_v49  ;;  %v956_v55 = vmul.f32 %v1062_v33, %v933_v42  ;;  %v957_v56 = vmul.f32 %v1062_v33, %v934_v47  ;;  %v958_v7 = vmul.f32 %v1062_v33, %v935_v51 }
 0x1c0   :  { %v959_v58 = vmul.f32 %v1062_v33, %v936_v45  ;;  %v960_v60 = vmul.f32 %v1062_v33, %v937_v52  ;;  %v961_v61 = vmul.f32 %v1062_v33, %v938_v29  ;;  %v962_v36 = vmul.f32 %v1062_v33, %v939_v53 }
 0x1c1   :  { %v963_v62 = vmul.f32 %v1062_v33, %v940_v5  ;;  %v964_v1 = vmul.f32 %v1062_v33, %v941_v44  ;;  %v965_v10 = vmul.f32 %v1062_v33, %v942_v6  ;;  %v966_v2 = vmul.f32 %v1062_v33, %v943_v59 }
 0x1c2   :  { %v967_v11 = vmul.f32 %v1062_v33, %v944_v43  ;;  %v968_v3 = vmul.f32 %v1062_v33, %v945_v4  ;;  %v969_v21 = vmul.f32 %v1062_v33, %v946_v9  ;;  %v970_v16 = vmul.f32 %v1062_v33, %v947_v8 }
 0x1c3   :  { %v978_v27 = vadd.f32 %v1063_v13, %v955_v48  ;;  %v979_v14 = vadd.f32 %v1063_v13, %v956_v55  ;;  %v980_v38 = vadd.f32 %v1063_v13, %v957_v56  ;;  %v981_v17 = vadd.f32 %v1063_v13, %v958_v7 }
 0x1c4   :  { %v982_v54 = vadd.f32 %v1063_v13, %v959_v58  ;;  %v983_v63 = vadd.f32 %v1063_v13, %v960_v60  ;;  %v984_v12 = vadd.f32 %v1063_v13, %v961_v61  ;;  %v985_v18 = vadd.f32 %v1063_v13, %v962_v36 }
 0x1c5   :  { %v986_v24 = vadd.f32 %v1063_v13, %v963_v62  ;;  %v987_v19 = vadd.f32 %v1063_v13, %v964_v1  ;;  %v988_v50 = vadd.f32 %v1063_v13, %v965_v10  ;;  %v989_v20 = vadd.f32 %v1063_v13, %v966_v2 }
 0x1c6   :  { %v990_v15 = vadd.f32 %v1063_v13, %v967_v11  ;;  %v991_v23 = vadd.f32 %v1063_v13, %v968_v3  ;;  %v992_v32 = vadd.f32 %v1063_v13, %v969_v21  ;;  %v993_v25 = vadd.f32 %v1063_v13, %v970_v16 }
 0x1c7   :  { %vm994_vm0 = vcmp.gt.f32.partialorder %v978_v27, 0.0  ;;  %vm995_vm1 = vcmp.gt.f32.partialorder %v979_v14, 0.0  ;;  %vm996_vm2 = vcmp.gt.f32.partialorder %v980_v38, 0.0  ;;  %vm997_vm3 = vcmp.gt.f32.partialorder %v981_v17, 0.0 }
 0x1c8   :  { %vm998_vm4 = vcmp.gt.f32.partialorder %v982_v54, 0.0  ;;  %vm999_vm5 = vcmp.gt.f32.partialorder %v983_v63, 0.0  ;;  %vm1000_vm6 = vcmp.gt.f32.partialorder %v984_v12, 0.0  ;;  %vm1001_vm7 = vcmp.gt.f32.partialorder %v985_v18, 0.0 }
 0x1c9   :  { %vm1002_vm8 = vcmp.gt.f32.partialorder %v986_v24, 0.0  ;;  %vm1003_vm9 = vcmp.gt.f32.partialorder %v987_v19, 0.0  ;;  %vm1004_vm10 = vcmp.gt.f32.partialorder %v988_v50, 0.0  ;;  %vm1005_vm11 = vcmp.gt.f32.partialorder %v989_v20, 0.0 }
 0x1ca   :  { %vm1006_vm12 = vcmp.gt.f32.partialorder %v990_v15, 0.0  ;;  %vm1007_vm13 = vcmp.gt.f32.partialorder %v991_v23, 0.0  ;;  %vm1008_vm14 = vcmp.gt.f32.partialorder %v992_v32, 0.0  ;;  %vm1009_vm15 = vcmp.gt.f32.partialorder %v993_v25, 0.0 }
 0x1cb   :  { %v1010_v26 = vmul.f32 0.2, %v978_v27  ;;  %v1011_v28 = vmul.f32 0.2, %v979_v14  ;;  %v1012_v30 = vmul.f32 0.2, %v980_v38 }
 0x1cc   :  { %v1013_v57 = vmul.f32 0.2, %v981_v17  ;;  %v1014_v31 = vmul.f32 0.2, %v982_v54  ;;  %v1015_v34 = vmul.f32 0.2, %v983_v63 }
 0x1cd   :  { %v1016_v35 = vmul.f32 0.2, %v984_v12  ;;  %v1017_v40 = vmul.f32 0.2, %v985_v18  ;;  %v1018_v22 = vmul.f32 0.2, %v986_v24  ;;  %v1026_v37 = vsel %vm994_vm0, %v978_v27, %v1010_v26 }
 0x1ce   :  { %v1019_v39 = vmul.f32 0.2, %v987_v19  ;;  %v1020_v41 = vmul.f32 0.2, %v988_v50  ;;  %v1021_v0 = vmul.f32 0.2, %v989_v20  ;;  %v1027_v46 = vsel %vm995_vm1, %v979_v14, %v1011_v28  ;;  %1042 = vst [vmem:[%s2354_s4] sm:$0xff] %v1026_v37 }
 0x1cf   :  { %v1022_v49 = vmul.f32 0.2, %v990_v15  ;;  %v1023_v42 = vmul.f32 0.2, %v991_v23  ;;  %v1024_v47 = vmul.f32 0.2, %v992_v32  ;;  %v1028_v51 = vsel %vm996_vm2, %v980_v38, %v1012_v30 }
 0x1d0   :  { %1043 = vst [vmem:[%s2354_s4 + $0x8] sm:$0xff] %v1027_v46  ;;  %v1025_v45 = vmul.f32 0.2, %v993_v25  ;;  %v1029_v52 = vsel %vm997_vm3, %v981_v17, %v1013_v57  ;;  %v1030_v29 = vsel %vm998_vm4, %v982_v54, %v1014_v31  ;;  %v1031_v53 = vsel %vm999_vm5, %v983_v63, %v1015_v34  ;;  %1044 = vst [vmem:[%s2354_s4 + $0x10] sm:$0xff] %v1028_v51 }
 0x1d1   :  { %v1032_v33 = vsel %vm1000_vm6, %v984_v12, %v1016_v35  ;;  %v1033_v5 = vsel %vm1001_vm7, %v985_v18, %v1017_v40  ;;  %v1034_v44 = vsel %vm1002_vm8, %v986_v24, %v1018_v22  ;;  %v1035_v6 = vsel %vm1003_vm9, %v987_v19, %v1019_v39  ;;  %1045 = vst [vmem:[%s2354_s4 + $0x18] sm:$0xff] %v1029_v52 }
 0x1d2   :  { %1046 = vst [vmem:[%s2354_s4 + $0x20] sm:$0xff] %v1030_v29  ;;  %1047 = vst [vmem:[%s2354_s4 + $0x28] sm:$0xff] %v1031_v53  ;;  %v1036_v59 = vsel %vm1004_vm10, %v988_v50, %v1020_v41  ;;  %v1037_v43 = vsel %vm1005_vm11, %v989_v20, %v1021_v0  ;;  %v1038_v4 = vsel %vm1006_vm12, %v990_v15, %v1022_v49 }
 0x1d3   :  { %v1039_v9 = vsel %vm1007_vm13, %v991_v23, %v1023_v42  ;;  %1048 = vst [vmem:[%s2354_s4 + $0x30] sm:$0xff] %v1032_v33  ;;  %1049 = vst [vmem:[%s2354_s4 + $0x38] sm:$0xff] %v1033_v5  ;;  %v1040_v8 = vsel %vm1008_vm14, %v992_v32, %v1024_v47  ;;  %v1041_v48 = vsel %vm1009_vm15, %v993_v25, %v1025_v45 }
 0x1d4   :  { %1050 = vst [vmem:[%s2354_s4 + $0x40] sm:$0xff] %v1034_v44  ;;  %1051 = vst [vmem:[%s2354_s4 + $0x48] sm:$0xff] %v1035_v6 }
 0x1d5   :  { %1052 = vst [vmem:[%s2354_s4 + $0x50] sm:$0xff] %v1036_v59  ;;  %1053 = vst [vmem:[%s2354_s4 + $0x58] sm:$0xff] %v1037_v43 }
 0x1d6   :  { %1054 = vst [vmem:[%s2354_s4 + $0x60] sm:$0xff] %v1038_v4  ;;  %1055 = vst [vmem:[%s2354_s4 + $0x68] sm:$0xff] %v1039_v9 }
 0x1d7   :  { %1056 = vst [vmem:[%s2354_s4 + $0x70] sm:$0xff] %v1040_v8  ;;  %1057 = vst [vmem:[%s2354_s4 + $0x78] sm:$0xff] %v1041_v48 }

// kernel: tile.7
= control target key start
LH: loop header
LB: loop body
LE: loop exit
PB: predicated region body
PF: predicated region fallthrough
CT: control target
= control target key end

     0   :  { %s98_s0 = inlined_call_operand.vmem [shape: f32[2,9,256], index: 0, kind: input, shape index: {}]   ;;  %s99_s1 = inlined_call_operand.vmem [shape: f32[18,256], index: 1, kind: output, shape index: {}]  }
   0x1   :  { %v2_v0 = vld [vmem:[%s98_s0] sm:$0xff]   ;;  %v30_v1 = vld [vmem:[%s98_s0 + $0x8] sm:$0xff]   ;;  %v41_v5 = vld [vmem:[%s98_s0 + $0x38] sm:$0x1]  }
   0x2   :  { %v32_v2 = vld [vmem:[%s98_s0 + $0x10] ss:$8 sm:$0x7]   ;;  %3 = vst [vmem:[%s99_s1] sm:$0xff] %v2_v0   ;;  %31 = vst [vmem:[%s99_s1 + $0x8] sm:$0xff] %v30_v1   ;;  %v35_v3 = vld [vmem:[%s98_s0 + $0x21] sm:$0xff]  }
   0x3   :  { %33 = vst [vmem:[%s99_s1 + $0x10] ss:$8 sm:$0x3] %v32_v2   ;;  %34 = vst [vmem:[%s99_s1 + $0xf] sm:$0x4] %v32_v2   ;;  %v38_v4 = vld [vmem:[%s98_s0 + $0x29] sm:$0xff]  }
   0x4   :  { %36 = vst [vmem:[%s99_s1 + $0x12] sm:$0x3f] %v35_v3   ;;  %37 = vst [vmem:[%s99_s1 + $0x4a] ss:$-7 sm:$0xc0] %v35_v3  }
   0x5   :  { %39 = vst [vmem:[%s99_s1 + $0x1a] sm:$0x3f] %v38_v4   ;;  %40 = vst [vmem:[%s99_s1 + $0x52] ss:$-7 sm:$0xc0] %v38_v4  }
   0x6   :  { %42 = vst [vmem:[%s99_s1 + $0x29] sm:$0x1] %v41_v5  }

// kernel: discriminator_forward.5
= control target key start
LH: loop header
LB: loop body
LE: loop exit
PB: predicated region body
PF: predicated region fallthrough
CT: control target
= control target key end

     0   :  { %vm754_vm0 = vcmask 1041408   ;;  %vm884_vm7 = vcmask 146432   ;;  %vm976_vm8 = vcmask 1024   ;;  %s2014_s1 = inlined_call_operand.vmem [shape: f32[1152,256], index: 1, kind: input, shape index: {}]   ;;  %s2015_s0 = inlined_call_operand.vmem [shape: f32[18,1152], index: 0, kind: input, shape index: {}]   ;;  %s2016_s2 = inlined_call_operand.vmem [shape: f32[1,256], index: 2, kind: input, shape index: {}]   ;;  %s2017_s3 = inlined_call_operand.vmem [shape: f32[1,256], index: 3, kind: input, shape index: {}]   ;;  %s2018_s4 = inlined_call_operand.vmem [shape: f32[18,256], index: 4, kind: input, shape index: {}]   ;;  %s2019_s5 = inlined_call_operand.vmem [shape: f32[2,18], index: 5, kind: input, shape index: {}]   ;;  %s2020_s6 = inlined_call_operand.vmem [shape: f32[2,1], index: 6, kind: output, shape index: {}]  }
   0x1   :  { %v81_v0 = vld [vmem:[%s2014_s1 + $0xf8] sm:$0xff]  ;;  %v80_v2 = vld [vmem:[%s2014_s1 + $0xf0] sm:$0xff]  ;;  %v79_v4 = vld [vmem:[%s2014_s1 + $0xe8] sm:$0xff] }
   0x2   :  { %v145_v1 = vld [vmem:[%s2014_s1 + $0x2f8] sm:$0xff]  ;;  %338 = vmatprep.subr.mxu0 %v81_v0  ;;  %v144_v3 = vld [vmem:[%s2014_s1 + $0x2f0] sm:$0xff]  ;;  %v143_v5 = vld [vmem:[%s2014_s1 + $0x2e8] sm:$0xff] }
   0x3   :  { %421 = vmatprep.subr.mxu1 %v145_v1  ;;  %339 = vmatpush1.msra.mxu0 %v80_v2  ;;  %v78_v6 = vld [vmem:[%s2014_s1 + $0xe0] sm:$0xff]  ;;  %v77_v8 = vld [vmem:[%s2014_s1 + $0xd8] sm:$0xff]  ;;  %v76_v10 = vld [vmem:[%s2014_s1 + $0xd0] sm:$0xff] }
   0x4   :  { %422 = vmatpush1.msra.mxu1 %v144_v3  ;;  %v142_v7 = vld [vmem:[%s2014_s1 + $0x2e0] sm:$0xff]  ;;  %340 = vmatprep.subr.mxu0 %v79_v4  ;;  %v141_v9 = vld [vmem:[%s2014_s1 + $0x2d8] sm:$0xff]  ;;  %v140_v11 = vld [vmem:[%s2014_s1 + $0x2d0] sm:$0xff] }
   0x5   :  { %423 = vmatprep.subr.mxu1 %v143_v5  ;;  %341 = vmatpush1.msra.mxu0 %v78_v6  ;;  %v75_v12 = vld [vmem:[%s2014_s1 + $0xc8] sm:$0xff]  ;;  %v74_v14 = vld [vmem:[%s2014_s1 + $0xc0] sm:$0xff]  ;;  %v73_v16 = vld [vmem:[%s2014_s1 + $0xb8] sm:$0xff] }
   0x6   :  { %424 = vmatpush1.msra.mxu1 %v142_v7  ;;  %v139_v13 = vld [vmem:[%s2014_s1 + $0x2c8] sm:$0xff]  ;;  %342 = vmatprep.subr.mxu0 %v77_v8  ;;  %v138_v15 = vld [vmem:[%s2014_s1 + $0x2c0] sm:$0xff]  ;;  %v137_v17 = vld [vmem:[%s2014_s1 + $0x2b8] sm:$0xff] }
   0x7   :  { %425 = vmatprep.subr.mxu1 %v141_v9  ;;  %343 = vmatpush1.msra.mxu0 %v76_v10  ;;  %v72_v18 = vld [vmem:[%s2014_s1 + $0xb0] sm:$0xff]  ;;  %v71_v20 = vld [vmem:[%s2014_s1 + $0xa8] sm:$0xff]  ;;  %v70_v22 = vld [vmem:[%s2014_s1 + $0xa0] sm:$0xff] }
   0x8   :  { %426 = vmatpush1.msra.mxu1 %v140_v11  ;;  %344 = vmatprep.subr.mxu0 %v75_v12  ;;  %v136_v19 = vld [vmem:[%s2014_s1 + $0x2b0] sm:$0xff]  ;;  %v135_v21 = vld [vmem:[%s2014_s1 + $0x2a8] sm:$0xff]  ;;  %v134_v23 = vld [vmem:[%s2014_s1 + $0x2a0] sm:$0xff] }
   0x9   :  { %427 = vmatprep.subr.mxu1 %v139_v13  ;;  %345 = vmatpush1.msra.mxu0 %v74_v14  ;;  %v69_v24 = vld [vmem:[%s2014_s1 + $0x98] sm:$0xff]  ;;  %v68_v26 = vld [vmem:[%s2014_s1 + $0x90] sm:$0xff]  ;;  %v67_v28 = vld [vmem:[%s2014_s1 + $0x88] sm:$0xff] }
   0xa   :  { %428 = vmatpush1.msra.mxu1 %v138_v15  ;;  %346 = vmatprep.subr.mxu0 %v73_v16  ;;  %v133_v25 = vld [vmem:[%s2014_s1 + $0x298] sm:$0xff]  ;;  %v132_v27 = vld [vmem:[%s2014_s1 + $0x290] sm:$0xff]  ;;  %v131_v29 = vld [vmem:[%s2014_s1 + $0x288] sm:$0xff] }
   0xb   :  { %429 = vmatprep.subr.mxu1 %v137_v17  ;;  %347 = vmatpush1.msra.mxu0 %v72_v18  ;;  %v66_v30 = vld [vmem:[%s2014_s1 + $0x80] sm:$0xff]  ;;  %v65_v32 = vld [vmem:[%s2014_s1 + $0x78] sm:$0xff]  ;;  %v64_v34 = vld [vmem:[%s2014_s1 + $0x70] sm:$0xff] }
   0xc   :  { %430 = vmatpush1.msra.mxu1 %v136_v19  ;;  %348 = vmatprep.subr.mxu0 %v71_v20  ;;  %v130_v31 = vld [vmem:[%s2014_s1 + $0x280] sm:$0xff]  ;;  %v129_v33 = vld [vmem:[%s2014_s1 + $0x278] sm:$0xff]  ;;  %v128_v35 = vld [vmem:[%s2014_s1 + $0x270] sm:$0xff] }
   0xd   :  { %431 = vmatprep.subr.mxu1 %v135_v21  ;;  %349 = vmatpush1.msra.mxu0 %v70_v22  ;;  %v63_v36 = vld [vmem:[%s2014_s1 + $0x68] sm:$0xff]  ;;  %v62_v38 = vld [vmem:[%s2014_s1 + $0x60] sm:$0xff]  ;;  %v61_v40 = vld [vmem:[%s2014_s1 + $0x58] sm:$0xff] }
   0xe   :  { %432 = vmatpush1.msra.mxu1 %v134_v23  ;;  %350 = vmatprep.subr.mxu0 %v69_v24  ;;  %v127_v37 = vld [vmem:[%s2014_s1 + $0x268] sm:$0xff]  ;;  %v126_v39 = vld [vmem:[%s2014_s1 + $0x260] sm:$0xff]  ;;  %v125_v41 = vld [vmem:[%s2014_s1 + $0x258] sm:$0xff] }
   0xf   :  { %433 = vmatprep.subr.mxu1 %v133_v25  ;;  %351 = vmatpush1.msra.mxu0 %v68_v26  ;;  %v60_v42 = vld [vmem:[%s2014_s1 + $0x50] sm:$0xff]  ;;  %v59_v44 = vld [vmem:[%s2014_s1 + $0x48] sm:$0xff]  ;;  %v58_v46 = vld [vmem:[%s2014_s1 + $0x40] sm:$0xff] }
  0x10   :  { %434 = vmatpush1.msra.mxu1 %v132_v27  ;;  %352 = vmatprep.subr.mxu0 %v67_v28  ;;  %v124_v43 = vld [vmem:[%s2014_s1 + $0x250] sm:$0xff]  ;;  %v123_v45 = vld [vmem:[%s2014_s1 + $0x248] sm:$0xff]  ;;  %v122_v47 = vld [vmem:[%s2014_s1 + $0x240] sm:$0xff] }
  0x11   :  { %435 = vmatprep.subr.mxu1 %v131_v29  ;;  %353 = vmatpush1.msra.mxu0 %v66_v30  ;;  %v57_v48 = vld [vmem:[%s2014_s1 + $0x38] sm:$0xff]  ;;  %v56_v50 = vld [vmem:[%s2014_s1 + $0x30] sm:$0xff]  ;;  %v55_v52 = vld [vmem:[%s2014_s1 + $0x28] sm:$0xff] }
  0x12   :  { %436 = vmatpush1.msra.mxu1 %v130_v31  ;;  %354 = vmatprep.subr.mxu0 %v65_v32  ;;  %v121_v49 = vld [vmem:[%s2014_s1 + $0x238] sm:$0xff]  ;;  %v120_v51 = vld [vmem:[%s2014_s1 + $0x230] sm:$0xff]  ;;  %v119_v53 = vld [vmem:[%s2014_s1 + $0x228] sm:$0xff] }
  0x13   :  { %437 = vmatprep.subr.mxu1 %v129_v33  ;;  %355 = vmatpush1.msra.mxu0 %v64_v34  ;;  %v54_v54 = vld [vmem:[%s2014_s1 + $0x20] sm:$0xff]  ;;  %v53_v56 = vld [vmem:[%s2014_s1 + $0x18] sm:$0xff]  ;;  %v52_v58 = vld [vmem:[%s2014_s1 + $0x10] sm:$0xff] }
  0x14   :  { %438 = vmatpush1.msra.mxu1 %v128_v35  ;;  %356 = vmatprep.subr.mxu0 %v63_v36  ;;  %v118_v55 = vld [vmem:[%s2014_s1 + $0x220] sm:$0xff]  ;;  %v117_v57 = vld [vmem:[%s2014_s1 + $0x218] sm:$0xff]  ;;  %v116_v59 = vld [vmem:[%s2014_s1 + $0x210] sm:$0xff] }
  0x15   :  { %439 = vmatprep.subr.mxu1 %v127_v37  ;;  %357 = vmatpush1.msra.mxu0 %v62_v38  ;;  %v51_v60 = vld [vmem:[%s2014_s1 + $0x8] sm:$0xff]  ;;  %v50_v62 = vld [vmem:[%s2014_s1] sm:$0xff]  ;;  %v113_v0 = vld [vmem:[%s2014_s1 + $0x1f8] sm:$0xff] }
  0x16   :  { %440 = vmatpush1.msra.mxu1 %v126_v39  ;;  %358 = vmatprep.subr.mxu0 %v61_v40  ;;  %v115_v61 = vld [vmem:[%s2014_s1 + $0x208] sm:$0xff]  ;;  %v114_v63 = vld [vmem:[%s2014_s1 + $0x200] sm:$0xff]  ;;  %v177_v1 = vld [vmem:[%s2014_s1 + $0x3f8] sm:$0xff] }
  0x17   :  { %441 = vmatprep.subr.mxu1 %v125_v41  ;;  %359 = vmatpush1.msra.mxu0 %v60_v42  ;;  %v112_v2 = vld [vmem:[%s2014_s1 + $0x1f0] sm:$0xff]  ;;  %v111_v4 = vld [vmem:[%s2014_s1 + $0x1e8] sm:$0xff]  ;;  %v110_v6 = vld [vmem:[%s2014_s1 + $0x1e0] sm:$0xff] }
  0x18   :  { %442 = vmatpush1.msra.mxu1 %v124_v43  ;;  %360 = vmatprep.subr.mxu0 %v59_v44  ;;  %v176_v3 = vld [vmem:[%s2014_s1 + $0x3f0] sm:$0xff]  ;;  %v175_v5 = vld [vmem:[%s2014_s1 + $0x3e8] sm:$0xff]  ;;  %v174_v7 = vld [vmem:[%s2014_s1 + $0x3e0] sm:$0xff] }
  0x19   :  { %443 = vmatprep.subr.mxu1 %v123_v45  ;;  %361 = vmatpush1.msra.mxu0 %v58_v46  ;;  %v109_v8 = vld [vmem:[%s2014_s1 + $0x1d8] sm:$0xff]  ;;  %v108_v10 = vld [vmem:[%s2014_s1 + $0x1d0] sm:$0xff]  ;;  %v107_v12 = vld [vmem:[%s2014_s1 + $0x1c8] sm:$0xff] }
  0x1a   :  { %444 = vmatpush1.msra.mxu1 %v122_v47  ;;  %362 = vmatprep.subr.mxu0 %v57_v48  ;;  %v173_v9 = vld [vmem:[%s2014_s1 + $0x3d8] sm:$0xff]  ;;  %v172_v11 = vld [vmem:[%s2014_s1 + $0x3d0] sm:$0xff]  ;;  %v171_v13 = vld [vmem:[%s2014_s1 + $0x3c8] sm:$0xff] }
  0x1b   :  { %445 = vmatprep.subr.mxu1 %v121_v49  ;;  %363 = vmatpush1.msra.mxu0 %v56_v50  ;;  %v106_v14 = vld [vmem:[%s2014_s1 + $0x1c0] sm:$0xff]  ;;  %v105_v16 = vld [vmem:[%s2014_s1 + $0x1b8] sm:$0xff]  ;;  %v104_v18 = vld [vmem:[%s2014_s1 + $0x1b0] sm:$0xff] }
  0x1c   :  { %446 = vmatpush1.msra.mxu1 %v120_v51  ;;  %364 = vmatprep.subr.mxu0 %v55_v52  ;;  %v170_v15 = vld [vmem:[%s2014_s1 + $0x3c0] sm:$0xff]  ;;  %v169_v17 = vld [vmem:[%s2014_s1 + $0x3b8] sm:$0xff]  ;;  %v168_v19 = vld [vmem:[%s2014_s1 + $0x3b0] sm:$0xff] }
  0x1d   :  { %447 = vmatprep.subr.mxu1 %v119_v53  ;;  %365 = vmatpush1.msra.mxu0 %v54_v54  ;;  %v103_v20 = vld [vmem:[%s2014_s1 + $0x1a8] sm:$0xff]  ;;  %v102_v22 = vld [vmem:[%s2014_s1 + $0x1a0] sm:$0xff]  ;;  %v101_v24 = vld [vmem:[%s2014_s1 + $0x198] sm:$0xff] }
  0x1e   :  { %448 = vmatpush1.msra.mxu1 %v118_v55  ;;  %366 = vmatprep.subr.mxu0 %v53_v56  ;;  %v167_v21 = vld [vmem:[%s2014_s1 + $0x3a8] sm:$0xff]  ;;  %v166_v23 = vld [vmem:[%s2014_s1 + $0x3a0] sm:$0xff]  ;;  %v165_v25 = vld [vmem:[%s2014_s1 + $0x398] sm:$0xff] }
  0x1f   :  { %449 = vmatprep.subr.mxu1 %v117_v57  ;;  %367 = vmatpush1.msra.mxu0 %v52_v58  ;;  %v100_v26 = vld [vmem:[%s2014_s1 + $0x190] sm:$0xff]  ;;  %v99_v28 = vld [vmem:[%s2014_s1 + $0x188] sm:$0xff]  ;;  %v98_v30 = vld [vmem:[%s2014_s1 + $0x180] sm:$0xff] }
  0x20   :  { %450 = vmatpush1.msra.mxu1 %v116_v59  ;;  %368 = vmatprep.subr.mxu0 %v51_v60  ;;  %v164_v27 = vld [vmem:[%s2014_s1 + $0x390] sm:$0xff]  ;;  %v163_v29 = vld [vmem:[%s2014_s1 + $0x388] sm:$0xff]  ;;  %v162_v31 = vld [vmem:[%s2014_s1 + $0x380] sm:$0xff] }
  0x21   :  { %451 = vmatprep.subr.mxu1 %v115_v61  ;;  %369 = vmatpush1.msra.mxu0 %v50_v62  ;;  %v97_v32 = vld [vmem:[%s2014_s1 + $0x178] sm:$0xff]  ;;  %v96_v34 = vld [vmem:[%s2014_s1 + $0x170] sm:$0xff]  ;;  %v95_v36 = vld [vmem:[%s2014_s1 + $0x168] sm:$0xff] }
  0x22   :  { %452 = vmatpush1.msra.mxu1 %v114_v63  ;;  %370 = vmatprep.subr.mxu0 %v113_v0  ;;  %v161_v33 = vld [vmem:[%s2014_s1 + $0x378] sm:$0xff]  ;;  %v160_v35 = vld [vmem:[%s2014_s1 + $0x370] sm:$0xff]  ;;  %v159_v37 = vld [vmem:[%s2014_s1 + $0x368] sm:$0xff] }
  0x23   :  { %453 = vmatprep.subr.mxu1 %v177_v1  ;;  %371 = vmatpush2.msra.mxu0 %v112_v2  ;;  %v94_v38 = vld [vmem:[%s2014_s1 + $0x160] sm:$0xff]  ;;  %v93_v40 = vld [vmem:[%s2014_s1 + $0x158] sm:$0xff]  ;;  %v92_v42 = vld [vmem:[%s2014_s1 + $0x150] sm:$0xff] }
  0x24   :  { %454 = vmatpush2.msra.mxu1 %v176_v3  ;;  %372 = vmatprep.subr.mxu0 %v111_v4  ;;  %v158_v39 = vld [vmem:[%s2014_s1 + $0x360] sm:$0xff]  ;;  %v157_v41 = vld [vmem:[%s2014_s1 + $0x358] sm:$0xff]  ;;  %v156_v43 = vld [vmem:[%s2014_s1 + $0x350] sm:$0xff] }
  0x25   :  { %455 = vmatprep.subr.mxu1 %v175_v5  ;;  %373 = vmatpush2.msra.mxu0 %v110_v6  ;;  %v91_v44 = vld [vmem:[%s2014_s1 + $0x148] sm:$0xff]  ;;  %v90_v46 = vld [vmem:[%s2014_s1 + $0x140] sm:$0xff]  ;;  %v89_v48 = vld [vmem:[%s2014_s1 + $0x138] sm:$0xff] }
  0x26   :  { %456 = vmatpush2.msra.mxu1 %v174_v7  ;;  %374 = vmatprep.subr.mxu0 %v109_v8  ;;  %v155_v45 = vld [vmem:[%s2014_s1 + $0x348] sm:$0xff]  ;;  %v154_v47 = vld [vmem:[%s2014_s1 + $0x340] sm:$0xff]  ;;  %v153_v49 = vld [vmem:[%s2014_s1 + $0x338] sm:$0xff] }
  0x27   :  { %457 = vmatprep.subr.mxu1 %v173_v9  ;;  %375 = vmatpush2.msra.mxu0 %v108_v10  ;;  %v88_v50 = vld [vmem:[%s2014_s1 + $0x130] sm:$0xff]  ;;  %v87_v52 = vld [vmem:[%s2014_s1 + $0x128] sm:$0xff]  ;;  %v86_v54 = vld [vmem:[%s2014_s1 + $0x120] sm:$0xff] }
  0x28   :  { %458 = vmatpush2.msra.mxu1 %v172_v11  ;;  %376 = vmatprep.subr.mxu0 %v107_v12  ;;  %v152_v51 = vld [vmem:[%s2014_s1 + $0x330] sm:$0xff]  ;;  %v151_v53 = vld [vmem:[%s2014_s1 + $0x328] sm:$0xff]  ;;  %v150_v55 = vld [vmem:[%s2014_s1 + $0x320] sm:$0xff] }
  0x29   :  { %459 = vmatprep.subr.mxu1 %v171_v13  ;;  %377 = vmatpush2.msra.mxu0 %v106_v14  ;;  %v85_v56 = vld [vmem:[%s2014_s1 + $0x118] sm:$0xff]  ;;  %v84_v58 = vld [vmem:[%s2014_s1 + $0x110] sm:$0xff]  ;;  %v83_v60 = vld [vmem:[%s2014_s1 + $0x108] sm:$0xff] }
  0x2a   :  { %460 = vmatpush2.msra.mxu1 %v170_v15  ;;  %378 = vmatprep.subr.mxu0 %v105_v16  ;;  %v149_v57 = vld [vmem:[%s2014_s1 + $0x318] sm:$0xff]  ;;  %v148_v59 = vld [vmem:[%s2014_s1 + $0x310] sm:$0xff]  ;;  %v147_v61 = vld [vmem:[%s2014_s1 + $0x308] sm:$0xff] }
  0x2b   :  { %461 = vmatprep.subr.mxu1 %v169_v17  ;;  %379 = vmatpush2.msra.mxu0 %v104_v18  ;;  %v82_v62 = vld [vmem:[%s2014_s1 + $0x100] sm:$0xff]  ;;  %v24_v63 = vld [vmem:[%s2015_s0 + $0x8] sm:$0xff]  ;;  %v26_v1 = vld [vmem:[%s2015_s0 + $0x18] sm:$0xff] }
  0x2c   :  { %462 = vmatpush2.msra.mxu1 %v168_v19  ;;  %380 = vmatprep.subr.mxu0 %v103_v20  ;;  %v146_v0 = vld [vmem:[%s2014_s1 + $0x300] sm:$0xff]  ;;  %v25_v3 = vld [vmem:[%s2015_s0 + $0x10] sm:$0xff]  ;;  %v209_v4 = vld [vmem:[%s2014_s1 + $0x4f8] sm:$0xff] }
  0x2d   :  { %463 = vmatprep.subr.mxu1 %v167_v21  ;;  %381 = vmatpush2.msra.mxu0 %v102_v22  ;;  %v23_v2 = vld [vmem:[%s2015_s0] sm:$0xff]  ;;  %v273_v5 = vld [vmem:[%s2014_s1 + $0x6f8] sm:$0xff]  ;;  %v208_v6 = vld [vmem:[%s2014_s1 + $0x4f0] sm:$0xff] }
  0x2e   :  { %464 = vmatpush2.msra.mxu1 %v166_v23  ;;  %382 = vmatprep.subr.mxu0 %v101_v24  ;;  %v272_v7 = vld [vmem:[%s2014_s1 + $0x6f0] sm:$0xff]  ;;  %v207_v8 = vld [vmem:[%s2014_s1 + $0x4e8] sm:$0xff]  ;;  %v206_v10 = vld [vmem:[%s2014_s1 + $0x4e0] sm:$0xff] }
  0x2f   :  { %465 = vmatprep.subr.mxu1 %v165_v25  ;;  %383 = vmatpush2.msra.mxu0 %v100_v26  ;;  %v271_v9 = vld [vmem:[%s2014_s1 + $0x6e8] sm:$0xff]  ;;  %v270_v11 = vld [vmem:[%s2014_s1 + $0x6e0] sm:$0xff]  ;;  %v205_v12 = vld [vmem:[%s2014_s1 + $0x4d8] sm:$0xff] }
  0x30   :  { %466 = vmatpush2.msra.mxu1 %v164_v27  ;;  %384 = vmatprep.subr.mxu0 %v99_v28  ;;  %v269_v13 = vld [vmem:[%s2014_s1 + $0x6d8] sm:$0xff]  ;;  %v204_v14 = vld [vmem:[%s2014_s1 + $0x4d0] sm:$0xff]  ;;  %v203_v16 = vld [vmem:[%s2014_s1 + $0x4c8] sm:$0xff] }
  0x31   :  { %467 = vmatprep.subr.mxu1 %v163_v29  ;;  %385 = vmatpush2.msra.mxu0 %v98_v30  ;;  %v268_v15 = vld [vmem:[%s2014_s1 + $0x6d0] sm:$0xff]  ;;  %v267_v17 = vld [vmem:[%s2014_s1 + $0x6c8] sm:$0xff]  ;;  %v202_v18 = vld [vmem:[%s2014_s1 + $0x4c0] sm:$0xff] }
  0x32   :  { %468 = vmatpush2.msra.mxu1 %v162_v31  ;;  %386 = vmatprep.subr.mxu0 %v97_v32  ;;  %v266_v19 = vld [vmem:[%s2014_s1 + $0x6c0] sm:$0xff]  ;;  %v201_v20 = vld [vmem:[%s2014_s1 + $0x4b8] sm:$0xff]  ;;  %v200_v22 = vld [vmem:[%s2014_s1 + $0x4b0] sm:$0xff] }
  0x33   :  { %469 = vmatprep.subr.mxu1 %v161_v33  ;;  %387 = vmatpush2.msra.mxu0 %v96_v34  ;;  %v265_v21 = vld [vmem:[%s2014_s1 + $0x6b8] sm:$0xff]  ;;  %v264_v23 = vld [vmem:[%s2014_s1 + $0x6b0] sm:$0xff]  ;;  %v199_v24 = vld [vmem:[%s2014_s1 + $0x4a8] sm:$0xff] }
  0x34   :  { %470 = vmatpush2.msra.mxu1 %v160_v35  ;;  %388 = vmatprep.subr.mxu0 %v95_v36  ;;  %v263_v25 = vld [vmem:[%s2014_s1 + $0x6a8] sm:$0xff]  ;;  %v198_v26 = vld [vmem:[%s2014_s1 + $0x4a0] sm:$0xff]  ;;  %v197_v28 = vld [vmem:[%s2014_s1 + $0x498] sm:$0xff] }
  0x35   :  { %471 = vmatprep.subr.mxu1 %v159_v37  ;;  %389 = vmatpush2.msra.mxu0 %v94_v38  ;;  %v262_v27 = vld [vmem:[%s2014_s1 + $0x6a0] sm:$0xff]  ;;  %v261_v29 = vld [vmem:[%s2014_s1 + $0x698] sm:$0xff]  ;;  %v196_v30 = vld [vmem:[%s2014_s1 + $0x490] sm:$0xff] }
  0x36   :  { %472 = vmatpush2.msra.mxu1 %v158_v39  ;;  %390 = vmatprep.subr.mxu0 %v93_v40  ;;  %v260_v31 = vld [vmem:[%s2014_s1 + $0x690] sm:$0xff]  ;;  %v195_v32 = vld [vmem:[%s2014_s1 + $0x488] sm:$0xff]  ;;  %v194_v34 = vld [vmem:[%s2014_s1 + $0x480] sm:$0xff] }
  0x37   :  { %473 = vmatprep.subr.mxu1 %v157_v41  ;;  %391 = vmatpush2.msra.mxu0 %v92_v42  ;;  %v259_v33 = vld [vmem:[%s2014_s1 + $0x688] sm:$0xff]  ;;  %v258_v35 = vld [vmem:[%s2014_s1 + $0x680] sm:$0xff]  ;;  %v193_v36 = vld [vmem:[%s2014_s1 + $0x478] sm:$0xff] }
  0x38   :  { %474 = vmatpush2.msra.mxu1 %v156_v43  ;;  %392 = vmatprep.subr.mxu0 %v91_v44  ;;  %v257_v37 = vld [vmem:[%s2014_s1 + $0x678] sm:$0xff]  ;;  %v192_v38 = vld [vmem:[%s2014_s1 + $0x470] sm:$0xff]  ;;  %v191_v40 = vld [vmem:[%s2014_s1 + $0x468] sm:$0xff] }
  0x39   :  { %475 = vmatprep.subr.mxu1 %v155_v45  ;;  %393 = vmatpush2.msra.mxu0 %v90_v46  ;;  %v256_v39 = vld [vmem:[%s2014_s1 + $0x670] sm:$0xff]  ;;  %v255_v41 = vld [vmem:[%s2014_s1 + $0x668] sm:$0xff]  ;;  %v190_v42 = vld [vmem:[%s2014_s1 + $0x460] sm:$0xff] }
  0x3a   :  { %476 = vmatpush2.msra.mxu1 %v154_v47  ;;  %394 = vmatprep.subr.mxu0 %v89_v48  ;;  %v254_v43 = vld [vmem:[%s2014_s1 + $0x660] sm:$0xff]  ;;  %v189_v44 = vld [vmem:[%s2014_s1 + $0x458] sm:$0xff]  ;;  %v188_v46 = vld [vmem:[%s2014_s1 + $0x450] sm:$0xff] }
  0x3b   :  { %477 = vmatprep.subr.mxu1 %v153_v49  ;;  %395 = vmatpush2.msra.mxu0 %v88_v50  ;;  %v253_v45 = vld [vmem:[%s2014_s1 + $0x658] sm:$0xff]  ;;  %v252_v47 = vld [vmem:[%s2014_s1 + $0x650] sm:$0xff]  ;;  %v187_v48 = vld [vmem:[%s2014_s1 + $0x448] sm:$0xff] }
  0x3c   :  { %478 = vmatpush2.msra.mxu1 %v152_v51  ;;  %396 = vmatprep.subr.mxu0 %v87_v52  ;;  %v251_v49 = vld [vmem:[%s2014_s1 + $0x648] sm:$0xff]  ;;  %v186_v50 = vld [vmem:[%s2014_s1 + $0x440] sm:$0xff]  ;;  %v185_v52 = vld [vmem:[%s2014_s1 + $0x438] sm:$0xff] }
  0x3d   :  { %479 = vmatprep.subr.mxu1 %v151_v53  ;;  %397 = vmatpush2.msra.mxu0 %v86_v54  ;;  %v250_v51 = vld [vmem:[%s2014_s1 + $0x640] sm:$0xff]  ;;  %v249_v53 = vld [vmem:[%s2014_s1 + $0x638] sm:$0xff]  ;;  %v184_v54 = vld [vmem:[%s2014_s1 + $0x430] sm:$0xff] }
  0x3e   :  { %480 = vmatpush2.msra.mxu1 %v150_v55  ;;  %398 = vmatprep.subr.mxu0 %v85_v56  ;;  %v248_v55 = vld [vmem:[%s2014_s1 + $0x630] sm:$0xff]  ;;  %v183_v56 = vld [vmem:[%s2014_s1 + $0x428] sm:$0xff] }
  0x3f   :  { %481 = vmatprep.subr.mxu1 %v149_v57  ;;  %399 = vmatpush2.msra.mxu0 %v84_v58  ;;  %v247_v57 = vld [vmem:[%s2014_s1 + $0x628] sm:$0xff]  ;;  %v182_v58 = vld [vmem:[%s2014_s1 + $0x420] sm:$0xff] }
  0x40   :  { %482 = vmatpush2.msra.mxu1 %v148_v59  ;;  %400 = vmatprep.subr.mxu0 %v83_v60  ;;  %v246_v59 = vld [vmem:[%s2014_s1 + $0x620] sm:$0xff]  ;;  %v181_v60 = vld [vmem:[%s2014_s1 + $0x418] sm:$0xff] }
  0x41   :  { %483 = vmatprep.subr.mxu1 %v147_v61  ;;  %401 = vmatpush2.msra.mxu0 %v82_v62  ;;  %v245_v61 = vld [vmem:[%s2014_s1 + $0x618] sm:$0xff]  ;;  %v180_v62 = vld [vmem:[%s2014_s1 + $0x410] sm:$0xff] }
  0x42   :  { %402 = vmatprep.mubr.f32.mxu0 %v24_v63  ;;  %484 = vmatpush2.msra.mxu1 %v146_v0  ;;  %v244_v63 = vld [vmem:[%s2014_s1 + $0x610] sm:$0xff]  ;;  %v179_v0 = vld [vmem:[%s2014_s1 + $0x408] sm:$0xff] }
  0x43   :  { %485 = vmatprep.mubr.f32.mxu1 %v26_v1  ;;  %403 = vmatmul.mubr.f32.vlgmr.msra.gmra.mxu0 %v23_v2  ;;  %v243_v1 = vld [vmem:[%s2014_s1 + $0x608] sm:$0xff]  ;;  %v178_v2 = vld [vmem:[%s2014_s1 + $0x400] sm:$0xff] }
  0x44   :  { %486 = vmatmul.mubr.f32.vlgmr.msra.gmra.mxu1 %v25_v3  ;;  %504 = vmatprep.subr.mxu0 %v209_v4  ;;  %v242_v3 = vld [vmem:[%s2014_s1 + $0x600] sm:$0xff]  ;;  %v241_v4 = vld [vmem:[%s2014_s1 + $0x5f8] sm:$0xff] }
  0x45   :  { %587 = vmatprep.subr.mxu1 %v273_v5  ;;  %505 = vmatpush1.msra.mxu0 %v208_v6  ;;  %v305_v5 = vld [vmem:[%s2014_s1 + $0x7f8] sm:$0xff]  ;;  %v240_v6 = vld [vmem:[%s2014_s1 + $0x5f0] sm:$0xff] }
  0x46   :  { %588 = vmatpush1.msra.mxu1 %v272_v7  ;;  %506 = vmatprep.subr.mxu0 %v207_v8  ;;  %v304_v7 = vld [vmem:[%s2014_s1 + $0x7f0] sm:$0xff]  ;;  %v239_v8 = vld [vmem:[%s2014_s1 + $0x5e8] sm:$0xff] }
  0x47   :  { %589 = vmatprep.subr.mxu1 %v271_v9  ;;  %507 = vmatpush1.msra.mxu0 %v206_v10  ;;  %v303_v9 = vld [vmem:[%s2014_s1 + $0x7e8] sm:$0xff]  ;;  %v238_v10 = vld [vmem:[%s2014_s1 + $0x5e0] sm:$0xff] }
  0x48   :  { %590 = vmatpush1.msra.mxu1 %v270_v11  ;;  %508 = vmatprep.subr.mxu0 %v205_v12  ;;  %v302_v11 = vld [vmem:[%s2014_s1 + $0x7e0] sm:$0xff]  ;;  %v237_v12 = vld [vmem:[%s2014_s1 + $0x5d8] sm:$0xff] }
  0x49   :  { %591 = vmatprep.subr.mxu1 %v269_v13  ;;  %509 = vmatpush1.msra.mxu0 %v204_v14  ;;  %v301_v13 = vld [vmem:[%s2014_s1 + $0x7d8] sm:$0xff]  ;;  %v236_v14 = vld [vmem:[%s2014_s1 + $0x5d0] sm:$0xff] }
  0x4a   :  { %592 = vmatpush1.msra.mxu1 %v268_v15  ;;  %510 = vmatprep.subr.mxu0 %v203_v16  ;;  %v300_v15 = vld [vmem:[%s2014_s1 + $0x7d0] sm:$0xff]  ;;  %v235_v16 = vld [vmem:[%s2014_s1 + $0x5c8] sm:$0xff] }
  0x4b   :  { %593 = vmatprep.subr.mxu1 %v267_v17  ;;  %511 = vmatpush1.msra.mxu0 %v202_v18  ;;  %v299_v17 = vld [vmem:[%s2014_s1 + $0x7c8] sm:$0xff]  ;;  %v234_v18 = vld [vmem:[%s2014_s1 + $0x5c0] sm:$0xff] }
  0x4c   :  { %594 = vmatpush1.msra.mxu1 %v266_v19  ;;  %512 = vmatprep.subr.mxu0 %v201_v20  ;;  %v298_v19 = vld [vmem:[%s2014_s1 + $0x7c0] sm:$0xff]  ;;  %v233_v20 = vld [vmem:[%s2014_s1 + $0x5b8] sm:$0xff] }
  0x4d   :  { %595 = vmatprep.subr.mxu1 %v265_v21  ;;  %513 = vmatpush1.msra.mxu0 %v200_v22  ;;  %v297_v21 = vld [vmem:[%s2014_s1 + $0x7b8] sm:$0xff]  ;;  %v232_v22 = vld [vmem:[%s2014_s1 + $0x5b0] sm:$0xff] }
  0x4e   :  { %596 = vmatpush1.msra.mxu1 %v264_v23  ;;  %514 = vmatprep.subr.mxu0 %v199_v24  ;;  %v296_v23 = vld [vmem:[%s2014_s1 + $0x7b0] sm:$0xff]  ;;  %v231_v24 = vld [vmem:[%s2014_s1 + $0x5a8] sm:$0xff] }
  0x4f   :  { %597 = vmatprep.subr.mxu1 %v263_v25  ;;  %515 = vmatpush1.msra.mxu0 %v198_v26  ;;  %v295_v25 = vld [vmem:[%s2014_s1 + $0x7a8] sm:$0xff]  ;;  %v230_v26 = vld [vmem:[%s2014_s1 + $0x5a0] sm:$0xff] }
  0x50   :  { %598 = vmatpush1.msra.mxu1 %v262_v27  ;;  %516 = vmatprep.subr.mxu0 %v197_v28  ;;  %v294_v27 = vld [vmem:[%s2014_s1 + $0x7a0] sm:$0xff]  ;;  %v229_v28 = vld [vmem:[%s2014_s1 + $0x598] sm:$0xff] }
  0x51   :  { %599 = vmatprep.subr.mxu1 %v261_v29  ;;  %517 = vmatpush1.msra.mxu0 %v196_v30  ;;  %v293_v29 = vld [vmem:[%s2014_s1 + $0x798] sm:$0xff]  ;;  %v228_v30 = vld [vmem:[%s2014_s1 + $0x590] sm:$0xff] }
  0x52   :  { %600 = vmatpush1.msra.mxu1 %v260_v31  ;;  %518 = vmatprep.subr.mxu0 %v195_v32  ;;  %v292_v31 = vld [vmem:[%s2014_s1 + $0x790] sm:$0xff]  ;;  %v227_v32 = vld [vmem:[%s2014_s1 + $0x588] sm:$0xff] }
  0x53   :  { %601 = vmatprep.subr.mxu1 %v259_v33  ;;  %519 = vmatpush1.msra.mxu0 %v194_v34  ;;  %v291_v33 = vld [vmem:[%s2014_s1 + $0x788] sm:$0xff]  ;;  %v226_v34 = vld [vmem:[%s2014_s1 + $0x580] sm:$0xff] }
  0x54   :  { %602 = vmatpush1.msra.mxu1 %v258_v35  ;;  %520 = vmatprep.subr.mxu0 %v193_v36  ;;  %v290_v35 = vld [vmem:[%s2014_s1 + $0x780] sm:$0xff]  ;;  %v225_v36 = vld [vmem:[%s2014_s1 + $0x578] sm:$0xff] }
  0x55   :  { %603 = vmatprep.subr.mxu1 %v257_v37  ;;  %521 = vmatpush1.msra.mxu0 %v192_v38  ;;  %v289_v37 = vld [vmem:[%s2014_s1 + $0x778] sm:$0xff]  ;;  %v224_v38 = vld [vmem:[%s2014_s1 + $0x570] sm:$0xff] }
  0x56   :  { %604 = vmatpush1.msra.mxu1 %v256_v39  ;;  %522 = vmatprep.subr.mxu0 %v191_v40  ;;  %v288_v39 = vld [vmem:[%s2014_s1 + $0x770] sm:$0xff]  ;;  %v223_v40 = vld [vmem:[%s2014_s1 + $0x568] sm:$0xff] }
  0x57   :  { %605 = vmatprep.subr.mxu1 %v255_v41  ;;  %523 = vmatpush1.msra.mxu0 %v190_v42  ;;  %v287_v41 = vld [vmem:[%s2014_s1 + $0x768] sm:$0xff]  ;;  %v222_v42 = vld [vmem:[%s2014_s1 + $0x560] sm:$0xff] }
  0x58   :  { %606 = vmatpush1.msra.mxu1 %v254_v43  ;;  %524 = vmatprep.subr.mxu0 %v189_v44  ;;  %v286_v43 = vld [vmem:[%s2014_s1 + $0x760] sm:$0xff]  ;;  %v221_v44 = vld [vmem:[%s2014_s1 + $0x558] sm:$0xff] }
  0x59   :  { %607 = vmatprep.subr.mxu1 %v253_v45  ;;  %525 = vmatpush1.msra.mxu0 %v188_v46  ;;  %v33_v45 = vld [vmem:[%s2015_s0 + $0x50] sm:$0xff] }
  0x5a   :  { %608 = vmatpush1.msra.mxu1 %v252_v47  ;;  %526 = vmatprep.subr.mxu0 %v187_v48  ;;  %v220_v46 = vld [vmem:[%s2014_s1 + $0x550] sm:$0xff]  ;;  %v35_v47 = vld [vmem:[%s2015_s0 + $0x60] sm:$0xff]  ;;  %v219_v48 = vld [vmem:[%s2014_s1 + $0x548] sm:$0xff] }
  0x5b   :  { %609 = vmatprep.subr.mxu1 %v251_v49  ;;  %527 = vmatpush1.msra.mxu0 %v186_v50  ;;  %v285_v49 = vld [vmem:[%s2014_s1 + $0x758] sm:$0xff]  ;;  %v32_v50 = vld [vmem:[%s2015_s0 + $0x48] sm:$0xff] }
  0x5c   :  { %610 = vmatpush1.msra.mxu1 %v250_v51  ;;  %528 = vmatprep.subr.mxu0 %v185_v52  ;;  %v34_v51 = vld [vmem:[%s2015_s0 + $0x58] sm:$0xff]  ;;  %v218_v52 = vld [vmem:[%s2014_s1 + $0x540] sm:$0xff] }
  0x5d   :  { %611 = vmatprep.subr.mxu1 %v249_v53  ;;  %529 = vmatpush1.msra.mxu0 %v184_v54  ;;  %v284_v53 = vld [vmem:[%s2014_s1 + $0x750] sm:$0xff]  ;;  %v217_v54 = vld [vmem:[%s2014_s1 + $0x538] sm:$0xff] }
  0x5e   :  { %612 = vmatpush1.msra.mxu1 %v248_v55  ;;  %530 = vmatprep.subr.mxu0 %v183_v56  ;;  %v283_v55 = vld [vmem:[%s2014_s1 + $0x748] sm:$0xff]  ;;  %v216_v56 = vld [vmem:[%s2014_s1 + $0x530] sm:$0xff] }
  0x5f   :  { %613 = vmatprep.subr.mxu1 %v247_v57  ;;  %531 = vmatpush1.msra.mxu0 %v182_v58  ;;  %v282_v57 = vld [vmem:[%s2014_s1 + $0x740] sm:$0xff]  ;;  %v42_v58 = vld [vmem:[%s2015_s0 + $0x98] sm:$0x3] }
  0x60   :  { %614 = vmatpush1.msra.mxu1 %v246_v59  ;;  %532 = vmatprep.subr.mxu0 %v181_v60  ;;  %v44_v59 = vld [vmem:[%s2015_s0 + $0xa8] sm:$0x3] }
  0x61   :  { %615 = vmatprep.subr.mxu1 %v245_v61  ;;  %533 = vmatpush1.msra.mxu0 %v180_v62  ;;  %v215_v60 = vld [vmem:[%s2014_s1 + $0x528] sm:$0xff]  ;;  %v281_v61 = vld [vmem:[%s2014_s1 + $0x738] sm:$0xff]  ;;  %v41_v62 = vld [vmem:[%s2015_s0 + $0x90] sm:$0x3] }
  0x62   :  { %616 = vmatpush1.msra.mxu1 %v244_v63  ;;  %534 = vmatprep.subr.mxu0 %v179_v0  ;;  %v43_v63 = vld [vmem:[%s2015_s0 + $0xa0] sm:$0x3] }
  0x63   :  { %617 = vmatprep.subr.mxu1 %v243_v1  ;;  %535 = vmatpush1.msra.mxu0 %v178_v2  ;;  %v214_v0 = vld [vmem:[%s2014_s1 + $0x520] sm:$0xff]  ;;  %v280_v1 = vld [vmem:[%s2014_s1 + $0x730] sm:$0xff]  ;;  %v213_v2 = vld [vmem:[%s2014_s1 + $0x518] sm:$0xff] }
  0x64   :  { %618 = vmatpush1.msra.mxu1 %v242_v3  ;;  %536 = vmatprep.subr.mxu0 %v241_v4  ;;  %v279_v3 = vld [vmem:[%s2014_s1 + $0x728] sm:$0xff]  ;;  %v212_v4 = vld [vmem:[%s2014_s1 + $0x510] sm:$0xff] }
  0x65   :  { %619 = vmatprep.subr.mxu1 %v305_v5  ;;  %537 = vmatpush2.msra.mxu0 %v240_v6  ;;  %v278_v5 = vld [vmem:[%s2014_s1 + $0x720] sm:$0xff]  ;;  %v211_v6 = vld [vmem:[%s2014_s1 + $0x508] sm:$0xff] }
  0x66   :  { %620 = vmatpush2.msra.mxu1 %v304_v7  ;;  %538 = vmatprep.subr.mxu0 %v239_v8  ;;  %v277_v7 = vld [vmem:[%s2014_s1 + $0x718] sm:$0xff]  ;;  %v210_v8 = vld [vmem:[%s2014_s1 + $0x500] sm:$0xff] }
  0x67   :  { %621 = vmatprep.subr.mxu1 %v303_v9  ;;  %539 = vmatpush2.msra.mxu0 %v238_v10  ;;  %v28_v9 = vld [vmem:[%s2015_s0 + $0x28] sm:$0xff]  ;;  %v276_v10 = vld [vmem:[%s2014_s1 + $0x710] sm:$0xff] }
  0x68   :  { %622 = vmatpush2.msra.mxu1 %v302_v11  ;;  %540 = vmatprep.subr.mxu0 %v237_v12  ;;  %v27_v11 = vld [vmem:[%s2015_s0 + $0x20] sm:$0xff]  ;;  %v275_v12 = vld [vmem:[%s2014_s1 + $0x708] sm:$0xff] }
  0x69   :  { %623 = vmatprep.subr.mxu1 %v301_v13  ;;  %541 = vmatpush2.msra.mxu0 %v236_v14  ;;  %v337_v13 = vld [vmem:[%s2014_s1 + $0x8f8] sm:$0xff]  ;;  %v274_v14 = vld [vmem:[%s2014_s1 + $0x700] sm:$0xff] }
  0x6a   :  { %624 = vmatpush2.msra.mxu1 %v300_v15  ;;  %542 = vmatprep.subr.mxu0 %v235_v16  ;;  %v30_v15 = vld [vmem:[%s2015_s0 + $0x38] sm:$0xff]  ;;  %v336_v16 = vld [vmem:[%s2014_s1 + $0x8f0] sm:$0xff] }
  0x6b   :  { %625 = vmatprep.subr.mxu1 %v299_v17  ;;  %543 = vmatpush2.msra.mxu0 %v234_v18  ;;  %v29_v17 = vld [vmem:[%s2015_s0 + $0x30] sm:$0xff]  ;;  %v335_v18 = vld [vmem:[%s2014_s1 + $0x8e8] sm:$0xff] }
  0x6c   :  { %626 = vmatpush2.msra.mxu1 %v298_v19  ;;  %544 = vmatprep.subr.mxu0 %v233_v20  ;;  %v37_v19 = vld [vmem:[%s2015_s0 + $0x70] sm:$0xff]  ;;  %v334_v20 = vld [vmem:[%s2014_s1 + $0x8e0] sm:$0xff] }
  0x6d   :  { %627 = vmatprep.subr.mxu1 %v297_v21  ;;  %545 = vmatpush2.msra.mxu0 %v232_v22  ;;  %v39_v21 = vld [vmem:[%s2015_s0 + $0x80] sm:$0xff]  ;;  %v36_v22 = vld [vmem:[%s2015_s0 + $0x68] sm:$0xff] }
  0x6e   :  { %628 = vmatpush2.msra.mxu1 %v296_v23  ;;  %546 = vmatprep.subr.mxu0 %v231_v24  ;;  %v333_v23 = vld [vmem:[%s2014_s1 + $0x8d8] sm:$0xff]  ;;  %v332_v24 = vld [vmem:[%s2014_s1 + $0x8d0] sm:$0xff] }
  0x6f   :  { %629 = vmatprep.subr.mxu1 %v295_v25  ;;  %547 = vmatpush2.msra.mxu0 %v230_v26  ;;  %v38_v25 = vld [vmem:[%s2015_s0 + $0x78] sm:$0xff]  ;;  %v331_v26 = vld [vmem:[%s2014_s1 + $0x8c8] sm:$0xff] }
  0x70   :  { %630 = vmatpush2.msra.mxu1 %v294_v27  ;;  %548 = vmatprep.subr.mxu0 %v229_v28  ;;  %v46_v27 = vld [vmem:[%s2015_s0 + $0xb8] sm:$0x3]  ;;  %v330_v28 = vld [vmem:[%s2014_s1 + $0x8c0] sm:$0xff] }
  0x71   :  { %631 = vmatprep.subr.mxu1 %v293_v29  ;;  %549 = vmatpush2.msra.mxu0 %v228_v30  ;;  %v48_v29 = vld [vmem:[%s2015_s0 + $0xc8] sm:$0x3]  ;;  %v45_v30 = vld [vmem:[%s2015_s0 + $0xb0] sm:$0x3] }
  0x72   :  { %632 = vmatpush2.msra.mxu1 %v292_v31  ;;  %550 = vmatprep.subr.mxu0 %v227_v32  ;;  %v329_v31 = vld [vmem:[%s2014_s1 + $0x8b8] sm:$0xff]  ;;  %v328_v32 = vld [vmem:[%s2014_s1 + $0x8b0] sm:$0xff] }
  0x73   :  { %633 = vmatprep.subr.mxu1 %v291_v33  ;;  %551 = vmatpush2.msra.mxu0 %v226_v34  ;;  %v47_v33 = vld [vmem:[%s2015_s0 + $0xc0] sm:$0x3]  ;;  %v327_v34 = vld [vmem:[%s2014_s1 + $0x8a8] sm:$0xff] }
  0x74   :  { %634 = vmatpush2.msra.mxu1 %v290_v35  ;;  %552 = vmatprep.subr.mxu0 %v225_v36  ;;  %v326_v35 = vld [vmem:[%s2014_s1 + $0x8a0] sm:$0xff]  ;;  %v325_v36 = vld [vmem:[%s2014_s1 + $0x898] sm:$0xff] }
  0x75   :  { %635 = vmatprep.subr.mxu1 %v289_v37  ;;  %553 = vmatpush2.msra.mxu0 %v224_v38  ;;  %v324_v37 = vld [vmem:[%s2014_s1 + $0x890] sm:$0xff]  ;;  %v995_v38 = vmov 0.0  }
  0x76   :  { %636 = vmatpush2.msra.mxu1 %v288_v39  ;;  %554 = vmatprep.subr.mxu0 %v223_v40  ;;  %v323_v39 = vld [vmem:[%s2014_s1 + $0x888] sm:$0xff]  ;;  %v322_v40 = vld [vmem:[%s2014_s1 + $0x880] sm:$0xff] }
  0x77   :  { %637 = vmatprep.subr.mxu1 %v287_v41  ;;  %555 = vmatpush2.msra.mxu0 %v222_v42  ;;  %v321_v41 = vld [vmem:[%s2014_s1 + $0x878] sm:$0xff]  ;;  %v320_v42 = vld [vmem:[%s2014_s1 + $0x870] sm:$0xff] }
  0x78   :  { %638 = vmatpush2.msra.mxu1 %v286_v43  ;;  %556 = vmatprep.subr.mxu0 %v221_v44  ;;  %v319_v43 = vld [vmem:[%s2014_s1 + $0x868] sm:$0xff]  ;;  %v318_v44 = vld [vmem:[%s2014_s1 + $0x860] sm:$0xff] }
  0x79   :  { %408 = vmatprep.mubr.f32.mxu0 %v33_v45  ;;  %557 = vmatpush2.msra.mxu0 %v220_v46  ;;  %v317_v45 = vld [vmem:[%s2014_s1 + $0x858] sm:$0xff]  ;;  %v316_v46 = vld [vmem:[%s2014_s1 + $0x850] sm:$0xff] }
  0x7a   :  { %491 = vmatprep.mubr.f32.mxu1 %v35_v47  ;;  %558 = vmatprep.subr.mxu0 %v219_v48  ;;  %v315_v47 = vld [vmem:[%s2014_s1 + $0x848] sm:$0xff]  ;;  %v314_v48 = vld [vmem:[%s2014_s1 + $0x840] sm:$0xff] }
  0x7b   :  { %639 = vmatprep.subr.mxu1 %v285_v49  ;;  %409 = vmatmul.mubr.f32.gmra.mxu0 %v32_v50  ;;  %v313_v49 = vld [vmem:[%s2014_s1 + $0x838] sm:$0xff]  ;;  %v312_v50 = vld [vmem:[%s2014_s1 + $0x830] sm:$0xff] }
  0x7c   :  { %492 = vmatmul.mubr.f32.gmra.mxu1 %v34_v51  ;;  %559 = vmatpush2.msra.mxu0 %v218_v52  ;;  %v311_v51 = vld [vmem:[%s2014_s1 + $0x828] sm:$0xff]  ;;  %v310_v52 = vld [vmem:[%s2014_s1 + $0x820] sm:$0xff] }
  0x7d   :  { %640 = vmatpush2.msra.mxu1 %v284_v53  ;;  %560 = vmatprep.subr.mxu0 %v217_v54  ;;  %v309_v53 = vld [vmem:[%s2014_s1 + $0x818] sm:$0xff]  ;;  %v308_v54 = vld [vmem:[%s2014_s1 + $0x810] sm:$0xff] }
  0x7e   :  { %641 = vmatprep.subr.mxu1 %v283_v55  ;;  %561 = vmatpush2.msra.mxu0 %v216_v56  ;;  %v307_v55 = vld [vmem:[%s2014_s1 + $0x808] sm:$0xff]  ;;  %v306_v56 = vld [vmem:[%s2014_s1 + $0x800] sm:$0xff] }
  0x7f   :  { %642 = vmatpush2.msra.mxu1 %v282_v57  ;;  %414 = vmatprep.mubr.f32.mxu0 %v42_v58  ;;  %v31_v57 = vld [vmem:[%s2015_s0 + $0x40] sm:$0xff]  ;;  %v40_v58 = vld [vmem:[%s2015_s0 + $0x88] sm:$0xff] }
  0x80   :  { %497 = vmatprep.mubr.f32.mxu1 %v44_v59  ;;  %562 = vmatprep.subr.mxu0 %v215_v60  ;;  %v49_v59 = vld [vmem:[%s2015_s0 + $0xd0] sm:$0x3] }
  0x81   :  { %643 = vmatprep.subr.mxu1 %v281_v61  ;;  %415 = vmatmul.mubr.f32.gmra.mxu0 %v41_v62 }
  0x82   :  { %498 = vmatmul.mubr.f32.gmra.mxu1 %v43_v63  ;;  %563 = vmatpush2.msra.mxu0 %v214_v0 }
  0x83   :  { %644 = vmatpush2.msra.mxu1 %v280_v1  ;;  %564 = vmatprep.subr.mxu0 %v213_v2 }
  0x84   :  { %645 = vmatprep.subr.mxu1 %v279_v3  ;;  %565 = vmatpush2.msra.mxu0 %v212_v4 }
  0x85   :  { %646 = vmatpush2.msra.mxu1 %v278_v5  ;;  %566 = vmatprep.subr.mxu0 %v211_v6 }
  0x86   :  { %647 = vmatprep.subr.mxu1 %v277_v7  ;;  %567 = vmatpush2.msra.mxu0 %v210_v8 }
  0x87   :  { %568 = vmatprep.mubr.f32.mxu0 %v28_v9  ;;  %648 = vmatpush2.msra.mxu1 %v276_v10 }
  0x88   :  { %569 = vmatmul.mubr.f32.vlgmr.msra.gmra.mxu0 %v27_v11  ;;  %649 = vmatprep.subr.mxu1 %v275_v12 }
  0x89   :  { %670 = vmatprep.subr.mxu0 %v337_v13  ;;  %650 = vmatpush2.msra.mxu1 %v274_v14 }
  0x8a   :  { %651 = vmatprep.mubr.f32.mxu1 %v30_v15  ;;  %671 = vmatpush1.msra.mxu0 %v336_v16 }
  0x8b   :  { %652 = vmatmul.mubr.f32.vlgmr.msra.gmra.mxu1 %v29_v17  ;;  %672 = vmatprep.subr.mxu0 %v335_v18 }
  0x8c   :  { %574 = vmatprep.mubr.f32.mxu0 %v37_v19  ;;  %673 = vmatpush1.msra.mxu0 %v334_v20 }
  0x8d   :  { %657 = vmatprep.mubr.f32.mxu1 %v39_v21  ;;  %575 = vmatmul.mubr.f32.gmra.mxu0 %v36_v22 }
  0x8e   :  { %674 = vmatprep.subr.mxu0 %v333_v23  ;;  %580 = vmatprep.mubr.f32.mxu0 %v46_v27 }
  0x8f   :  { %675 = vmatpush1.msra.mxu0 %v332_v24  ;;  %658 = vmatmul.mubr.f32.gmra.mxu1 %v38_v25 }
  0x90   :  { %676 = vmatprep.subr.mxu0 %v331_v26  ;;  %663 = vmatprep.mubr.f32.mxu1 %v48_v29 }
  0x91   :  { %677 = vmatpush1.msra.mxu0 %v330_v28 }
  0x92   :  { %581 = vmatmul.mubr.f32.gmra.mxu0 %v45_v30  ;;  %678 = vmatprep.subr.mxu0 %v329_v31 }
  0x93   :  { %679 = vmatpush1.msra.mxu0 %v328_v32  ;;  %664 = vmatmul.mubr.f32.gmra.mxu1 %v47_v33 }
  0x94   :  { %680 = vmatprep.subr.mxu0 %v327_v34  ;;  %734 = vmatprep.mubr.f32.mxu0 %v995_v38 }
  0x95   :  { %681 = vmatpush1.msra.mxu0 %v326_v35  ;;  %958 = vmatprep.mubr.f32.mxu1 %v995_v38 }
  0x96   :  { %682 = vmatprep.subr.mxu0 %v325_v36 }
  0x97   :  { %683 = vmatpush1.msra.mxu0 %v324_v37 }
  0x98   :  { %684 = vmatprep.subr.mxu0 %v323_v39 }
  0x99   :  { %685 = vmatpush1.msra.mxu0 %v322_v40 }
  0x9a   :  { %686 = vmatprep.subr.mxu0 %v321_v41 }
  0x9b   :  { %687 = vmatpush1.msra.mxu0 %v320_v42 }
  0x9c   :  { %688 = vmatprep.subr.mxu0 %v319_v43 }
  0x9d   :  { %689 = vmatpush1.msra.mxu0 %v318_v44 }
  0x9e   :  { %690 = vmatprep.subr.mxu0 %v317_v45 }
  0x9f   :  { %691 = vmatpush1.msra.mxu0 %v316_v46 }
  0xa0   :  { %692 = vmatprep.subr.mxu0 %v315_v47 }
  0xa1   :  { %693 = vmatpush1.msra.mxu0 %v314_v48 }
  0xa2   :  { %694 = vmatprep.subr.mxu0 %v313_v49 }
  0xa3   :  { %695 = vmatpush1.msra.mxu0 %v312_v50 }
  0xa4   :  { %696 = vmatprep.subr.mxu0 %v311_v51 }
  0xa5   :  { %697 = vmatpush1.msra.mxu0 %v310_v52 }
  0xa6   :  { %698 = vmatprep.subr.mxu0 %v309_v53 }
  0xa7   :  { %699 = vmatpush1.msra.mxu0 %v308_v54 }
  0xa8   :  { %700 = vmatprep.subr.mxu0 %v307_v55 }
  0xa9   :  { %701 = vmatpush1.msra.mxu0 %v306_v56 }
  0xaa   :  { %735 = vmatmul.mubr.f32.vlgmr.msra.gmra.mxu0 %v31_v57 }
  0xab   :  { %740 = vmatprep.mubr.f32.mxu0 %v995_v38 }
  0xae   :  { %741 = vmatmul.mubr.f32.gmra.mxu0 %v40_v58 }
  0xaf   :  { %746 = vmatprep.mubr.f32.mxu0 %v995_v38 }
  0xb2   :  { %747 = vmatmul.mubr.f32.gmra.mxu0 %v49_v59 }
 0x103   :  { %v404_v60 = vpop.f32.mrf.mxu0 }
 0x104   :  { %v487_v63 = vpop.f32.mrf.mxu1 }
 0x105   :  { %v406_v61 = vpop.f32.mrf.mxu0  ;;  %v488_v19 = vadd.f32 %v487_v63, %v404_v60 }
 0x106   :  { %v489_v1 = vpop.f32.mrf.mxu1 }
 0x107   :  { %v490_v24 = vadd.f32 %v489_v1, %v406_v61 }
 0x13b   :  { %v410_v62 = vpop.f32.mrf.mxu0 }
 0x13c   :  { %v493_v3 = vpop.f32.mrf.mxu1 }
 0x13d   :  { %v412_v0 = vpop.f32.mrf.mxu0  ;;  %v494_v16 = vadd.f32 %v493_v3, %v410_v62 }
 0x13e   :  { %v495_v5 = vpop.f32.mrf.mxu1 }
 0x13f   :  { %v496_v20 = vadd.f32 %v495_v5, %v412_v0 }
 0x141   :  { %v416_v2 = vpop.f32.mrf.mxu0 }
 0x142   :  { %v499_v7 = vpop.f32.mrf.mxu1 }
 0x143   :  { %v418_v4 = vpop.f32.mrf.mxu0  ;;  %v500_v23 = vadd.f32 %v499_v7, %v416_v2 }
 0x144   :  { %v501_v9 = vpop.f32.mrf.mxu1 }
 0x145   :  { %v502_v29 = vadd.f32 %v501_v9, %v418_v4 }
 0x148   :  { %v570_v6 = vpop.f32.mrf.mxu0 }
 0x149   :  { %v571_v25 = vadd.f32 %v570_v6, %v488_v19 }
 0x14a   :  { %v572_v8 = vpop.f32.mrf.mxu0 }
 0x14b   :  { %v653_v10 = vpop.f32.mrf.mxu1  ;;  %v573_v31 = vadd.f32 %v572_v8, %v490_v24 }
 0x14c   :  { %v654_v35 = vadd.f32 %v653_v10, %v571_v25 }
 0x14d   :  { %v576_v11 = vpop.f32.mrf.mxu0  ;;  %v655_v12 = vpop.f32.mrf.mxu1 }
 0x14e   :  { %v577_v21 = vadd.f32 %v576_v11, %v494_v16  ;;  %v656_v41 = vadd.f32 %v655_v12, %v573_v31 }
 0x14f   :  { %v578_v13 = vpop.f32.mrf.mxu0  ;;  %v659_v14 = vpop.f32.mrf.mxu1 }
 0x150   :  { %v579_v26 = vadd.f32 %v578_v13, %v496_v20  ;;  %v660_v32 = vadd.f32 %v659_v14, %v577_v21 }
 0x151   :  { %v661_v17 = vpop.f32.mrf.mxu1 }
 0x152   :  { %v582_v15 = vpop.f32.mrf.mxu0  ;;  %v662_v36 = vadd.f32 %v661_v17, %v579_v26 }
 0x153   :  { %v665_v27 = vpop.f32.mrf.mxu1  ;;  %v583_v30 = vadd.f32 %v582_v15, %v500_v23 }
 0x154   :  { %v584_v18 = vpop.f32.mrf.mxu0 }
 0x155   :  { %v585_v34 = vadd.f32 %v584_v18, %v502_v29  ;;  %v667_v37 = vpop.f32.mrf.mxu1  ;;  %v666_v40 = vadd.f32 %v665_v27, %v583_v30 }
 0x157   :  { %v668_v45 = vadd.f32 %v667_v37, %v585_v34 }
 0x16a   :  { %v736_v22 = vpop.f32.mrf.mxu0 }
 0x16b   :  { %v737_v42 = vadd.f32 %v736_v22, %v654_v35 }
 0x16c   :  { %v738_v28 = vpop.f32.mrf.mxu0 }
 0x16d   :  { %v739_v47 = vadd.f32 %v738_v28, %v656_v41 }
 0x16e   :  { %v742_v33 = vpop.f32.mrf.mxu0 }
 0x16f   :  { %v743_v38 = vadd.f32 %v742_v33, %v660_v32 }
 0x170   :  { %v744_v39 = vpop.f32.mrf.mxu0 }
 0x171   :  { %v745_v43 = vadd.f32 %v744_v39, %v662_v36  ;;  %v753_v48 = vadd.f32 %v743_v38, %v737_v42  ;;  %v819_v39 = vlaneseq }
 0x172   :  { %v748_v44 = vpop.f32.mrf.mxu0 }
 0x173   :  { %v749_v46 = vadd.f32 %v748_v44, %v666_v40  ;;  %v763_v52 = vadd.f32 %v745_v43, %v739_v47  ;;  %v820_v41 = vshrl.u32 %v819_v39, 7  ;;  %v835_v44 = vld [vmem:[%s2017_s3] sm:$0x3] }
 0x174   :  { %v750_v49 = vpop.f32.mrf.mxu0 }
 0x175   :  { %v755_v50 = vsel %vm754_vm0, %v749_v46, 0.0  ;;  %v751_v51 = vadd.f32 %v750_v49, %v668_v45  ;;  %v825_v45 = vsub.s32 1, %v820_v41 }
 0x176   :  { %v756_v53 = vadd.f32 %v755_v50, %v753_v48 }
 0x177   :  { %v764_v54 = vsel %vm754_vm0, %v751_v51, 0.0 }
 0x178   :  { %v757_v55 = vrot.slane %v756_v53, 4  ;;  %v765_v56 = vadd.f32 %v764_v54, %v763_v52 }
 0x17a   :  { %v758_v57 = vadd.f32 %v757_v55, %v756_v53  ;;  %v766_v58 = vrot.slane %v765_v56, 4 }
 0x17c   :  { %v759_v59 = vrot.slane %v758_v57, 2  ;;  %v767_v60 = vadd.f32 %v766_v58, %v765_v56  ;;  %v844_v58 = vrot.slane %v835_v44, %v825_v45 }
 0x17e   :  { %v760_v61 = vadd.f32 %v759_v59, %v758_v57  ;;  %v768_v62 = vrot.slane %v767_v60, 2 }
 0x180   :  { %v761_v63 = vrot.slane %v760_v61, 1  ;;  %v769_v0 = vadd.f32 %v768_v62, %v767_v60 }
 0x182   :  { %v762_v1 = vadd.f32 %v761_v63, %v760_v61  ;;  %v770_v2 = vrot.slane %v769_v0, 1 }
 0x184   :  { %v773_v3 = vmul.f32 0.055555556, %v762_v1  ;;  %v771_v4 = vadd.f32 %v770_v2, %v769_v0 }
 0x186   :  { %v775_v5 = vsub.f32 %v737_v42, %v773_v3  ;;  %v777_v6 = vsub.f32 %v743_v38, %v773_v3  ;;  %v779_v7 = vsub.f32 %v749_v46, %v773_v3  ;;  %v774_v8 = vmul.f32 0.055555556, %v771_v4 }
 0x187   :  { %v821_v42 = vsub.s32 0, %v820_v41 }
 0x188   :  { %v781_v9 = vmul.f32 %v775_v5, %v775_v5  ;;  %v783_v10 = vmul.f32 %v777_v6, %v777_v6  ;;  %v785_v11 = vmul.f32 %v779_v7, %v779_v7  ;;  %v776_v12 = vsub.f32 %v739_v47, %v774_v8 }
 0x189   :  { %v778_v13 = vsub.f32 %v745_v43, %v774_v8  ;;  %v780_v14 = vsub.f32 %v751_v51, %v774_v8  ;;  %v817_v43 = vld [vmem:[%s2016_s2] sm:$0x3]  ;;  %v840_v51 = vrot.slane %v835_v44, %v821_v42 }
 0x18a   :  { %v787_v15 = vadd.f32 %v783_v10, %v781_v9  ;;  %v788_v16 = vsel %vm754_vm0, %v785_v11, 0.0  ;;  %v782_v17 = vmul.f32 %v776_v12, %v776_v12  ;;  %v822_v46 = vrot.slane %v817_v43, %v821_v42  ;;  %v875_v8 = vld [vmem:[%s2018_s4 + $0x20] sm:$0x3] }
 0x18b   :  { %v784_v18 = vmul.f32 %v778_v13, %v778_v13  ;;  %v786_v19 = vmul.f32 %v780_v14, %v780_v14  ;;  %v826_v52 = vrot.slane %v817_v43, %v825_v45 }
 0x18c   :  { %v789_v20 = vadd.f32 %v788_v16, %v787_v15  ;;  %v874_v16 = vld [vmem:[%s2018_s4 + $0x18] sm:$0xff] }
 0x18d   :  { %v796_v21 = vadd.f32 %v784_v18, %v782_v17  ;;  %v797_v22 = vsel %vm754_vm0, %v786_v19, 0.0 }
 0x18e   :  { %v790_v23 = vrot.slane %v789_v20, 4 }
 0x18f   :  { %v798_v24 = vadd.f32 %v797_v22, %v796_v21 }
 0x190   :  { %v791_v25 = vadd.f32 %v790_v23, %v789_v20  ;;  %v873_v20 = vld [vmem:[%s2018_s4 + $0x10] sm:$0xff]  ;;  %v872_v23 = vld [vmem:[%s2018_s4 + $0x8] sm:$0xff] }
 0x191   :  { %v799_v26 = vrot.slane %v798_v24, 4 }
 0x192   :  { %v792_v27 = vrot.slane %v791_v25, 2 }
 0x193   :  { %v800_v28 = vadd.f32 %v799_v26, %v798_v24  ;;  %v871_v26 = vld [vmem:[%s2018_s4] sm:$0xff] }
 0x194   :  { %v793_v29 = vadd.f32 %v792_v27, %v791_v25 }
 0x195   :  { %v801_v30 = vrot.slane %v800_v28, 2 }
 0x196   :  { %v794_v31 = vrot.slane %v793_v29, 1 }
 0x197   :  { %v802_v32 = vadd.f32 %v801_v30, %v800_v28  ;;  %v883_v30 = vld [vmem:[%s2019_s5] sm:$0x3] }
 0x198   :  { %v795_v33 = vadd.f32 %v794_v31, %v793_v29 }
 0x199   :  { %v803_v34 = vrot.slane %v802_v32, 1 }
 0x19a   :  { %v805_v35 = vmul.f32 0.055555556, %v795_v33 }
 0x19b   :  { %v804_v36 = vadd.f32 %v803_v34, %v802_v32 }
 0x19c   :  { %v807_v37 = vadd.f32 1e-05, %v805_v35 }
 0x19d   :  { %v806_v38 = vmul.f32 0.055555556, %v804_v36 }
 0x19e   :  { %987 = vrsqrt.f32 %v807_v37 }
 0x19f   :  { %v808_v40 = vadd.f32 1e-05, %v806_v38 }
 0x1a1   :  { %989 = vrsqrt.f32 %v808_v40 }
 0x1ab   :  { %v988_v47 = vpop.eup %987 }
 0x1ac   :  { %v811_v48 = vmul.f32 %v988_v47, %v775_v5  ;;  %v813_v49 = vmul.f32 %v988_v47, %v777_v6  ;;  %v815_v50 = vmul.f32 %v988_v47, %v779_v7  ;;  %v876_v7 = vld [vmem:[%s2018_s4 + $0x28] sm:$0x3] }
 0x1ae   :  { %v990_v53 = vpop.eup %989  ;;  %v833_v54 = vmul.f32 %v822_v46, %v815_v50  ;;  %v831_v55 = vmul.f32 %v822_v46, %v813_v49  ;;  %v829_v56 = vmul.f32 %v822_v46, %v811_v48 }
 0x1af   :  { %v816_v57 = vmul.f32 %v990_v53, %v780_v14  ;;  %v814_v59 = vmul.f32 %v990_v53, %v778_v13  ;;  %v812_v60 = vmul.f32 %v990_v53, %v776_v12 }
 0x1b0   :  { %v851_v61 = vadd.f32 %v840_v51, %v833_v54  ;;  %v849_v62 = vadd.f32 %v840_v51, %v831_v55  ;;  %v847_v2 = vadd.f32 %v840_v51, %v829_v56 }
 0x1b1   :  { %v834_v63 = vmul.f32 %v826_v52, %v816_v57  ;;  %v832_v0 = vmul.f32 %v826_v52, %v814_v59  ;;  %v830_v1 = vmul.f32 %v826_v52, %v812_v60 }
 0x1b2   :  { %v863_v3 = vmul.f32 0.2, %v851_v61  ;;  %vm857_vm1 = vcmp.gt.f32.partialorder %v851_v61, 0.0  ;;  %vm855_vm2 = vcmp.gt.f32.partialorder %v849_v62, 0.0  ;;  %v861_v9 = vmul.f32 0.2, %v849_v62 }
 0x1b3   :  { %v852_v4 = vadd.f32 %v844_v58, %v834_v63  ;;  %v850_v5 = vadd.f32 %v844_v58, %v832_v0  ;;  %v848_v6 = vadd.f32 %v844_v58, %v830_v1  ;;  %v859_v11 = vmul.f32 0.2, %v847_v2 }
 0x1b4   :  { %v869_v12 = vsel %vm857_vm1, %v851_v61, %v863_v3  ;;  %vm853_vm6 = vcmp.gt.f32.partialorder %v847_v2, 0.0  ;;  %v867_v19 = vsel %vm855_vm2, %v849_v62, %v861_v9 }
 0x1b5   :  { %vm858_vm3 = vcmp.gt.f32.partialorder %v852_v4, 0.0  ;;  %v864_v10 = vmul.f32 0.2, %v852_v4  ;;  %vm856_vm4 = vcmp.gt.f32.partialorder %v850_v5, 0.0  ;;  %v862_v13 = vmul.f32 0.2, %v850_v5 }
 0x1b6   :  { %vm854_vm5 = vcmp.gt.f32.partialorder %v848_v6, 0.0  ;;  %v860_v14 = vmul.f32 0.2, %v848_v6  ;;  %v881_v21 = vmul.f32 %v875_v8, %v869_v12  ;;  %v865_v25 = vsel %vm853_vm6, %v847_v2, %v859_v11 }
 0x1b7   :  { %v870_v15 = vsel %vm858_vm3, %v852_v4, %v864_v10  ;;  %v868_v18 = vsel %vm856_vm4, %v850_v5, %v862_v13  ;;  %v879_v27 = vmul.f32 %v873_v20, %v867_v19  ;;  %v877_v29 = vmul.f32 %v871_v26, %v865_v25 }
 0x1b8   :  { %v882_v17 = vmul.f32 %v876_v7, %v870_v15  ;;  %v866_v22 = vsel %vm854_vm5, %v848_v6, %v860_v14  ;;  %v880_v24 = vmul.f32 %v874_v16, %v868_v18 }
 0x1b9   :  { %v878_v28 = vmul.f32 %v872_v23, %v866_v22 }
 0x1ba   :  { %982 = vmatprep.subr.msk.mxu1 %vm754_vm0, %v882_v17 }
 0x1bb   :  { %983 = vmatpush1.msk.msra.mxu1 %vm754_vm0, %v881_v21 }
 0x1bc   :  { %922 = vmatprep.subr.mxu1 %v880_v24 }
 0x1bd   :  { %923 = vmatpush1.msra.mxu1 %v879_v27 }
 0x1be   :  { %924 = vmatprep.subr.mxu1 %v878_v28 }
 0x1bf   :  { %925 = vmatpush1.msra.mxu1 %v877_v29 }
 0x1c0   :  { %984 = vmatmul.mubr.msk.f32.vlgmr.msra.gmra.mxu1 %vm884_vm7, %v883_v30 }
 0x280   :  { %v960_v31 = vpop.f32.mrf.mxu1 }
 0x281   :  { %v965_v33 = vsel %vm754_vm0, %v960_v31, 0.0 }
 0x282   :  { %v962_v32 = vpop.f32.mrf.mxu1 }
 0x283   :  { %v966_v34 = vsel %vm754_vm0, %v962_v32, 0.0 }
 0x284   :  { %v967_v35 = vadd.f32 %v966_v34, %v965_v33 }
 0x286   :  { %968 = vadd.xlane.f32.xlu0 %v967_v35 }
 0x30f   :  { %v969_v36 = vpop.xlane.xlu0 %968 }
 0x310   :  { %v985_v37 = vmul.f32 -1.442695, %v969_v36 }
 0x312   :  { %991 = vpow2.f32 %v985_v37 }
 0x31f   :  { %v992_v38 = vpop.eup %991 }
 0x320   :  { %v973_v39 = vadd.f32 1.0, %v992_v38 }
 0x322   :  { %993 = vrcp.f32 %v973_v39 }
 0x32f   :  { %v994_v40 = vpop.eup %993 }
 0x330   :  { %977 = vst.msk [vmem:[%s2020_s6] sm:$0x3] %vm976_vm8, %v994_v40 }

</bundles_post_ra>
